<compile_context>
chip_gen: v5e
topology: v5e:2x2
jax: 0.10.0
libtpu: 0.0.40
codegen_flags: <defaults>
</compile_context>

<pallas_src>
import jax
import jax.numpy as jnp
from jax.experimental import pallas as pl
from jax.experimental.pallas import tpu as pltpu


def _sigmoid(x):
    # One EUP push (tanh) instead of exp + reciprocal.
    return 0.5 * jnp.tanh(0.5 * x) + 0.5


# ---------------------------------------------------------------------------
# Fused kernel: [GRU layer 0] -> [GRU layer 1] -> ... -> Linear -> tanh
# ---------------------------------------------------------------------------
def _make_fused_gru_kernel(num_layers, T, B, D, hidden_sizes):
    L = num_layers

    def kernel(*refs):
        idx = 0
        x_ref = refs[idx]; idx += 1
        wih0_ref = refs[idx]; idx += 1
        bias_refs = refs[idx:idx + 2 * L]; idx += 2 * L       # (b_fold, b_hn)*L
        fcb_ref = refs[idx]; idx += 1
        whh_hbm = refs[idx:idx + L]; idx += L                 # raw HBM refs
        wih_hbm = refs[idx:idx + (L - 1)]; idx += L - 1       # raw HBM refs
        fcw_hbm = refs[idx]; idx += 1                         # raw HBM ref
        out_ref = refs[idx]; idx += 1
        whh_vmem = refs[idx:idx + L]; idx += L
        wih_vmem = refs[idx:idx + (L - 1)]; idx += L - 1
        fcw_vmem = refs[idx]; idx += 1
        gi_vmem = refs[idx:idx + L]; idx += L                 # (T*B, 3H) f32
        seq_vmem = refs[idx:idx + (L - 1)]; idx += L - 1      # (T*B, H)  f32
        dma_sem = refs[idx]; idx += 1

        # ---- kick off ALL big-weight HBM->VMEM DMAs up front ---------------
        s = 0
        whh_cp = []
        for l in range(L):
            cp = pltpu.make_async_copy(whh_hbm[l], whh_vmem[l], dma_sem.at[s])
            cp.start(); whh_cp.append(cp); s += 1
        wih_cp = []
        for l in range(L - 1):
            cp = pltpu.make_async_copy(wih_hbm[l], wih_vmem[l], dma_sem.at[s])
            cp.start(); wih_cp.append(cp); s += 1
        fcw_cp = pltpu.make_async_copy(fcw_hbm, fcw_vmem, dma_sem.at[s]); s += 1
        fcw_cp.start()

        h = None
        for l in range(L):
            H = hidden_sizes[l]
            last = (l == L - 1)
            b_fold = bias_refs[2 * l][...]          # (1, 3H)  f32
            b_hn = bias_refs[2 * l + 1][...]        # (1, H)   f32

            # ---- hoisted input projection for all T timesteps --------------
            if l == 0:
                if D == 1:
                    xv = x_ref[...].astype(jnp.float32)            # (T, B)
                    w_row = wih0_ref[...].astype(jnp.float32)      # (1, 3H)
                    gi = (xv[:, :, None] * w_row[None, :, :]
                          + b_fold[None, :, :]).reshape(T * B, 3 * H)
                else:
                    gi = (jnp.dot(x_ref[...].astype(wih0_ref.dtype),
                                  wih0_ref[...],
                                  preferred_element_type=jnp.float32)
                          + b_fold)
                gi_vmem[0][...] = gi
            else:
                wih_cp[l - 1].wait()                 # weight DMA done by now
                gi_vmem[l][...] = (
                    jnp.dot(seq_vmem[l - 1][...].astype(wih_vmem[l - 1].dtype),
                            wih_vmem[l - 1][...],
                            preferred_element_type=jnp.float32)
                    + b_fold)

            gi_ref = gi_vmem[l]
            whh_ref = whh_vmem[l]

            # ---- serial recurrence: only (B,H)@(H,3H) on the chain ----------
            for t in range(T):
                gi_t = gi_ref[pl.ds(t * B, B), :]                  # (B, 3H)
                if t == 0:
                    # h0 == 0  =>  W_hh @ h0 == 0 (b_hh_{r,z} already folded).
                    rz = _sigmoid(gi_t[:, :2 * H])
                    r = rz[:, :H]
                    z = rz[:, H:]
                    n = jnp.tanh(gi_t[:, 2 * H:] + r * b_hn)
                    h = n - z * n
                else:
                    if t == 1:
                        whh_cp[l].wait()             # hidden weights needed now
                    gh = jnp.dot(h.astype(whh_ref.dtype), whh_ref[...],
                                 preferred_element_type=jnp.float32)
                    rz = _sigmoid(gi_t[:, :2 * H] + gh[:, :2 * H])
                    r = rz[:, :H]
                    z = rz[:, H:]
                    n = jnp.tanh(gi_t[:, 2 * H:] + r * (gh[:, 2 * H:] + b_hn))
                    h = n + z * (h - n)
                if not last:
                    seq_vmem[l][pl.ds(t * B, B), :] = h
            if T == 1:
                whh_cp[l].wait()   # drain DMA even if never used
            # dropout(0.2) between layers: identity in eval mode.

        # ---- final Linear + tanh on the last hidden state only --------------
        fcw_cp.wait()
        y = jnp.dot(h.astype(fcw_vmem.dtype), fcw_vmem[...],
                    preferred_element_type=jnp.float32) + fcb_ref[...]
        out_ref[...] = jnp.tanh(y).astype(out_ref.dtype)

    return kernel


# ---------------------------------------------------------------------------
# Wrapper: builds the single fused pallas_call
# ---------------------------------------------------------------------------
def custom_gru_forward_fn(params, x):
    """x: (B, T, input_size) batch-first, like the PyTorch module."""
    B, T, D = x.shape
    layers = params["gru"]
    fc_w, fc_b = params["fc"]
    num_layers = len(layers)
    hidden_sizes = [w_hh.shape[0] for (_, w_hh, _, _) in layers]
    O = fc_w.shape[1]

    # Time-major input; squeeze the degenerate feature dim so the x tile is a
    # dense (T, B) tile instead of a padding-heavy (B, T, 1) one.
    if D == 1:
        x_in = jnp.transpose(x[:, :, 0], (1, 0))                  # (T, B)
        x_spec = pl.BlockSpec((T, B), lambda i: (0, 0))
    else:
        x_in = jnp.transpose(x, (1, 0, 2)).reshape(T * B, D)      # (T*B, D)
        x_spec = pl.BlockSpec((T * B, D), lambda i: (0, 0))

    inputs = [x_in]
    in_specs = [x_spec]

    # Small arrays (layer-0 input weights + all biases + fc bias): BlockSpec.
    w_ih0 = layers[0][0]
    inputs.append(w_ih0)
    in_specs.append(pl.BlockSpec(w_ih0.shape, lambda i: (0, 0)))
    for (_, _, b_fold, b_hn) in layers:
        inputs += [b_fold, b_hn]
        in_specs += [pl.BlockSpec(b_fold.shape, lambda i: (0, 0)),
                     pl.BlockSpec(b_hn.shape, lambda i: (0, 0))]
    inputs.append(fc_b)
    in_specs.append(pl.BlockSpec(fc_b.shape, lambda i: (0, 0)))

    # Big weights stay in HBM; kernel DMAs them into VMEM scratch so the fetch
    # overlaps layer-0 compute (and avoids double-buffered BlockSpec copies).
    for (_, w_hh, _, _) in layers:
        inputs.append(w_hh)
        in_specs.append(pl.BlockSpec(memory_space=pl.ANY))
    for (w_ih, _, _, _) in layers[1:]:
        inputs.append(w_ih)
        in_specs.append(pl.BlockSpec(memory_space=pl.ANY))
    inputs.append(fc_w)
    in_specs.append(pl.BlockSpec(memory_space=pl.ANY))

    # Scratch: VMEM weight landing buffers, per-layer gate pre-activations,
    # inter-layer hidden sequence, DMA semaphores.
    scratch = []
    for (_, w_hh, _, _) in layers:
        scratch.append(pltpu.VMEM(w_hh.shape, w_hh.dtype))
    for (w_ih, _, _, _) in layers[1:]:
        scratch.append(pltpu.VMEM(w_ih.shape, w_ih.dtype))
    scratch.append(pltpu.VMEM(fc_w.shape, fc_w.dtype))
    for h in hidden_sizes:
        scratch.append(pltpu.VMEM((T * B, 3 * h), jnp.float32))
    for h in hidden_sizes[:-1]:
        scratch.append(pltpu.VMEM((T * B, h), jnp.float32))
    scratch.append(pltpu.SemaphoreType.DMA((2 * num_layers,)))

    return pl.pallas_call(
        _make_fused_gru_kernel(num_layers, T, B, D, hidden_sizes),
        out_shape=jax.ShapeDtypeStruct((B, O), jnp.float32),
        grid=(1,),
        in_specs=in_specs,
        out_specs=pl.BlockSpec((B, O), lambda i: (0, 0)),
        scratch_shapes=scratch,
        compiler_params=pltpu.CompilerParams(
            dimension_semantics=("arbitrary",)),
    )(*inputs)


custom_gru_forward = jax.jit(custom_gru_forward_fn)


# ---------------------------------------------------------------------------
# Parameter init (PyTorch-style uniform(-1/sqrt(H), 1/sqrt(H)), gates r|z|n)
# ---------------------------------------------------------------------------
def init_params(key, input_size, hidden_sizes, output_size,
                weight_dtype=jnp.bfloat16):
    """Weights stored pre-transposed ((D_in,3H)/(H,3H)/(H,O)) in `weight_dtype`
    (bf16: MXU-native).  Biases pre-folded once:
      b_fold = [b_ih_r + b_hh_r, b_ih_z + b_hh_z, b_ih_n]  (into input proj)
      b_hn   = b_hh_n  (kept separate: n-gate uses r * (W_hn h + b_hn))
    """
    params = {"gru": [], "fc": None}
    dims = [input_size] + list(hidden_sizes)
    for d_in, h in zip(dims[:-1], dims[1:]):
        key, k1, k2, k3, k4 = jax.random.split(key, 5)
        bound = 1.0 / (h ** 0.5)
        w_ih = jax.random.uniform(k1, (3 * h, d_in), jnp.float32, -bound, bound)
        w_hh = jax.random.uniform(k2, (3 * h, h), jnp.float32, -bound, bound)
        b_ih = jax.random.uniform(k3, (3 * h,), jnp.float32, -bound, bound)
        b_hh = jax.random.uniform(k4, (3 * h,), jnp.float32, -bound, bound)
        b_fold = jnp.concatenate([b_ih[:2 * h] + b_hh[:2 * h], b_ih[2 * h:]])
        params["gru"].append((
            jnp.asarray(w_ih.T, dtype=weight_dtype),        # (d_in, 3h)
            jnp.asarray(w_hh.T, dtype=weight_dtype),        # (h, 3h)
            b_fold[None, :].astype(jnp.float32),            # (1, 3h)
            b_hh[2 * h:][None, :].astype(jnp.float32),      # (1, h)
        ))
    key, k1, k2 = jax.random.split(key, 3)
    h_last = hidden_sizes[-1]
    bound = 1.0 / (h_last ** 0.5)
    fc_w = jax.random.uniform(k1, (output_size, h_last), jnp.float32, -bound, bound)
    fc_b = jax.random.uniform(k2, (output_size,), jnp.float32, -bound, bound)
    params["fc"] = (jnp.asarray(fc_w.T, dtype=weight_dtype),    # (h_last, O)
                    fc_b[None, :].astype(jnp.float32))          # (1, O)
    return params


# ---------------------------------------------------------------------------
# Pure-JAX reference (float32 math, same stored params) for a sanity check
# ---------------------------------------------------------------------------
def reference_forward(params, x):
    B, T, _ = x.shape
    out = x.astype(jnp.float32)
    for (w_ih, w_hh, b_fold, b_hn) in params["gru"]:
        w_ih = w_ih.astype(jnp.float32)
        w_hh = w_hh.astype(jnp.float32)
        H = w_hh.shape[0]
        h = jnp.zeros((B, H), jnp.float32)
        seq = []
        for t in range(T):
            gi = out[:, t, :] @ w_ih + b_fold[0]
            gh = h @ w_hh
            r = jax.nn.sigmoid(gi[:, :H] + gh[:, :H])
            z = jax.nn.sigmoid(gi[:, H:2 * H] + gh[:, H:2 * H])
            n = jnp.tanh(gi[:, 2 * H:] + r * (gh[:, 2 * H:] + b_hn[0]))
            h = (1.0 - z) * n + z * h
            seq.append(h)
        out = jnp.stack(seq, axis=1)
    fc_w, fc_b = params["fc"]
    return jnp.tanh(out[:, -1, :] @ fc_w.astype(jnp.float32) + fc_b[0])


if __name__ == "__main__":
    key = jax.random.PRNGKey(0)
    kx, kp = jax.random.split(key)

    # Small shapes consistent with the module (input_size=1, stacked GRU, fc=140)
    B, T = 8, 8
    input_size = 1
    hidden_sizes = [128, 128]          # small stand-in for [512, 512]
    output_size = 140

    x = jax.random.normal(kx, (B, T, input_size), dtype=jnp.float32)
    params = init_params(kp, input_size, hidden_sizes, output_size)

    out = jax.block_until_ready(custom_gru_forward(params, x))

    assert out.shape == (B, output_size), out.shape
    assert bool(jnp.all(jnp.isfinite(out)))
    assert bool(jnp.all(jnp.abs(out) <= 1.0))        # tanh output range

    ref = reference_forward(params, x)
    err = float(jnp.max(jnp.abs(out - ref)))
    assert err < 5e-2, f"max |err| vs reference = {err}"

    print("KERNEL_OK")
</pallas_src>

<mosaic_0001>
module attributes {stable_mosaic.version = 11 : i64} {
  func.func @kernel(%arg0: i32, %arg1: memref<8x8xf32, #tpu.memory_space<vmem>>, %arg2: memref<1x384xbf16, #tpu.memory_space<vmem>>, %arg3: memref<1x384xf32, #tpu.memory_space<vmem>>, %arg4: memref<1x128xf32, #tpu.memory_space<vmem>>, %arg5: memref<1x384xf32, #tpu.memory_space<vmem>>, %arg6: memref<1x128xf32, #tpu.memory_space<vmem>>, %arg7: memref<1x140xf32, #tpu.memory_space<vmem>>, %arg8: memref<128x384xbf16, #tpu.memory_space<any>>, %arg9: memref<128x384xbf16, #tpu.memory_space<any>>, %arg10: memref<128x384xbf16, #tpu.memory_space<any>>, %arg11: memref<128x140xbf16, #tpu.memory_space<any>>, %arg12: memref<8x140xf32, #tpu.memory_space<vmem>>, %arg13: memref<128x384xbf16, #tpu.memory_space<vmem>>, %arg14: memref<128x384xbf16, #tpu.memory_space<vmem>>, %arg15: memref<128x384xbf16, #tpu.memory_space<vmem>>, %arg16: memref<128x140xbf16, #tpu.memory_space<vmem>>, %arg17: memref<64x384xf32, #tpu.memory_space<vmem>>, %arg18: memref<64x384xf32, #tpu.memory_space<vmem>>, %arg19: memref<64x128xf32, #tpu.memory_space<vmem>>, %arg20: memref<4x!tpu.dma_semaphore, #tpu.memory_space<semaphore_mem>>) attributes {dimension_semantics = [#tpu.dimension_semantics<arbitrary>], iteration_bounds = array<i64: 1>, scalar_prefetch = 0 : i64, scratch_operands = 8 : i64, tpu.core_type = #tpu.core_type<tc>, window_params = [{pipeline_mode = #tpu.pipeline_mode<synchronous>, transform_indices = @transform_0, window_bounds = array<i64: 8, 8>}, {pipeline_mode = #tpu.pipeline_mode<synchronous>, transform_indices = @transform_1, window_bounds = array<i64: 1, 384>}, {pipeline_mode = #tpu.pipeline_mode<synchronous>, transform_indices = @transform_2, window_bounds = array<i64: 1, 384>}, {pipeline_mode = #tpu.pipeline_mode<synchronous>, transform_indices = @transform_3, window_bounds = array<i64: 1, 128>}, {pipeline_mode = #tpu.pipeline_mode<synchronous>, transform_indices = @transform_4, window_bounds = array<i64: 1, 384>}, {pipeline_mode = #tpu.pipeline_mode<synchronous>, transform_indices = @transform_5, window_bounds = array<i64: 1, 128>}, {pipeline_mode = #tpu.pipeline_mode<synchronous>, transform_indices = @transform_6, window_bounds = array<i64: 1, 140>}, {}, {}, {}, {}, {pipeline_mode = #tpu.pipeline_mode<synchronous>, transform_indices = @transform_11, window_bounds = array<i64: 8, 140>}]} {
    %c0_i32 = arith.constant 0 : i32
    %0 = tpu.memref_slice %arg20[%c0_i32] : memref<4x!tpu.dma_semaphore, #tpu.memory_space<semaphore_mem>> -> memref<1x!tpu.dma_semaphore, #tpu.memory_space<semaphore_mem>>
    %1 = tpu.memref_squeeze %0 : memref<1x!tpu.dma_semaphore, #tpu.memory_space<semaphore_mem>> -> memref<!tpu.dma_semaphore, #tpu.memory_space<semaphore_mem>>
    tpu.enqueue_dma source(%arg8 : memref<128x384xbf16, #tpu.memory_space<any>>) target(%arg13 : memref<128x384xbf16, #tpu.memory_space<vmem>>) target_semaphore(%1 : memref<!tpu.dma_semaphore, #tpu.memory_space<semaphore_mem>>)
    %c1_i32 = arith.constant 1 : i32
    %2 = tpu.memref_slice %arg20[%c1_i32] : memref<4x!tpu.dma_semaphore, #tpu.memory_space<semaphore_mem>> -> memref<1x!tpu.dma_semaphore, #tpu.memory_space<semaphore_mem>>
    %3 = tpu.memref_squeeze %2 : memref<1x!tpu.dma_semaphore, #tpu.memory_space<semaphore_mem>> -> memref<!tpu.dma_semaphore, #tpu.memory_space<semaphore_mem>>
    tpu.enqueue_dma source(%arg9 : memref<128x384xbf16, #tpu.memory_space<any>>) target(%arg14 : memref<128x384xbf16, #tpu.memory_space<vmem>>) target_semaphore(%3 : memref<!tpu.dma_semaphore, #tpu.memory_space<semaphore_mem>>)
    %c2_i32 = arith.constant 2 : i32
    %4 = tpu.memref_slice %arg20[%c2_i32] : memref<4x!tpu.dma_semaphore, #tpu.memory_space<semaphore_mem>> -> memref<1x!tpu.dma_semaphore, #tpu.memory_space<semaphore_mem>>
    %5 = tpu.memref_squeeze %4 : memref<1x!tpu.dma_semaphore, #tpu.memory_space<semaphore_mem>> -> memref<!tpu.dma_semaphore, #tpu.memory_space<semaphore_mem>>
    tpu.enqueue_dma source(%arg10 : memref<128x384xbf16, #tpu.memory_space<any>>) target(%arg15 : memref<128x384xbf16, #tpu.memory_space<vmem>>) target_semaphore(%5 : memref<!tpu.dma_semaphore, #tpu.memory_space<semaphore_mem>>)
    %c3_i32 = arith.constant 3 : i32
    %6 = tpu.memref_slice %arg20[%c3_i32] : memref<4x!tpu.dma_semaphore, #tpu.memory_space<semaphore_mem>> -> memref<1x!tpu.dma_semaphore, #tpu.memory_space<semaphore_mem>>
    %7 = tpu.memref_squeeze %6 : memref<1x!tpu.dma_semaphore, #tpu.memory_space<semaphore_mem>> -> memref<!tpu.dma_semaphore, #tpu.memory_space<semaphore_mem>>
    tpu.enqueue_dma source(%arg11 : memref<128x140xbf16, #tpu.memory_space<any>>) target(%arg16 : memref<128x140xbf16, #tpu.memory_space<vmem>>) target_semaphore(%7 : memref<!tpu.dma_semaphore, #tpu.memory_space<semaphore_mem>>)
    %c0 = arith.constant 0 : index
    %c0_0 = arith.constant 0 : index
    %8 = vector.load %arg3[%c0, %c0_0] : memref<1x384xf32, #tpu.memory_space<vmem>>, vector<1x384xf32>
    %c0_1 = arith.constant 0 : index
    %c0_2 = arith.constant 0 : index
    %9 = vector.load %arg4[%c0_1, %c0_2] : memref<1x128xf32, #tpu.memory_space<vmem>>, vector<1x128xf32>
    %c0_3 = arith.constant 0 : index
    %c0_4 = arith.constant 0 : index
    %10 = vector.load %arg1[%c0_3, %c0_4] : memref<8x8xf32, #tpu.memory_space<vmem>>, vector<8x8xf32>
    %c0_5 = arith.constant 0 : index
    %c0_6 = arith.constant 0 : index
    %11 = vector.load %arg2[%c0_5, %c0_6] : memref<1x384xbf16, #tpu.memory_space<vmem>>, vector<1x384xbf16>
    %12 = arith.extf %11 : vector<1x384xbf16> to vector<1x384xf32>
    %13 = vector.shape_cast %10 : vector<8x8xf32> to vector<8x8x1xf32>
    %14 = vector.shape_cast %12 : vector<1x384xf32> to vector<1x1x384xf32>
    %15 = vector.broadcast %13 : vector<8x8x1xf32> to vector<8x8x384xf32>
    %16 = vector.broadcast %14 : vector<1x1x384xf32> to vector<8x8x384xf32>
    %17 = arith.mulf %15, %16 : vector<8x8x384xf32>
    %18 = vector.shape_cast %8 : vector<1x384xf32> to vector<1x1x384xf32>
    %19 = vector.broadcast %18 : vector<1x1x384xf32> to vector<8x8x384xf32>
    %20 = arith.addf %17, %19 : vector<8x8x384xf32>
    %21 = vector.shape_cast %20 : vector<8x8x384xf32> to vector<64x384xf32>
    %c0_7 = arith.constant 0 : index
    %c0_8 = arith.constant 0 : index
    %22 = vector.load %arg17[%c0_7, %c0_8] : memref<64x384xf32, #tpu.memory_space<vmem>>, vector<64x384xf32>
    tpu.vector_store %arg17[%c0_7, %c0_8], %21 {strides = array<i32>} : memref<64x384xf32, #tpu.memory_space<vmem>>, vector<64x384xf32>,
    %c0_9 = arith.constant 0 : index
    %c0_10 = arith.constant 0 : index
    %23 = vector.load %arg17[%c0_9, %c0_10] : memref<64x384xf32, #tpu.memory_space<vmem>>, vector<8x384xf32>
    %24 = vector.extract_strided_slice %23 {offsets = [0, 0], sizes = [8, 256], strides = [1, 1]} : vector<8x384xf32> to vector<8x256xf32>
    %cst = arith.constant 5.000000e-01 : f32
    %25 = vector.broadcast %cst : f32 to vector<8x256xf32>
    %26 = arith.mulf %25, %24 : vector<8x256xf32>
    %27 = math.tanh %26 : vector<8x256xf32>
    %cst_11 = arith.constant 5.000000e-01 : f32
    %28 = vector.broadcast %cst_11 : f32 to vector<8x256xf32>
    %29 = arith.mulf %28, %27 : vector<8x256xf32>
    %cst_12 = arith.constant 5.000000e-01 : f32
    %30 = vector.broadcast %cst_12 : f32 to vector<8x256xf32>
    %31 = arith.addf %29, %30 : vector<8x256xf32>
    %32 = vector.extract_strided_slice %31 {offsets = [0, 0], sizes = [8, 128], strides = [1, 1]} : vector<8x256xf32> to vector<8x128xf32>
    %33 = vector.extract_strided_slice %31 {offsets = [0, 128], sizes = [8, 128], strides = [1, 1]} : vector<8x256xf32> to vector<8x128xf32>
    %34 = vector.extract_strided_slice %23 {offsets = [0, 256], sizes = [8, 128], strides = [1, 1]} : vector<8x384xf32> to vector<8x128xf32>
    %35 = vector.broadcast %9 : vector<1x128xf32> to vector<8x128xf32>
    %36 = arith.mulf %32, %35 : vector<8x128xf32>
    %37 = arith.addf %34, %36 : vector<8x128xf32>
    %38 = math.tanh %37 : vector<8x128xf32>
    %39 = arith.mulf %33, %38 : vector<8x128xf32>
    %40 = arith.subf %38, %39 : vector<8x128xf32>
    %c0_13 = arith.constant 0 : index
    %c0_14 = arith.constant 0 : index
    %41 = vector.load %arg19[%c0_13, %c0_14] : memref<64x128xf32, #tpu.memory_space<vmem>>, vector<8x128xf32>
    tpu.vector_store %arg19[%c0_13, %c0_14], %40 {strides = array<i32>} : memref<64x128xf32, #tpu.memory_space<vmem>>, vector<8x128xf32>,
    %c8 = arith.constant 8 : index
    %c0_15 = arith.constant 0 : index
    %42 = vector.load %arg17[%c8, %c0_15] : memref<64x384xf32, #tpu.memory_space<vmem>>, vector<8x384xf32>
    %c0_i32_16 = arith.constant 0 : i32
    %43 = tpu.memref_slice %arg20[%c0_i32_16] : memref<4x!tpu.dma_semaphore, #tpu.memory_space<semaphore_mem>> -> memref<1x!tpu.dma_semaphore, #tpu.memory_space<semaphore_mem>>
    %44 = tpu.memref_squeeze %43 : memref<1x!tpu.dma_semaphore, #tpu.memory_space<semaphore_mem>> -> memref<!tpu.dma_semaphore, #tpu.memory_space<semaphore_mem>>
    tpu.wait_dma2 semaphore(%44 : memref<!tpu.dma_semaphore, #tpu.memory_space<semaphore_mem>>) src(%arg8 : memref<128x384xbf16, #tpu.memory_space<any>>) dst(%arg13 : memref<128x384xbf16, #tpu.memory_space<vmem>>)
    %45 = arith.truncf %40 : vector<8x128xf32> to vector<8x128xbf16>
    %c0_17 = arith.constant 0 : index
    %c0_18 = arith.constant 0 : index
    %46 = vector.load %arg13[%c0_17, %c0_18] : memref<128x384xbf16, #tpu.memory_space<vmem>>, vector<128x384xbf16>
    %cst_19 = arith.constant dense<0.000000e+00> : vector<8x384xf32>
    %47 = tpu.matmul %45, %46, %cst_19 {dimension_numbers = #tpu.dot_dimension_numbers<[1], [0], [0], [1], [0, 0, 1, 1], [], []>} : vector<8x128xbf16>, vector<128x384xbf16>, vector<8x384xf32> -> vector<8x384xf32>
    %48 = vector.extract_strided_slice %42 {offsets = [0, 0], sizes = [8, 256], strides = [1, 1]} : vector<8x384xf32> to vector<8x256xf32>
    %49 = vector.extract_strided_slice %47 {offsets = [0, 0], sizes = [8, 256], strides = [1, 1]} : vector<8x384xf32> to vector<8x256xf32>
    %50 = arith.addf %48, %49 : vector<8x256xf32>
    %cst_20 = arith.constant 5.000000e-01 : f32
    %51 = vector.broadcast %cst_20 : f32 to vector<8x256xf32>
    %52 = arith.mulf %51, %50 : vector<8x256xf32>
    %53 = math.tanh %52 : vector<8x256xf32>
    %cst_21 = arith.constant 5.000000e-01 : f32
    %54 = vector.broadcast %cst_21 : f32 to vector<8x256xf32>
    %55 = arith.mulf %54, %53 : vector<8x256xf32>
    %cst_22 = arith.constant 5.000000e-01 : f32
    %56 = vector.broadcast %cst_22 : f32 to vector<8x256xf32>
    %57 = arith.addf %55, %56 : vector<8x256xf32>
    %58 = vector.extract_strided_slice %57 {offsets = [0, 0], sizes = [8, 128], strides = [1, 1]} : vector<8x256xf32> to vector<8x128xf32>
    %59 = vector.extract_strided_slice %57 {offsets = [0, 128], sizes = [8, 128], strides = [1, 1]} : vector<8x256xf32> to vector<8x128xf32>
    %60 = vector.extract_strided_slice %42 {offsets = [0, 256], sizes = [8, 128], strides = [1, 1]} : vector<8x384xf32> to vector<8x128xf32>
    %61 = vector.extract_strided_slice %47 {offsets = [0, 256], sizes = [8, 128], strides = [1, 1]} : vector<8x384xf32> to vector<8x128xf32>
    %62 = vector.broadcast %9 : vector<1x128xf32> to vector<8x128xf32>
    %63 = arith.addf %61, %62 : vector<8x128xf32>
    %64 = arith.mulf %58, %63 : vector<8x128xf32>
    %65 = arith.addf %60, %64 : vector<8x128xf32>
    %66 = math.tanh %65 : vector<8x128xf32>
    %67 = arith.subf %40, %66 : vector<8x128xf32>
    %68 = arith.mulf %59, %67 : vector<8x128xf32>
    %69 = arith.addf %66, %68 : vector<8x128xf32>
    %c8_23 = arith.constant 8 : index
    %c0_24 = arith.constant 0 : index
    %70 = vector.load %arg19[%c8_23, %c0_24] : memref<64x128xf32, #tpu.memory_space<vmem>>, vector<8x128xf32>
    tpu.vector_store %arg19[%c8_23, %c0_24], %69 {strides = array<i32>} : memref<64x128xf32, #tpu.memory_space<vmem>>, vector<8x128xf32>,
    %c16 = arith.constant 16 : index
    %c0_25 = arith.constant 0 : index
    %71 = vector.load %arg17[%c16, %c0_25] : memref<64x384xf32, #tpu.memory_space<vmem>>, vector<8x384xf32>
    %72 = arith.truncf %69 : vector<8x128xf32> to vector<8x128xbf16>
    %c0_26 = arith.constant 0 : index
    %c0_27 = arith.constant 0 : index
    %73 = vector.load %arg13[%c0_26, %c0_27] : memref<128x384xbf16, #tpu.memory_space<vmem>>, vector<128x384xbf16>
    %cst_28 = arith.constant dense<0.000000e+00> : vector<8x384xf32>
    %74 = tpu.matmul %72, %73, %cst_28 {dimension_numbers = #tpu.dot_dimension_numbers<[1], [0], [0], [1], [0, 0, 1, 1], [], []>} : vector<8x128xbf16>, vector<128x384xbf16>, vector<8x384xf32> -> vector<8x384xf32>
    %75 = vector.extract_strided_slice %71 {offsets = [0, 0], sizes = [8, 256], strides = [1, 1]} : vector<8x384xf32> to vector<8x256xf32>
    %76 = vector.extract_strided_slice %74 {offsets = [0, 0], sizes = [8, 256], strides = [1, 1]} : vector<8x384xf32> to vector<8x256xf32>
    %77 = arith.addf %75, %76 : vector<8x256xf32>
    %cst_29 = arith.constant 5.000000e-01 : f32
    %78 = vector.broadcast %cst_29 : f32 to vector<8x256xf32>
    %79 = arith.mulf %78, %77 : vector<8x256xf32>
    %80 = math.tanh %79 : vector<8x256xf32>
    %cst_30 = arith.constant 5.000000e-01 : f32
    %81 = vector.broadcast %cst_30 : f32 to vector<8x256xf32>
    %82 = arith.mulf %81, %80 : vector<8x256xf32>
    %cst_31 = arith.constant 5.000000e-01 : f32
    %83 = vector.broadcast %cst_31 : f32 to vector<8x256xf32>
    %84 = arith.addf %82, %83 : vector<8x256xf32>
    %85 = vector.extract_strided_slice %84 {offsets = [0, 0], sizes = [8, 128], strides = [1, 1]} : vector<8x256xf32> to vector<8x128xf32>
    %86 = vector.extract_strided_slice %84 {offsets = [0, 128], sizes = [8, 128], strides = [1, 1]} : vector<8x256xf32> to vector<8x128xf32>
    %87 = vector.extract_strided_slice %71 {offsets = [0, 256], sizes = [8, 128], strides = [1, 1]} : vector<8x384xf32> to vector<8x128xf32>
    %88 = vector.extract_strided_slice %74 {offsets = [0, 256], sizes = [8, 128], strides = [1, 1]} : vector<8x384xf32> to vector<8x128xf32>
    %89 = vector.broadcast %9 : vector<1x128xf32> to vector<8x128xf32>
    %90 = arith.addf %88, %89 : vector<8x128xf32>
    %91 = arith.mulf %85, %90 : vector<8x128xf32>
    %92 = arith.addf %87, %91 : vector<8x128xf32>
    %93 = math.tanh %92 : vector<8x128xf32>
    %94 = arith.subf %69, %93 : vector<8x128xf32>
    %95 = arith.mulf %86, %94 : vector<8x128xf32>
    %96 = arith.addf %93, %95 : vector<8x128xf32>
    %c16_32 = arith.constant 16 : index
    %c0_33 = arith.constant 0 : index
    %97 = vector.load %arg19[%c16_32, %c0_33] : memref<64x128xf32, #tpu.memory_space<vmem>>, vector<8x128xf32>
    tpu.vector_store %arg19[%c16_32, %c0_33], %96 {strides = array<i32>} : memref<64x128xf32, #tpu.memory_space<vmem>>, vector<8x128xf32>,
    %c24 = arith.constant 24 : index
    %c0_34 = arith.constant 0 : index
    %98 = vector.load %arg17[%c24, %c0_34] : memref<64x384xf32, #tpu.memory_space<vmem>>, vector<8x384xf32>
    %99 = arith.truncf %96 : vector<8x128xf32> to vector<8x128xbf16>
    %c0_35 = arith.constant 0 : index
    %c0_36 = arith.constant 0 : index
    %100 = vector.load %arg13[%c0_35, %c0_36] : memref<128x384xbf16, #tpu.memory_space<vmem>>, vector<128x384xbf16>
    %cst_37 = arith.constant dense<0.000000e+00> : vector<8x384xf32>
    %101 = tpu.matmul %99, %100, %cst_37 {dimension_numbers = #tpu.dot_dimension_numbers<[1], [0], [0], [1], [0, 0, 1, 1], [], []>} : vector<8x128xbf16>, vector<128x384xbf16>, vector<8x384xf32> -> vector<8x384xf32>
    %102 = vector.extract_strided_slice %98 {offsets = [0, 0], sizes = [8, 256], strides = [1, 1]} : vector<8x384xf32> to vector<8x256xf32>
    %103 = vector.extract_strided_slice %101 {offsets = [0, 0], sizes = [8, 256], strides = [1, 1]} : vector<8x384xf32> to vector<8x256xf32>
    %104 = arith.addf %102, %103 : vector<8x256xf32>
    %cst_38 = arith.constant 5.000000e-01 : f32
    %105 = vector.broadcast %cst_38 : f32 to vector<8x256xf32>
    %106 = arith.mulf %105, %104 : vector<8x256xf32>
    %107 = math.tanh %106 : vector<8x256xf32>
    %cst_39 = arith.constant 5.000000e-01 : f32
    %108 = vector.broadcast %cst_39 : f32 to vector<8x256xf32>
    %109 = arith.mulf %108, %107 : vector<8x256xf32>
    %cst_40 = arith.constant 5.000000e-01 : f32
    %110 = vector.broadcast %cst_40 : f32 to vector<8x256xf32>
    %111 = arith.addf %109, %110 : vector<8x256xf32>
    %112 = vector.extract_strided_slice %111 {offsets = [0, 0], sizes = [8, 128], strides = [1, 1]} : vector<8x256xf32> to vector<8x128xf32>
    %113 = vector.extract_strided_slice %111 {offsets = [0, 128], sizes = [8, 128], strides = [1, 1]} : vector<8x256xf32> to vector<8x128xf32>
    %114 = vector.extract_strided_slice %98 {offsets = [0, 256], sizes = [8, 128], strides = [1, 1]} : vector<8x384xf32> to vector<8x128xf32>
    %115 = vector.extract_strided_slice %101 {offsets = [0, 256], sizes = [8, 128], strides = [1, 1]} : vector<8x384xf32> to vector<8x128xf32>
    %116 = vector.broadcast %9 : vector<1x128xf32> to vector<8x128xf32>
    %117 = arith.addf %115, %116 : vector<8x128xf32>
    %118 = arith.mulf %112, %117 : vector<8x128xf32>
    %119 = arith.addf %114, %118 : vector<8x128xf32>
    %120 = math.tanh %119 : vector<8x128xf32>
    %121 = arith.subf %96, %120 : vector<8x128xf32>
    %122 = arith.mulf %113, %121 : vector<8x128xf32>
    %123 = arith.addf %120, %122 : vector<8x128xf32>
    %c24_41 = arith.constant 24 : index
    %c0_42 = arith.constant 0 : index
    %124 = vector.load %arg19[%c24_41, %c0_42] : memref<64x128xf32, #tpu.memory_space<vmem>>, vector<8x128xf32>
    tpu.vector_store %arg19[%c24_41, %c0_42], %123 {strides = array<i32>} : memref<64x128xf32, #tpu.memory_space<vmem>>, vector<8x128xf32>,
    %c32 = arith.constant 32 : index
    %c0_43 = arith.constant 0 : index
    %125 = vector.load %arg17[%c32, %c0_43] : memref<64x384xf32, #tpu.memory_space<vmem>>, vector<8x384xf32>
    %126 = arith.truncf %123 : vector<8x128xf32> to vector<8x128xbf16>
    %c0_44 = arith.constant 0 : index
    %c0_45 = arith.constant 0 : index
    %127 = vector.load %arg13[%c0_44, %c0_45] : memref<128x384xbf16, #tpu.memory_space<vmem>>, vector<128x384xbf16>
    %cst_46 = arith.constant dense<0.000000e+00> : vector<8x384xf32>
    %128 = tpu.matmul %126, %127, %cst_46 {dimension_numbers = #tpu.dot_dimension_numbers<[1], [0], [0], [1], [0, 0, 1, 1], [], []>} : vector<8x128xbf16>, vector<128x384xbf16>, vector<8x384xf32> -> vector<8x384xf32>
    %129 = vector.extract_strided_slice %125 {offsets = [0, 0], sizes = [8, 256], strides = [1, 1]} : vector<8x384xf32> to vector<8x256xf32>
    %130 = vector.extract_strided_slice %128 {offsets = [0, 0], sizes = [8, 256], strides = [1, 1]} : vector<8x384xf32> to vector<8x256xf32>
    %131 = arith.addf %129, %130 : vector<8x256xf32>
    %cst_47 = arith.constant 5.000000e-01 : f32
    %132 = vector.broadcast %cst_47 : f32 to vector<8x256xf32>
    %133 = arith.mulf %132, %131 : vector<8x256xf32>
    %134 = math.tanh %133 : vector<8x256xf32>
    %cst_48 = arith.constant 5.000000e-01 : f32
    %135 = vector.broadcast %cst_48 : f32 to vector<8x256xf32>
    %136 = arith.mulf %135, %134 : vector<8x256xf32>
    %cst_49 = arith.constant 5.000000e-01 : f32
    %137 = vector.broadcast %cst_49 : f32 to vector<8x256xf32>
    %138 = arith.addf %136, %137 : vector<8x256xf32>
    %139 = vector.extract_strided_slice %138 {offsets = [0, 0], sizes = [8, 128], strides = [1, 1]} : vector<8x256xf32> to vector<8x128xf32>
    %140 = vector.extract_strided_slice %138 {offsets = [0, 128], sizes = [8, 128], strides = [1, 1]} : vector<8x256xf32> to vector<8x128xf32>
    %141 = vector.extract_strided_slice %125 {offsets = [0, 256], sizes = [8, 128], strides = [1, 1]} : vector<8x384xf32> to vector<8x128xf32>
    %142 = vector.extract_strided_slice %128 {offsets = [0, 256], sizes = [8, 128], strides = [1, 1]} : vector<8x384xf32> to vector<8x128xf32>
    %143 = vector.broadcast %9 : vector<1x128xf32> to vector<8x128xf32>
    %144 = arith.addf %142, %143 : vector<8x128xf32>
    %145 = arith.mulf %139, %144 : vector<8x128xf32>
    %146 = arith.addf %141, %145 : vector<8x128xf32>
    %147 = math.tanh %146 : vector<8x128xf32>
    %148 = arith.subf %123, %147 : vector<8x128xf32>
    %149 = arith.mulf %140, %148 : vector<8x128xf32>
    %150 = arith.addf %147, %149 : vector<8x128xf32>
    %c32_50 = arith.constant 32 : index
    %c0_51 = arith.constant 0 : index
    %151 = vector.load %arg19[%c32_50, %c0_51] : memref<64x128xf32, #tpu.memory_space<vmem>>, vector<8x128xf32>
    tpu.vector_store %arg19[%c32_50, %c0_51], %150 {strides = array<i32>} : memref<64x128xf32, #tpu.memory_space<vmem>>, vector<8x128xf32>,
    %c40 = arith.constant 40 : index
    %c0_52 = arith.constant 0 : index
    %152 = vector.load %arg17[%c40, %c0_52] : memref<64x384xf32, #tpu.memory_space<vmem>>, vector<8x384xf32>
    %153 = arith.truncf %150 : vector<8x128xf32> to vector<8x128xbf16>
    %c0_53 = arith.constant 0 : index
    %c0_54 = arith.constant 0 : index
    %154 = vector.load %arg13[%c0_53, %c0_54] : memref<128x384xbf16, #tpu.memory_space<vmem>>, vector<128x384xbf16>
    %cst_55 = arith.constant dense<0.000000e+00> : vector<8x384xf32>
    %155 = tpu.matmul %153, %154, %cst_55 {dimension_numbers = #tpu.dot_dimension_numbers<[1], [0], [0], [1], [0, 0, 1, 1], [], []>} : vector<8x128xbf16>, vector<128x384xbf16>, vector<8x384xf32> -> vector<8x384xf32>
    %156 = vector.extract_strided_slice %152 {offsets = [0, 0], sizes = [8, 256], strides = [1, 1]} : vector<8x384xf32> to vector<8x256xf32>
    %157 = vector.extract_strided_slice %155 {offsets = [0, 0], sizes = [8, 256], strides = [1, 1]} : vector<8x384xf32> to vector<8x256xf32>
    %158 = arith.addf %156, %157 : vector<8x256xf32>
    %cst_56 = arith.constant 5.000000e-01 : f32
    %159 = vector.broadcast %cst_56 : f32 to vector<8x256xf32>
    %160 = arith.mulf %159, %158 : vector<8x256xf32>
    %161 = math.tanh %160 : vector<8x256xf32>
    %cst_57 = arith.constant 5.000000e-01 : f32
    %162 = vector.broadcast %cst_57 : f32 to vector<8x256xf32>
    %163 = arith.mulf %162, %161 : vector<8x256xf32>
    %cst_58 = arith.constant 5.000000e-01 : f32
    %164 = vector.broadcast %cst_58 : f32 to vector<8x256xf32>
    %165 = arith.addf %163, %164 : vector<8x256xf32>
    %166 = vector.extract_strided_slice %165 {offsets = [0, 0], sizes = [8, 128], strides = [1, 1]} : vector<8x256xf32> to vector<8x128xf32>
    %167 = vector.extract_strided_slice %165 {offsets = [0, 128], sizes = [8, 128], strides = [1, 1]} : vector<8x256xf32> to vector<8x128xf32>
    %168 = vector.extract_strided_slice %152 {offsets = [0, 256], sizes = [8, 128], strides = [1, 1]} : vector<8x384xf32> to vector<8x128xf32>
    %169 = vector.extract_strided_slice %155 {offsets = [0, 256], sizes = [8, 128], strides = [1, 1]} : vector<8x384xf32> to vector<8x128xf32>
    %170 = vector.broadcast %9 : vector<1x128xf32> to vector<8x128xf32>
    %171 = arith.addf %169, %170 : vector<8x128xf32>
    %172 = arith.mulf %166, %171 : vector<8x128xf32>
    %173 = arith.addf %168, %172 : vector<8x128xf32>
    %174 = math.tanh %173 : vector<8x128xf32>
    %175 = arith.subf %150, %174 : vector<8x128xf32>
    %176 = arith.mulf %167, %175 : vector<8x128xf32>
    %177 = arith.addf %174, %176 : vector<8x128xf32>
    %c40_59 = arith.constant 40 : index
    %c0_60 = arith.constant 0 : index
    %178 = vector.load %arg19[%c40_59, %c0_60] : memref<64x128xf32, #tpu.memory_space<vmem>>, vector<8x128xf32>
    tpu.vector_store %arg19[%c40_59, %c0_60], %177 {strides = array<i32>} : memref<64x128xf32, #tpu.memory_space<vmem>>, vector<8x128xf32>,
    %c48 = arith.constant 48 : index
    %c0_61 = arith.constant 0 : index
    %179 = vector.load %arg17[%c48, %c0_61] : memref<64x384xf32, #tpu.memory_space<vmem>>, vector<8x384xf32>
    %180 = arith.truncf %177 : vector<8x128xf32> to vector<8x128xbf16>
    %c0_62 = arith.constant 0 : index
    %c0_63 = arith.constant 0 : index
    %181 = vector.load %arg13[%c0_62, %c0_63] : memref<128x384xbf16, #tpu.memory_space<vmem>>, vector<128x384xbf16>
    %cst_64 = arith.constant dense<0.000000e+00> : vector<8x384xf32>
    %182 = tpu.matmul %180, %181, %cst_64 {dimension_numbers = #tpu.dot_dimension_numbers<[1], [0], [0], [1], [0, 0, 1, 1], [], []>} : vector<8x128xbf16>, vector<128x384xbf16>, vector<8x384xf32> -> vector<8x384xf32>
    %183 = vector.extract_strided_slice %179 {offsets = [0, 0], sizes = [8, 256], strides = [1, 1]} : vector<8x384xf32> to vector<8x256xf32>
    %184 = vector.extract_strided_slice %182 {offsets = [0, 0], sizes = [8, 256], strides = [1, 1]} : vector<8x384xf32> to vector<8x256xf32>
    %185 = arith.addf %183, %184 : vector<8x256xf32>
    %cst_65 = arith.constant 5.000000e-01 : f32
    %186 = vector.broadcast %cst_65 : f32 to vector<8x256xf32>
    %187 = arith.mulf %186, %185 : vector<8x256xf32>
    %188 = math.tanh %187 : vector<8x256xf32>
    %cst_66 = arith.constant 5.000000e-01 : f32
    %189 = vector.broadcast %cst_66 : f32 to vector<8x256xf32>
    %190 = arith.mulf %189, %188 : vector<8x256xf32>
    %cst_67 = arith.constant 5.000000e-01 : f32
    %191 = vector.broadcast %cst_67 : f32 to vector<8x256xf32>
    %192 = arith.addf %190, %191 : vector<8x256xf32>
    %193 = vector.extract_strided_slice %192 {offsets = [0, 0], sizes = [8, 128], strides = [1, 1]} : vector<8x256xf32> to vector<8x128xf32>
    %194 = vector.extract_strided_slice %192 {offsets = [0, 128], sizes = [8, 128], strides = [1, 1]} : vector<8x256xf32> to vector<8x128xf32>
    %195 = vector.extract_strided_slice %179 {offsets = [0, 256], sizes = [8, 128], strides = [1, 1]} : vector<8x384xf32> to vector<8x128xf32>
    %196 = vector.extract_strided_slice %182 {offsets = [0, 256], sizes = [8, 128], strides = [1, 1]} : vector<8x384xf32> to vector<8x128xf32>
    %197 = vector.broadcast %9 : vector<1x128xf32> to vector<8x128xf32>
    %198 = arith.addf %196, %197 : vector<8x128xf32>
    %199 = arith.mulf %193, %198 : vector<8x128xf32>
    %200 = arith.addf %195, %199 : vector<8x128xf32>
    %201 = math.tanh %200 : vector<8x128xf32>
    %202 = arith.subf %177, %201 : vector<8x128xf32>
    %203 = arith.mulf %194, %202 : vector<8x128xf32>
    %204 = arith.addf %201, %203 : vector<8x128xf32>
    %c48_68 = arith.constant 48 : index
    %c0_69 = arith.constant 0 : index
    %205 = vector.load %arg19[%c48_68, %c0_69] : memref<64x128xf32, #tpu.memory_space<vmem>>, vector<8x128xf32>
    tpu.vector_store %arg19[%c48_68, %c0_69], %204 {strides = array<i32>} : memref<64x128xf32, #tpu.memory_space<vmem>>, vector<8x128xf32>,
    %c56 = arith.constant 56 : index
    %c0_70 = arith.constant 0 : index
    %206 = vector.load %arg17[%c56, %c0_70] : memref<64x384xf32, #tpu.memory_space<vmem>>, vector<8x384xf32>
    %207 = arith.truncf %204 : vector<8x128xf32> to vector<8x128xbf16>
    %c0_71 = arith.constant 0 : index
    %c0_72 = arith.constant 0 : index
    %208 = vector.load %arg13[%c0_71, %c0_72] : memref<128x384xbf16, #tpu.memory_space<vmem>>, vector<128x384xbf16>
    %cst_73 = arith.constant dense<0.000000e+00> : vector<8x384xf32>
    %209 = tpu.matmul %207, %208, %cst_73 {dimension_numbers = #tpu.dot_dimension_numbers<[1], [0], [0], [1], [0, 0, 1, 1], [], []>} : vector<8x128xbf16>, vector<128x384xbf16>, vector<8x384xf32> -> vector<8x384xf32>
    %210 = vector.extract_strided_slice %206 {offsets = [0, 0], sizes = [8, 256], strides = [1, 1]} : vector<8x384xf32> to vector<8x256xf32>
    %211 = vector.extract_strided_slice %209 {offsets = [0, 0], sizes = [8, 256], strides = [1, 1]} : vector<8x384xf32> to vector<8x256xf32>
    %212 = arith.addf %210, %211 : vector<8x256xf32>
    %cst_74 = arith.constant 5.000000e-01 : f32
    %213 = vector.broadcast %cst_74 : f32 to vector<8x256xf32>
    %214 = arith.mulf %213, %212 : vector<8x256xf32>
    %215 = math.tanh %214 : vector<8x256xf32>
    %cst_75 = arith.constant 5.000000e-01 : f32
    %216 = vector.broadcast %cst_75 : f32 to vector<8x256xf32>
    %217 = arith.mulf %216, %215 : vector<8x256xf32>
    %cst_76 = arith.constant 5.000000e-01 : f32
    %218 = vector.broadcast %cst_76 : f32 to vector<8x256xf32>
    %219 = arith.addf %217, %218 : vector<8x256xf32>
    %220 = vector.extract_strided_slice %219 {offsets = [0, 0], sizes = [8, 128], strides = [1, 1]} : vector<8x256xf32> to vector<8x128xf32>
    %221 = vector.extract_strided_slice %219 {offsets = [0, 128], sizes = [8, 128], strides = [1, 1]} : vector<8x256xf32> to vector<8x128xf32>
    %222 = vector.extract_strided_slice %206 {offsets = [0, 256], sizes = [8, 128], strides = [1, 1]} : vector<8x384xf32> to vector<8x128xf32>
    %223 = vector.extract_strided_slice %209 {offsets = [0, 256], sizes = [8, 128], strides = [1, 1]} : vector<8x384xf32> to vector<8x128xf32>
    %224 = vector.broadcast %9 : vector<1x128xf32> to vector<8x128xf32>
    %225 = arith.addf %223, %224 : vector<8x128xf32>
    %226 = arith.mulf %220, %225 : vector<8x128xf32>
    %227 = arith.addf %222, %226 : vector<8x128xf32>
    %228 = math.tanh %227 : vector<8x128xf32>
    %229 = arith.subf %204, %228 : vector<8x128xf32>
    %230 = arith.mulf %221, %229 : vector<8x128xf32>
    %231 = arith.addf %228, %230 : vector<8x128xf32>
    %c56_77 = arith.constant 56 : index
    %c0_78 = arith.constant 0 : index
    %232 = vector.load %arg19[%c56_77, %c0_78] : memref<64x128xf32, #tpu.memory_space<vmem>>, vector<8x128xf32>
    tpu.vector_store %arg19[%c56_77, %c0_78], %231 {strides = array<i32>} : memref<64x128xf32, #tpu.memory_space<vmem>>, vector<8x128xf32>,
    %c0_79 = arith.constant 0 : index
    %c0_80 = arith.constant 0 : index
    %233 = vector.load %arg5[%c0_79, %c0_80] : memref<1x384xf32, #tpu.memory_space<vmem>>, vector<1x384xf32>
    %c0_81 = arith.constant 0 : index
    %c0_82 = arith.constant 0 : index
    %234 = vector.load %arg6[%c0_81, %c0_82] : memref<1x128xf32, #tpu.memory_space<vmem>>, vector<1x128xf32>
    %c2_i32_83 = arith.constant 2 : i32
    %235 = tpu.memref_slice %arg20[%c2_i32_83] : memref<4x!tpu.dma_semaphore, #tpu.memory_space<semaphore_mem>> -> memref<1x!tpu.dma_semaphore, #tpu.memory_space<semaphore_mem>>
    %236 = tpu.memref_squeeze %235 : memref<1x!tpu.dma_semaphore, #tpu.memory_space<semaphore_mem>> -> memref<!tpu.dma_semaphore, #tpu.memory_space<semaphore_mem>>
    tpu.wait_dma2 semaphore(%236 : memref<!tpu.dma_semaphore, #tpu.memory_space<semaphore_mem>>) src(%arg10 : memref<128x384xbf16, #tpu.memory_space<any>>) dst(%arg15 : memref<128x384xbf16, #tpu.memory_space<vmem>>)
    %c0_84 = arith.constant 0 : index
    %c0_85 = arith.constant 0 : index
    %237 = vector.load %arg19[%c0_84, %c0_85] : memref<64x128xf32, #tpu.memory_space<vmem>>, vector<64x128xf32>
    %238 = arith.truncf %237 : vector<64x128xf32> to vector<64x128xbf16>
    %c0_86 = arith.constant 0 : index
    %c0_87 = arith.constant 0 : index
    %239 = vector.load %arg15[%c0_86, %c0_87] : memref<128x384xbf16, #tpu.memory_space<vmem>>, vector<128x384xbf16>
    %cst_88 = arith.constant dense<0.000000e+00> : vector<64x384xf32>
    %240 = tpu.matmul %238, %239, %cst_88 {dimension_numbers = #tpu.dot_dimension_numbers<[1], [0], [0], [1], [0, 0, 1, 1], [], []>} : vector<64x128xbf16>, vector<128x384xbf16>, vector<64x384xf32> -> vector<64x384xf32>
    %241 = vector.broadcast %233 : vector<1x384xf32> to vector<64x384xf32>
    %242 = arith.addf %240, %241 : vector<64x384xf32>
    %c0_89 = arith.constant 0 : index
    %c0_90 = arith.constant 0 : index
    %243 = vector.load %arg18[%c0_89, %c0_90] : memref<64x384xf32, #tpu.memory_space<vmem>>, vector<64x384xf32>
    tpu.vector_store %arg18[%c0_89, %c0_90], %242 {strides = array<i32>} : memref<64x384xf32, #tpu.memory_space<vmem>>, vector<64x384xf32>,
    %c0_91 = arith.constant 0 : index
    %c0_92 = arith.constant 0 : index
    %244 = vector.load %arg18[%c0_91, %c0_92] : memref<64x384xf32, #tpu.memory_space<vmem>>, vector<8x384xf32>
    %245 = vector.extract_strided_slice %244 {offsets = [0, 0], sizes = [8, 256], strides = [1, 1]} : vector<8x384xf32> to vector<8x256xf32>
    %cst_93 = arith.constant 5.000000e-01 : f32
    %246 = vector.broadcast %cst_93 : f32 to vector<8x256xf32>
    %247 = arith.mulf %246, %245 : vector<8x256xf32>
    %248 = math.tanh %247 : vector<8x256xf32>
    %cst_94 = arith.constant 5.000000e-01 : f32
    %249 = vector.broadcast %cst_94 : f32 to vector<8x256xf32>
    %250 = arith.mulf %249, %248 : vector<8x256xf32>
    %cst_95 = arith.constant 5.000000e-01 : f32
    %251 = vector.broadcast %cst_95 : f32 to vector<8x256xf32>
    %252 = arith.addf %250, %251 : vector<8x256xf32>
    %253 = vector.extract_strided_slice %252 {offsets = [0, 0], sizes = [8, 128], strides = [1, 1]} : vector<8x256xf32> to vector<8x128xf32>
    %254 = vector.extract_strided_slice %252 {offsets = [0, 128], sizes = [8, 128], strides = [1, 1]} : vector<8x256xf32> to vector<8x128xf32>
    %255 = vector.extract_strided_slice %244 {offsets = [0, 256], sizes = [8, 128], strides = [1, 1]} : vector<8x384xf32> to vector<8x128xf32>
    %256 = vector.broadcast %234 : vector<1x128xf32> to vector<8x128xf32>
    %257 = arith.mulf %253, %256 : vector<8x128xf32>
    %258 = arith.addf %255, %257 : vector<8x128xf32>
    %259 = math.tanh %258 : vector<8x128xf32>
    %260 = arith.mulf %254, %259 : vector<8x128xf32>
    %261 = arith.subf %259, %260 : vector<8x128xf32>
    %c8_96 = arith.constant 8 : index
    %c0_97 = arith.constant 0 : index
    %262 = vector.load %arg18[%c8_96, %c0_97] : memref<64x384xf32, #tpu.memory_space<vmem>>, vector<8x384xf32>
    %c1_i32_98 = arith.constant 1 : i32
    %263 = tpu.memref_slice %arg20[%c1_i32_98] : memref<4x!tpu.dma_semaphore, #tpu.memory_space<semaphore_mem>> -> memref<1x!tpu.dma_semaphore, #tpu.memory_space<semaphore_mem>>
    %264 = tpu.memref_squeeze %263 : memref<1x!tpu.dma_semaphore, #tpu.memory_space<semaphore_mem>> -> memref<!tpu.dma_semaphore, #tpu.memory_space<semaphore_mem>>
    tpu.wait_dma2 semaphore(%264 : memref<!tpu.dma_semaphore, #tpu.memory_space<semaphore_mem>>) src(%arg9 : memref<128x384xbf16, #tpu.memory_space<any>>) dst(%arg14 : memref<128x384xbf16, #tpu.memory_space<vmem>>)
    %265 = arith.truncf %261 : vector<8x128xf32> to vector<8x128xbf16>
    %c0_99 = arith.constant 0 : index
    %c0_100 = arith.constant 0 : index
    %266 = vector.load %arg14[%c0_99, %c0_100] : memref<128x384xbf16, #tpu.memory_space<vmem>>, vector<128x384xbf16>
    %cst_101 = arith.constant dense<0.000000e+00> : vector<8x384xf32>
    %267 = tpu.matmul %265, %266, %cst_101 {dimension_numbers = #tpu.dot_dimension_numbers<[1], [0], [0], [1], [0, 0, 1, 1], [], []>} : vector<8x128xbf16>, vector<128x384xbf16>, vector<8x384xf32> -> vector<8x384xf32>
    %268 = vector.extract_strided_slice %262 {offsets = [0, 0], sizes = [8, 256], strides = [1, 1]} : vector<8x384xf32> to vector<8x256xf32>
    %269 = vector.extract_strided_slice %267 {offsets = [0, 0], sizes = [8, 256], strides = [1, 1]} : vector<8x384xf32> to vector<8x256xf32>
    %270 = arith.addf %268, %269 : vector<8x256xf32>
    %cst_102 = arith.constant 5.000000e-01 : f32
    %271 = vector.broadcast %cst_102 : f32 to vector<8x256xf32>
    %272 = arith.mulf %271, %270 : vector<8x256xf32>
    %273 = math.tanh %272 : vector<8x256xf32>
    %cst_103 = arith.constant 5.000000e-01 : f32
    %274 = vector.broadcast %cst_103 : f32 to vector<8x256xf32>
    %275 = arith.mulf %274, %273 : vector<8x256xf32>
    %cst_104 = arith.constant 5.000000e-01 : f32
    %276 = vector.broadcast %cst_104 : f32 to vector<8x256xf32>
    %277 = arith.addf %275, %276 : vector<8x256xf32>
    %278 = vector.extract_strided_slice %277 {offsets = [0, 0], sizes = [8, 128], strides = [1, 1]} : vector<8x256xf32> to vector<8x128xf32>
    %279 = vector.extract_strided_slice %277 {offsets = [0, 128], sizes = [8, 128], strides = [1, 1]} : vector<8x256xf32> to vector<8x128xf32>
    %280 = vector.extract_strided_slice %262 {offsets = [0, 256], sizes = [8, 128], strides = [1, 1]} : vector<8x384xf32> to vector<8x128xf32>
    %281 = vector.extract_strided_slice %267 {offsets = [0, 256], sizes = [8, 128], strides = [1, 1]} : vector<8x384xf32> to vector<8x128xf32>
    %282 = vector.broadcast %234 : vector<1x128xf32> to vector<8x128xf32>
    %283 = arith.addf %281, %282 : vector<8x128xf32>
    %284 = arith.mulf %278, %283 : vector<8x128xf32>
    %285 = arith.addf %280, %284 : vector<8x128xf32>
    %286 = math.tanh %285 : vector<8x128xf32>
    %287 = arith.subf %261, %286 : vector<8x128xf32>
    %288 = arith.mulf %279, %287 : vector<8x128xf32>
    %289 = arith.addf %286, %288 : vector<8x128xf32>
    %c16_105 = arith.constant 16 : index
    %c0_106 = arith.constant 0 : index
    %290 = vector.load %arg18[%c16_105, %c0_106] : memref<64x384xf32, #tpu.memory_space<vmem>>, vector<8x384xf32>
    %291 = arith.truncf %289 : vector<8x128xf32> to vector<8x128xbf16>
    %c0_107 = arith.constant 0 : index
    %c0_108 = arith.constant 0 : index
    %292 = vector.load %arg14[%c0_107, %c0_108] : memref<128x384xbf16, #tpu.memory_space<vmem>>, vector<128x384xbf16>
    %cst_109 = arith.constant dense<0.000000e+00> : vector<8x384xf32>
    %293 = tpu.matmul %291, %292, %cst_109 {dimension_numbers = #tpu.dot_dimension_numbers<[1], [0], [0], [1], [0, 0, 1, 1], [], []>} : vector<8x128xbf16>, vector<128x384xbf16>, vector<8x384xf32> -> vector<8x384xf32>
    %294 = vector.extract_strided_slice %290 {offsets = [0, 0], sizes = [8, 256], strides = [1, 1]} : vector<8x384xf32> to vector<8x256xf32>
    %295 = vector.extract_strided_slice %293 {offsets = [0, 0], sizes = [8, 256], strides = [1, 1]} : vector<8x384xf32> to vector<8x256xf32>
    %296 = arith.addf %294, %295 : vector<8x256xf32>
    %cst_110 = arith.constant 5.000000e-01 : f32
    %297 = vector.broadcast %cst_110 : f32 to vector<8x256xf32>
    %298 = arith.mulf %297, %296 : vector<8x256xf32>
    %299 = math.tanh %298 : vector<8x256xf32>
    %cst_111 = arith.constant 5.000000e-01 : f32
    %300 = vector.broadcast %cst_111 : f32 to vector<8x256xf32>
    %301 = arith.mulf %300, %299 : vector<8x256xf32>
    %cst_112 = arith.constant 5.000000e-01 : f32
    %302 = vector.broadcast %cst_112 : f32 to vector<8x256xf32>
    %303 = arith.addf %301, %302 : vector<8x256xf32>
    %304 = vector.extract_strided_slice %303 {offsets = [0, 0], sizes = [8, 128], strides = [1, 1]} : vector<8x256xf32> to vector<8x128xf32>
    %305 = vector.extract_strided_slice %303 {offsets = [0, 128], sizes = [8, 128], strides = [1, 1]} : vector<8x256xf32> to vector<8x128xf32>
    %306 = vector.extract_strided_slice %290 {offsets = [0, 256], sizes = [8, 128], strides = [1, 1]} : vector<8x384xf32> to vector<8x128xf32>
    %307 = vector.extract_strided_slice %293 {offsets = [0, 256], sizes = [8, 128], strides = [1, 1]} : vector<8x384xf32> to vector<8x128xf32>
    %308 = vector.broadcast %234 : vector<1x128xf32> to vector<8x128xf32>
    %309 = arith.addf %307, %308 : vector<8x128xf32>
    %310 = arith.mulf %304, %309 : vector<8x128xf32>
    %311 = arith.addf %306, %310 : vector<8x128xf32>
    %312 = math.tanh %311 : vector<8x128xf32>
    %313 = arith.subf %289, %312 : vector<8x128xf32>
    %314 = arith.mulf %305, %313 : vector<8x128xf32>
    %315 = arith.addf %312, %314 : vector<8x128xf32>
    %c24_113 = arith.constant 24 : index
    %c0_114 = arith.constant 0 : index
    %316 = vector.load %arg18[%c24_113, %c0_114] : memref<64x384xf32, #tpu.memory_space<vmem>>, vector<8x384xf32>
    %317 = arith.truncf %315 : vector<8x128xf32> to vector<8x128xbf16>
    %c0_115 = arith.constant 0 : index
    %c0_116 = arith.constant 0 : index
    %318 = vector.load %arg14[%c0_115, %c0_116] : memref<128x384xbf16, #tpu.memory_space<vmem>>, vector<128x384xbf16>
    %cst_117 = arith.constant dense<0.000000e+00> : vector<8x384xf32>
    %319 = tpu.matmul %317, %318, %cst_117 {dimension_numbers = #tpu.dot_dimension_numbers<[1], [0], [0], [1], [0, 0, 1, 1], [], []>} : vector<8x128xbf16>, vector<128x384xbf16>, vector<8x384xf32> -> vector<8x384xf32>
    %320 = vector.extract_strided_slice %316 {offsets = [0, 0], sizes = [8, 256], strides = [1, 1]} : vector<8x384xf32> to vector<8x256xf32>
    %321 = vector.extract_strided_slice %319 {offsets = [0, 0], sizes = [8, 256], strides = [1, 1]} : vector<8x384xf32> to vector<8x256xf32>
    %322 = arith.addf %320, %321 : vector<8x256xf32>
    %cst_118 = arith.constant 5.000000e-01 : f32
    %323 = vector.broadcast %cst_118 : f32 to vector<8x256xf32>
    %324 = arith.mulf %323, %322 : vector<8x256xf32>
    %325 = math.tanh %324 : vector<8x256xf32>
    %cst_119 = arith.constant 5.000000e-01 : f32
    %326 = vector.broadcast %cst_119 : f32 to vector<8x256xf32>
    %327 = arith.mulf %326, %325 : vector<8x256xf32>
    %cst_120 = arith.constant 5.000000e-01 : f32
    %328 = vector.broadcast %cst_120 : f32 to vector<8x256xf32>
    %329 = arith.addf %327, %328 : vector<8x256xf32>
    %330 = vector.extract_strided_slice %329 {offsets = [0, 0], sizes = [8, 128], strides = [1, 1]} : vector<8x256xf32> to vector<8x128xf32>
    %331 = vector.extract_strided_slice %329 {offsets = [0, 128], sizes = [8, 128], strides = [1, 1]} : vector<8x256xf32> to vector<8x128xf32>
    %332 = vector.extract_strided_slice %316 {offsets = [0, 256], sizes = [8, 128], strides = [1, 1]} : vector<8x384xf32> to vector<8x128xf32>
    %333 = vector.extract_strided_slice %319 {offsets = [0, 256], sizes = [8, 128], strides = [1, 1]} : vector<8x384xf32> to vector<8x128xf32>
    %334 = vector.broadcast %234 : vector<1x128xf32> to vector<8x128xf32>
    %335 = arith.addf %333, %334 : vector<8x128xf32>
    %336 = arith.mulf %330, %335 : vector<8x128xf32>
    %337 = arith.addf %332, %336 : vector<8x128xf32>
    %338 = math.tanh %337 : vector<8x128xf32>
    %339 = arith.subf %315, %338 : vector<8x128xf32>
    %340 = arith.mulf %331, %339 : vector<8x128xf32>
    %341 = arith.addf %338, %340 : vector<8x128xf32>
    %c32_121 = arith.constant 32 : index
    %c0_122 = arith.constant 0 : index
    %342 = vector.load %arg18[%c32_121, %c0_122] : memref<64x384xf32, #tpu.memory_space<vmem>>, vector<8x384xf32>
    %343 = arith.truncf %341 : vector<8x128xf32> to vector<8x128xbf16>
    %c0_123 = arith.constant 0 : index
    %c0_124 = arith.constant 0 : index
    %344 = vector.load %arg14[%c0_123, %c0_124] : memref<128x384xbf16, #tpu.memory_space<vmem>>, vector<128x384xbf16>
    %cst_125 = arith.constant dense<0.000000e+00> : vector<8x384xf32>
    %345 = tpu.matmul %343, %344, %cst_125 {dimension_numbers = #tpu.dot_dimension_numbers<[1], [0], [0], [1], [0, 0, 1, 1], [], []>} : vector<8x128xbf16>, vector<128x384xbf16>, vector<8x384xf32> -> vector<8x384xf32>
    %346 = vector.extract_strided_slice %342 {offsets = [0, 0], sizes = [8, 256], strides = [1, 1]} : vector<8x384xf32> to vector<8x256xf32>
    %347 = vector.extract_strided_slice %345 {offsets = [0, 0], sizes = [8, 256], strides = [1, 1]} : vector<8x384xf32> to vector<8x256xf32>
    %348 = arith.addf %346, %347 : vector<8x256xf32>
    %cst_126 = arith.constant 5.000000e-01 : f32
    %349 = vector.broadcast %cst_126 : f32 to vector<8x256xf32>
    %350 = arith.mulf %349, %348 : vector<8x256xf32>
    %351 = math.tanh %350 : vector<8x256xf32>
    %cst_127 = arith.constant 5.000000e-01 : f32
    %352 = vector.broadcast %cst_127 : f32 to vector<8x256xf32>
    %353 = arith.mulf %352, %351 : vector<8x256xf32>
    %cst_128 = arith.constant 5.000000e-01 : f32
    %354 = vector.broadcast %cst_128 : f32 to vector<8x256xf32>
    %355 = arith.addf %353, %354 : vector<8x256xf32>
    %356 = vector.extract_strided_slice %355 {offsets = [0, 0], sizes = [8, 128], strides = [1, 1]} : vector<8x256xf32> to vector<8x128xf32>
    %357 = vector.extract_strided_slice %355 {offsets = [0, 128], sizes = [8, 128], strides = [1, 1]} : vector<8x256xf32> to vector<8x128xf32>
    %358 = vector.extract_strided_slice %342 {offsets = [0, 256], sizes = [8, 128], strides = [1, 1]} : vector<8x384xf32> to vector<8x128xf32>
    %359 = vector.extract_strided_slice %345 {offsets = [0, 256], sizes = [8, 128], strides = [1, 1]} : vector<8x384xf32> to vector<8x128xf32>
    %360 = vector.broadcast %234 : vector<1x128xf32> to vector<8x128xf32>
    %361 = arith.addf %359, %360 : vector<8x128xf32>
    %362 = arith.mulf %356, %361 : vector<8x128xf32>
    %363 = arith.addf %358, %362 : vector<8x128xf32>
    %364 = math.tanh %363 : vector<8x128xf32>
    %365 = arith.subf %341, %364 : vector<8x128xf32>
    %366 = arith.mulf %357, %365 : vector<8x128xf32>
    %367 = arith.addf %364, %366 : vector<8x128xf32>
    %c40_129 = arith.constant 40 : index
    %c0_130 = arith.constant 0 : index
    %368 = vector.load %arg18[%c40_129, %c0_130] : memref<64x384xf32, #tpu.memory_space<vmem>>, vector<8x384xf32>
    %369 = arith.truncf %367 : vector<8x128xf32> to vector<8x128xbf16>
    %c0_131 = arith.constant 0 : index
    %c0_132 = arith.constant 0 : index
    %370 = vector.load %arg14[%c0_131, %c0_132] : memref<128x384xbf16, #tpu.memory_space<vmem>>, vector<128x384xbf16>
    %cst_133 = arith.constant dense<0.000000e+00> : vector<8x384xf32>
    %371 = tpu.matmul %369, %370, %cst_133 {dimension_numbers = #tpu.dot_dimension_numbers<[1], [0], [0], [1], [0, 0, 1, 1], [], []>} : vector<8x128xbf16>, vector<128x384xbf16>, vector<8x384xf32> -> vector<8x384xf32>
    %372 = vector.extract_strided_slice %368 {offsets = [0, 0], sizes = [8, 256], strides = [1, 1]} : vector<8x384xf32> to vector<8x256xf32>
    %373 = vector.extract_strided_slice %371 {offsets = [0, 0], sizes = [8, 256], strides = [1, 1]} : vector<8x384xf32> to vector<8x256xf32>
    %374 = arith.addf %372, %373 : vector<8x256xf32>
    %cst_134 = arith.constant 5.000000e-01 : f32
    %375 = vector.broadcast %cst_134 : f32 to vector<8x256xf32>
    %376 = arith.mulf %375, %374 : vector<8x256xf32>
    %377 = math.tanh %376 : vector<8x256xf32>
    %cst_135 = arith.constant 5.000000e-01 : f32
    %378 = vector.broadcast %cst_135 : f32 to vector<8x256xf32>
    %379 = arith.mulf %378, %377 : vector<8x256xf32>
    %cst_136 = arith.constant 5.000000e-01 : f32
    %380 = vector.broadcast %cst_136 : f32 to vector<8x256xf32>
    %381 = arith.addf %379, %380 : vector<8x256xf32>
    %382 = vector.extract_strided_slice %381 {offsets = [0, 0], sizes = [8, 128], strides = [1, 1]} : vector<8x256xf32> to vector<8x128xf32>
    %383 = vector.extract_strided_slice %381 {offsets = [0, 128], sizes = [8, 128], strides = [1, 1]} : vector<8x256xf32> to vector<8x128xf32>
    %384 = vector.extract_strided_slice %368 {offsets = [0, 256], sizes = [8, 128], strides = [1, 1]} : vector<8x384xf32> to vector<8x128xf32>
    %385 = vector.extract_strided_slice %371 {offsets = [0, 256], sizes = [8, 128], strides = [1, 1]} : vector<8x384xf32> to vector<8x128xf32>
    %386 = vector.broadcast %234 : vector<1x128xf32> to vector<8x128xf32>
    %387 = arith.addf %385, %386 : vector<8x128xf32>
    %388 = arith.mulf %382, %387 : vector<8x128xf32>
    %389 = arith.addf %384, %388 : vector<8x128xf32>
    %390 = math.tanh %389 : vector<8x128xf32>
    %391 = arith.subf %367, %390 : vector<8x128xf32>
    %392 = arith.mulf %383, %391 : vector<8x128xf32>
    %393 = arith.addf %390, %392 : vector<8x128xf32>
    %c48_137 = arith.constant 48 : index
    %c0_138 = arith.constant 0 : index
    %394 = vector.load %arg18[%c48_137, %c0_138] : memref<64x384xf32, #tpu.memory_space<vmem>>, vector<8x384xf32>
    %395 = arith.truncf %393 : vector<8x128xf32> to vector<8x128xbf16>
    %c0_139 = arith.constant 0 : index
    %c0_140 = arith.constant 0 : index
    %396 = vector.load %arg14[%c0_139, %c0_140] : memref<128x384xbf16, #tpu.memory_space<vmem>>, vector<128x384xbf16>
    %cst_141 = arith.constant dense<0.000000e+00> : vector<8x384xf32>
    %397 = tpu.matmul %395, %396, %cst_141 {dimension_numbers = #tpu.dot_dimension_numbers<[1], [0], [0], [1], [0, 0, 1, 1], [], []>} : vector<8x128xbf16>, vector<128x384xbf16>, vector<8x384xf32> -> vector<8x384xf32>
    %398 = vector.extract_strided_slice %394 {offsets = [0, 0], sizes = [8, 256], strides = [1, 1]} : vector<8x384xf32> to vector<8x256xf32>
    %399 = vector.extract_strided_slice %397 {offsets = [0, 0], sizes = [8, 256], strides = [1, 1]} : vector<8x384xf32> to vector<8x256xf32>
    %400 = arith.addf %398, %399 : vector<8x256xf32>
    %cst_142 = arith.constant 5.000000e-01 : f32
    %401 = vector.broadcast %cst_142 : f32 to vector<8x256xf32>
    %402 = arith.mulf %401, %400 : vector<8x256xf32>
    %403 = math.tanh %402 : vector<8x256xf32>
    %cst_143 = arith.constant 5.000000e-01 : f32
    %404 = vector.broadcast %cst_143 : f32 to vector<8x256xf32>
    %405 = arith.mulf %404, %403 : vector<8x256xf32>
    %cst_144 = arith.constant 5.000000e-01 : f32
    %406 = vector.broadcast %cst_144 : f32 to vector<8x256xf32>
    %407 = arith.addf %405, %406 : vector<8x256xf32>
    %408 = vector.extract_strided_slice %407 {offsets = [0, 0], sizes = [8, 128], strides = [1, 1]} : vector<8x256xf32> to vector<8x128xf32>
    %409 = vector.extract_strided_slice %407 {offsets = [0, 128], sizes = [8, 128], strides = [1, 1]} : vector<8x256xf32> to vector<8x128xf32>
    %410 = vector.extract_strided_slice %394 {offsets = [0, 256], sizes = [8, 128], strides = [1, 1]} : vector<8x384xf32> to vector<8x128xf32>
    %411 = vector.extract_strided_slice %397 {offsets = [0, 256], sizes = [8, 128], strides = [1, 1]} : vector<8x384xf32> to vector<8x128xf32>
    %412 = vector.broadcast %234 : vector<1x128xf32> to vector<8x128xf32>
    %413 = arith.addf %411, %412 : vector<8x128xf32>
    %414 = arith.mulf %408, %413 : vector<8x128xf32>
    %415 = arith.addf %410, %414 : vector<8x128xf32>
    %416 = math.tanh %415 : vector<8x128xf32>
    %417 = arith.subf %393, %416 : vector<8x128xf32>
    %418 = arith.mulf %409, %417 : vector<8x128xf32>
    %419 = arith.addf %416, %418 : vector<8x128xf32>
    %c56_145 = arith.constant 56 : index
    %c0_146 = arith.constant 0 : index
    %420 = vector.load %arg18[%c56_145, %c0_146] : memref<64x384xf32, #tpu.memory_space<vmem>>, vector<8x384xf32>
    %421 = arith.truncf %419 : vector<8x128xf32> to vector<8x128xbf16>
    %c0_147 = arith.constant 0 : index
    %c0_148 = arith.constant 0 : index
    %422 = vector.load %arg14[%c0_147, %c0_148] : memref<128x384xbf16, #tpu.memory_space<vmem>>, vector<128x384xbf16>
    %cst_149 = arith.constant dense<0.000000e+00> : vector<8x384xf32>
    %423 = tpu.matmul %421, %422, %cst_149 {dimension_numbers = #tpu.dot_dimension_numbers<[1], [0], [0], [1], [0, 0, 1, 1], [], []>} : vector<8x128xbf16>, vector<128x384xbf16>, vector<8x384xf32> -> vector<8x384xf32>
    %424 = vector.extract_strided_slice %420 {offsets = [0, 0], sizes = [8, 256], strides = [1, 1]} : vector<8x384xf32> to vector<8x256xf32>
    %425 = vector.extract_strided_slice %423 {offsets = [0, 0], sizes = [8, 256], strides = [1, 1]} : vector<8x384xf32> to vector<8x256xf32>
    %426 = arith.addf %424, %425 : vector<8x256xf32>
    %cst_150 = arith.constant 5.000000e-01 : f32
    %427 = vector.broadcast %cst_150 : f32 to vector<8x256xf32>
    %428 = arith.mulf %427, %426 : vector<8x256xf32>
    %429 = math.tanh %428 : vector<8x256xf32>
    %cst_151 = arith.constant 5.000000e-01 : f32
    %430 = vector.broadcast %cst_151 : f32 to vector<8x256xf32>
    %431 = arith.mulf %430, %429 : vector<8x256xf32>
    %cst_152 = arith.constant 5.000000e-01 : f32
    %432 = vector.broadcast %cst_152 : f32 to vector<8x256xf32>
    %433 = arith.addf %431, %432 : vector<8x256xf32>
    %434 = vector.extract_strided_slice %433 {offsets = [0, 0], sizes = [8, 128], strides = [1, 1]} : vector<8x256xf32> to vector<8x128xf32>
    %435 = vector.extract_strided_slice %433 {offsets = [0, 128], sizes = [8, 128], strides = [1, 1]} : vector<8x256xf32> to vector<8x128xf32>
    %436 = vector.extract_strided_slice %420 {offsets = [0, 256], sizes = [8, 128], strides = [1, 1]} : vector<8x384xf32> to vector<8x128xf32>
    %437 = vector.extract_strided_slice %423 {offsets = [0, 256], sizes = [8, 128], strides = [1, 1]} : vector<8x384xf32> to vector<8x128xf32>
    %438 = vector.broadcast %234 : vector<1x128xf32> to vector<8x128xf32>
    %439 = arith.addf %437, %438 : vector<8x128xf32>
    %440 = arith.mulf %434, %439 : vector<8x128xf32>
    %441 = arith.addf %436, %440 : vector<8x128xf32>
    %442 = math.tanh %441 : vector<8x128xf32>
    %443 = arith.subf %419, %442 : vector<8x128xf32>
    %444 = arith.mulf %435, %443 : vector<8x128xf32>
    %445 = arith.addf %442, %444 : vector<8x128xf32>
    %c3_i32_153 = arith.constant 3 : i32
    %446 = tpu.memref_slice %arg20[%c3_i32_153] : memref<4x!tpu.dma_semaphore, #tpu.memory_space<semaphore_mem>> -> memref<1x!tpu.dma_semaphore, #tpu.memory_space<semaphore_mem>>
    %447 = tpu.memref_squeeze %446 : memref<1x!tpu.dma_semaphore, #tpu.memory_space<semaphore_mem>> -> memref<!tpu.dma_semaphore, #tpu.memory_space<semaphore_mem>>
    tpu.wait_dma2 semaphore(%447 : memref<!tpu.dma_semaphore, #tpu.memory_space<semaphore_mem>>) src(%arg11 : memref<128x140xbf16, #tpu.memory_space<any>>) dst(%arg16 : memref<128x140xbf16, #tpu.memory_space<vmem>>)
    %448 = arith.truncf %445 : vector<8x128xf32> to vector<8x128xbf16>
    %c0_154 = arith.constant 0 : index
    %c0_155 = arith.constant 0 : index
    %449 = vector.load %arg16[%c0_154, %c0_155] : memref<128x140xbf16, #tpu.memory_space<vmem>>, vector<128x140xbf16>
    %cst_156 = arith.constant dense<0.000000e+00> : vector<8x140xf32>
    %450 = tpu.matmul %448, %449, %cst_156 {dimension_numbers = #tpu.dot_dimension_numbers<[1], [0], [0], [1], [0, 0, 1, 1], [], []>} : vector<8x128xbf16>, vector<128x140xbf16>, vector<8x140xf32> -> vector<8x140xf32>
    %c0_157 = arith.constant 0 : index
    %c0_158 = arith.constant 0 : index
    %451 = vector.load %arg7[%c0_157, %c0_158] : memref<1x140xf32, #tpu.memory_space<vmem>>, vector<1x140xf32>
    %452 = vector.broadcast %451 : vector<1x140xf32> to vector<8x140xf32>
    %453 = arith.addf %450, %452 : vector<8x140xf32>
    %454 = math.tanh %453 : vector<8x140xf32>
    %c0_159 = arith.constant 0 : index
    %c0_160 = arith.constant 0 : index
    %455 = vector.load %arg12[%c0_159, %c0_160] : memref<8x140xf32, #tpu.memory_space<vmem>>, vector<8x140xf32>
    tpu.vector_store %arg12[%c0_159, %c0_160], %454 {strides = array<i32>} : memref<8x140xf32, #tpu.memory_space<vmem>>, vector<8x140xf32>,
    return
  }
  func.func @transform_0(%arg0: i32) -> (i32, i32) {
    %c0_i32 = arith.constant 0 : i32
    %c0_i32_0 = arith.constant 0 : i32
    %c0_i32_1 = arith.constant 0 : i32
    return %c0_i32, %c0_i32_0 : i32, i32
  }
  func.func @transform_1(%arg0: i32) -> (i32, i32) {
    %c0_i32 = arith.constant 0 : i32
    %c0_i32_0 = arith.constant 0 : i32
    %c0_i32_1 = arith.constant 0 : i32
    return %c0_i32, %c0_i32_0 : i32, i32
  }
  func.func @transform_2(%arg0: i32) -> (i32, i32) {
    %c0_i32 = arith.constant 0 : i32
    %c0_i32_0 = arith.constant 0 : i32
    %c0_i32_1 = arith.constant 0 : i32
    return %c0_i32, %c0_i32_0 : i32, i32
  }
  func.func @transform_3(%arg0: i32) -> (i32, i32) {
    %c0_i32 = arith.constant 0 : i32
    %c0_i32_0 = arith.constant 0 : i32
    %c0_i32_1 = arith.constant 0 : i32
    return %c0_i32, %c0_i32_0 : i32, i32
  }
  func.func @transform_4(%arg0: i32) -> (i32, i32) {
    %c0_i32 = arith.constant 0 : i32
    %c0_i32_0 = arith.constant 0 : i32
    %c0_i32_1 = arith.constant 0 : i32
    return %c0_i32, %c0_i32_0 : i32, i32
  }
  func.func @transform_5(%arg0: i32) -> (i32, i32) {
    %c0_i32 = arith.constant 0 : i32
    %c0_i32_0 = arith.constant 0 : i32
    %c0_i32_1 = arith.constant 0 : i32
    return %c0_i32, %c0_i32_0 : i32, i32
  }
  func.func @transform_6(%arg0: i32) -> (i32, i32) {
    %c0_i32 = arith.constant 0 : i32
    %c0_i32_0 = arith.constant 0 : i32
    %c0_i32_1 = arith.constant 0 : i32
    return %c0_i32, %c0_i32_0 : i32, i32
  }
  func.func @transform_11(%arg0: i32) -> (i32, i32) {
    %c0_i32 = arith.constant 0 : i32
    %c0_i32_0 = arith.constant 0 : i32
    %c0_i32_1 = arith.constant 0 : i32
    return %c0_i32, %c0_i32_0 : i32, i32
  }
}

</mosaic_0001>

<bundles_post_ra>
// kernel: custom_gru_forward_fn.1
= control target key start
LH: loop header
LB: loop body
LE: loop exit
PB: predicated region body
PF: predicated region fallthrough
CT: control target
= control target key end

     0   :  { %16 = vsyncpa [#allocation11], 0  ;;  %s5006_s0 = inlined_call_operand.vmem [shape: f32[8,8], index: 0, kind: input, shape index: {}]   ;;  %s5007_s1 = inlined_call_operand.vmem [shape: bf16[1,384], index: 1, kind: input, shape index: {}]   ;;  %s5008_s2 = inlined_call_operand.vmem [shape: f32[1,384], index: 2, kind: input, shape index: {}]   ;;  %s5009_s3 = inlined_call_operand.vmem [shape: f32[1,128], index: 3, kind: input, shape index: {}]   ;;  %s5010_s4 = inlined_call_operand.vmem [shape: f32[1,384], index: 4, kind: input, shape index: {}]   ;;  %s5011_s5 = inlined_call_operand.vmem [shape: f32[1,128], index: 5, kind: input, shape index: {}]   ;;  %s5012_s6 = inlined_call_operand.vmem [shape: f32[1,140], index: 6, kind: input, shape index: {}]   ;;  %s5013_s7 = inlined_call_operand.vmem [shape: bf16[128,384], index: 7, kind: input, shape index: {}]   ;;  %s5014_s8 = inlined_call_operand.hbm [shape: bf16[128,384], index: 8, kind: input, shape index: {}]   ;;  %s5015_s9 = inlined_call_operand.hbm [shape: bf16[128,384], index: 9, kind: input, shape index: {}]   ;;  %s5016_s10 = inlined_call_operand.vmem [shape: bf16[128,140], index: 10, kind: input, shape index: {}]   ;;  %s5017_s11 = inlined_call_operand.hbm [shape: f32[8,140], index: 11, kind: output, shape index: {}]  }
   0x1   :  { %v41_v0 = vld [vmem:[%s5013_s7] sm:$0xff]  ;;  %v43_v1 = vld [vmem:[%s5013_s7 + $0x8] sm:$0xff]  ;;  %v45_v2 = vld [vmem:[%s5013_s7 + $0x10] sm:$0xff] }
   0x2   :  { %42 = vst [vmem:[#allocation2] sm:$0xff] %v41_v0  ;;  %v47_v3 = vld [vmem:[%s5013_s7 + $0x18] sm:$0xff]  ;;  %v49_v4 = vld [vmem:[%s5013_s7 + $0x20] sm:$0xff]  ;;  %v51_v5 = vld [vmem:[%s5013_s7 + $0x28] sm:$0xff] }
   0x3   :  { %44 = vst [vmem:[#allocation2 + $0x8] sm:$0xff] %v43_v1  ;;  %v53_v6 = vld [vmem:[%s5013_s7 + $0x30] sm:$0xff]  ;;  %v55_v7 = vld [vmem:[%s5013_s7 + $0x38] sm:$0xff]  ;;  %v57_v8 = vld [vmem:[%s5013_s7 + $0x40] sm:$0xff] }
   0x4   :  { %46 = vst [vmem:[#allocation2 + $0x10] sm:$0xff] %v45_v2  ;;  %v59_v9 = vld [vmem:[%s5013_s7 + $0x48] sm:$0xff]  ;;  %v61_v10 = vld [vmem:[%s5013_s7 + $0x50] sm:$0xff]  ;;  %v63_v11 = vld [vmem:[%s5013_s7 + $0x58] sm:$0xff] }
   0x5   :  { %48 = vst [vmem:[#allocation2 + $0x18] sm:$0xff] %v47_v3  ;;  %v65_v12 = vld [vmem:[%s5013_s7 + $0x60] sm:$0xff]  ;;  %v67_v13 = vld [vmem:[%s5013_s7 + $0x68] sm:$0xff]  ;;  %v69_v14 = vld [vmem:[%s5013_s7 + $0x70] sm:$0xff] }
   0x6   :  { %50 = vst [vmem:[#allocation2 + $0x20] sm:$0xff] %v49_v4  ;;  %v71_v15 = vld [vmem:[%s5013_s7 + $0x78] sm:$0xff]  ;;  %v73_v16 = vld [vmem:[%s5013_s7 + $0x80] sm:$0xff]  ;;  %v75_v17 = vld [vmem:[%s5013_s7 + $0x88] sm:$0xff] }
   0x7   :  { %52 = vst [vmem:[#allocation2 + $0x28] sm:$0xff] %v51_v5  ;;  %v77_v18 = vld [vmem:[%s5013_s7 + $0x90] sm:$0xff]  ;;  %v79_v19 = vld [vmem:[%s5013_s7 + $0x98] sm:$0xff]  ;;  %v81_v20 = vld [vmem:[%s5013_s7 + $0xa0] sm:$0xff] }
   0x8   :  { %54 = vst [vmem:[#allocation2 + $0x30] sm:$0xff] %v53_v6  ;;  %v83_v21 = vld [vmem:[%s5013_s7 + $0xa8] sm:$0xff]  ;;  %v85_v22 = vld [vmem:[%s5013_s7 + $0xb0] sm:$0xff]  ;;  %v87_v23 = vld [vmem:[%s5013_s7 + $0xb8] sm:$0xff] }
   0x9   :  { %56 = vst [vmem:[#allocation2 + $0x38] sm:$0xff] %v55_v7 }
   0xa   :  { %58 = vst [vmem:[#allocation2 + $0x40] sm:$0xff] %v57_v8 }
   0xb   :  { %60 = vst [vmem:[#allocation2 + $0x48] sm:$0xff] %v59_v9 }
   0xc   :  { %62 = vst [vmem:[#allocation2 + $0x50] sm:$0xff] %v61_v10 }
   0xd   :  { %64 = vst [vmem:[#allocation2 + $0x58] sm:$0xff] %v63_v11 }
   0xe   :  { %66 = vst [vmem:[#allocation2 + $0x60] sm:$0xff] %v65_v12 }
   0xf   :  { %68 = vst [vmem:[#allocation2 + $0x68] sm:$0xff] %v67_v13 }
  0x10   :  { %70 = vst [vmem:[#allocation2 + $0x70] sm:$0xff] %v69_v14 }
  0x11   :  { %72 = vst [vmem:[#allocation2 + $0x78] sm:$0xff] %v71_v15 }
  0x12   :  { %74 = vst [vmem:[#allocation2 + $0x80] sm:$0xff] %v73_v16 }
  0x13   :  { %76 = vst [vmem:[#allocation2 + $0x88] sm:$0xff] %v75_v17 }
  0x14   :  { %78 = vst [vmem:[#allocation2 + $0x90] sm:$0xff] %v77_v18 }
  0x15   :  { %80 = vst [vmem:[#allocation2 + $0x98] sm:$0xff] %v79_v19 }
  0x16   :  { %82 = vst [vmem:[#allocation2 + $0xa0] sm:$0xff] %v81_v20 }
  0x17   :  { %84 = vst [vmem:[#allocation2 + $0xa8] sm:$0xff] %v83_v21 }
  0x18   :  { %86 = vst [vmem:[#allocation2 + $0xb0] sm:$0xff] %v85_v22 }
  0x19   :  { %88 = vst [vmem:[#allocation2 + $0xb8] sm:$0xff] %v87_v23 }
  0x1a   :  { %94 = vsyncadd [#allocation9], 3072  ;;  %s103_s29 = sshll.u32 %s5014_s8, 4  ;;  %v134_v24 = vld [vmem:[%s5016_s10] sm:$0xff]  ;;  %v136_v25 = vld [vmem:[%s5016_s10 + $0x8] sm:$0xff]  ;;  %s4329_s15 = smov [#allocation3]   ;;  %v178_v40 = vlaneseq  ;;  %s104_s29 = int_to_ptr.hbm [resolvable:$true] %s103_s29 }
  0x1b   :  { %s105_s16 = sshll.u32 %s4329_s15, 4  ;;  %135 = vst [vmem:[#allocation5] sm:$0xff] %v134_v24  ;;  %v138_v26 = vld [vmem:[%s5016_s10 + $0x10] sm:$0xff]  ;;  %v140_v27 = vld [vmem:[%s5016_s10 + $0x18] sm:$0xff]  ;;  %s117_s21 = sshll.u32 %s5015_s9, 4  ;;  %v142_v28 = vld [vmem:[%s5016_s10 + $0x20] sm:$0xff]  ;;  %s106_s16 = int_to_ptr.vmem [resolvable:$true] %s105_s16  ;;  %s118_s21 = int_to_ptr.hbm [resolvable:$true] %s117_s21 }
  0x1c   :  { %137 = vst [vmem:[#allocation5 + $0x8] sm:$0xff] %v136_v25  ;;  %108 = dma.hbm_to_vmem [thread:$0]  %s104_s29, 3072, %s106_s16, [#allocation9 + $0x1]  ;;  %v144_v29 = vld [vmem:[%s5016_s10 + $0x28] sm:$0xff]  ;;  %v146_v30 = vld [vmem:[%s5016_s10 + $0x30] sm:$0xff]  ;;  %v148_v31 = vld [vmem:[%s5016_s10 + $0x38] sm:$0xff] }
  0x1d   :  { %139 = vst [vmem:[#allocation5 + $0x10] sm:$0xff] %v138_v26  ;;  %s4330_s28 = smov [#allocation4]   ;;  %v150_v32 = vld [vmem:[%s5016_s10 + $0x40] sm:$0xff]  ;;  %v152_v33 = vld [vmem:[%s5016_s10 + $0x48] sm:$0xff]  ;;  %v154_v34 = vld [vmem:[%s5016_s10 + $0x50] sm:$0xff] }
  0x1e   :  { %141 = vst [vmem:[#allocation5 + $0x18] sm:$0xff] %v140_v27  ;;  %s119_s30 = sshll.u32 %s4330_s28, 4  ;;  %v156_v35 = vld [vmem:[%s5016_s10 + $0x58] sm:$0xff]  ;;  %v158_v36 = vld [vmem:[%s5016_s10 + $0x60] sm:$0xff]  ;;  %v160_v37 = vld [vmem:[%s5016_s10 + $0x68] sm:$0xff]  ;;  %s120_s30 = int_to_ptr.vmem [resolvable:$true] %s119_s30 }
  0x1f   :  { %143 = vst [vmem:[#allocation5 + $0x20] sm:$0xff] %v142_v28  ;;  %122 = dma.hbm_to_vmem [thread:$0]  %s118_s21, 3072, %s120_s30, [#allocation9 + $0x2]  ;;  %v162_v38 = vld [vmem:[%s5016_s10 + $0x70] sm:$0xff]  ;;  %v164_v39 = vld [vmem:[%s5016_s10 + $0x78] sm:$0xff] }
  0x20   :  { %145 = vst [vmem:[#allocation5 + $0x28] sm:$0xff] %v144_v29 }
  0x21   :  { %147 = vst [vmem:[#allocation5 + $0x30] sm:$0xff] %v146_v30 }
  0x22   :  { %149 = vst [vmem:[#allocation5 + $0x38] sm:$0xff] %v148_v31 }
  0x23   :  { %151 = vst [vmem:[#allocation5 + $0x40] sm:$0xff] %v150_v32 }
  0x24   :  { %153 = vst [vmem:[#allocation5 + $0x48] sm:$0xff] %v152_v33 }
  0x25   :  { %155 = vst [vmem:[#allocation5 + $0x50] sm:$0xff] %v154_v34 }
  0x26   :  { %157 = vst [vmem:[#allocation5 + $0x58] sm:$0xff] %v156_v35 }
  0x27   :  { %159 = vst [vmem:[#allocation5 + $0x60] sm:$0xff] %v158_v36 }
  0x28   :  { %161 = vst [vmem:[#allocation5 + $0x68] sm:$0xff] %v160_v37 }
  0x29   :  { %163 = vst [vmem:[#allocation5 + $0x70] sm:$0xff] %v162_v38 }
  0x2a   :  { %165 = vst [vmem:[#allocation5 + $0x78] sm:$0xff] %v164_v39 }
  0x2b   :  { %171 = vsyncadd [#allocation9 + $0x3], 2048  ;;  %v179_v41 = vshrl.u32 %v178_v40, 7  ;;  %v174_v42 = vld [vmem:[%s5006_s0] sm:$0xff] }
  0x2c   :  { %v191_v43 = vperm.slane %v174_v42, 2  ;;  %v177_v44 = vperm.slane %v174_v42, 0  ;;  %v205_v45 = vperm.slane %v174_v42, 4  ;;  %v198_v46 = vperm.slane %v174_v42, 3  ;;  %v175_v51 = vld [vmem:[%s5007_s1] sm:$0x7] }
  0x2d   :  { %4144 = vset.pattern.permute.xlu1 %v179_v41  ;;  %4143 = vset.pattern.permute.xlu0 %v179_v41  ;;  %v184_v47 = vperm.slane %v174_v42, 1  ;;  %v212_v48 = vperm.slane %v174_v42, 5  ;;  %v226_v49 = vperm.slane %v174_v42, 7  ;;  %v219_v50 = vperm.slane %v174_v42, 6  ;;  %v172_v57 = vld [vmem:[%s5008_s2] sm:$0x7] }
  0x2e   :  { %4145 = vset.pattern.permute.xlu2 %v179_v41  ;;  %v176_v52 = vunpack.c.l.bf16 %v175_v51  ;;  %v4527_v61 = vperm.slane %v172_v57, 0  ;;  %v4529_v62 = vperm.slane %v172_v57, 1  ;;  %v4531_v63 = vperm.slane %v172_v57, 2 }
  0x30   :  { %v234_v54 = vperm.slane %v176_v52, 0  ;;  %v235_v55 = vperm.slane %v176_v52, 2  ;;  %v236_v56 = vperm.slane %v176_v52, 4 }
  0x32   :  { %v240_v58 = vperm.slane %v234_v54, 0  ;;  %v241_v59 = vperm.slane %v235_v55, 0  ;;  %v242_v60 = vperm.slane %v236_v56, 0 }
  0x35   :  { %196 = vperm.xlu1 %4144, %v191_v43   ;;  %182 = vperm.xlu0 %4143, %v177_v44   ;;  %v4583_v44 = vld [vmem:[%s5009_s3] ss:$0 sm:$0xff] }
  0x36   :  { %210 = vperm.xlu2 %4145, %v205_v45  }
  0x3d   :  { %203 = vperm.xlu1 %4144, %v198_v46   ;;  %189 = vperm.xlu0 %4143, %v184_v47  }
  0x3e   :  { %217 = vperm.xlu2 %4145, %v212_v48  }
  0x45   :  { %231 = vperm.xlu1 %4144, %v226_v49   ;;  %224 = vperm.xlu0 %4143, %v219_v50  }
  0x90   :  { %v211_v53 = vpop.permute.xlu2 %210 }
  0x91   :  { %v255_v1 = vmul.f32 %v240_v58, %v211_v53  ;;  %v256_v2 = vmul.f32 %v241_v59, %v211_v53  ;;  %v257_v3 = vmul.f32 %v242_v60, %v211_v53 }
  0x93   :  { %v4534_v7 = vadd.f32 %v4527_v61, %v255_v1  ;;  %v4537_v8 = vadd.f32 %v4529_v62, %v256_v2  ;;  %v4540_v9 = vadd.f32 %v4531_v63, %v257_v3 }
  0x98   :  { %v218_v0 = vpop.permute.xlu2 %217 }
  0x99   :  { %v258_v4 = vmul.f32 %v240_v58, %v218_v0  ;;  %v259_v5 = vmul.f32 %v241_v59, %v218_v0  ;;  %v260_v6 = vmul.f32 %v242_v60, %v218_v0 }
  0x9b   :  { %v4543_v10 = vadd.f32 %v4527_v61, %v258_v4  ;;  %v4546_v11 = vadd.f32 %v4529_v62, %v259_v5  ;;  %v4549_v12 = vadd.f32 %v4531_v63, %v260_v6 }
  0xa7   :  { %v197_v13 = vpop.permute.xlu1 %196  ;;  %v183_v14 = vpop.permute.xlu0 %182 }
  0xa8   :  { %v249_v15 = vmul.f32 %v240_v58, %v197_v13  ;;  %v250_v16 = vmul.f32 %v241_v59, %v197_v13  ;;  %v251_v17 = vmul.f32 %v242_v60, %v197_v13  ;;  %v243_v18 = vmul.f32 %v240_v58, %v183_v14 }
  0xa9   :  { %v244_v19 = vmul.f32 %v241_v59, %v183_v14  ;;  %v245_v42 = vmul.f32 %v242_v60, %v183_v14 }
  0xaa   :  { %v4552_v20 = vadd.f32 %v4527_v61, %v249_v15  ;;  %v4555_v21 = vadd.f32 %v4529_v62, %v250_v16  ;;  %v4558_v22 = vadd.f32 %v4531_v63, %v251_v17  ;;  %v274_v23 = vadd.f32 %v4527_v61, %v243_v18 }
  0xab   :  { %v275_v25 = vadd.f32 %v4529_v62, %v244_v19  ;;  %v276_v48 = vadd.f32 %v4531_v63, %v245_v42 }
  0xac   :  { %v325_v24 = vmul.f32 0.5, %v274_v23 }
  0xad   :  { %v326_v32 = vmul.f32 0.5, %v275_v25 }
  0xae   :  { %4147 = vtanh.f32 %v325_v24 }
  0xaf   :  { %v204_v26 = vpop.permute.xlu1 %203  ;;  %v190_v27 = vpop.permute.xlu0 %189  ;;  %4149 = vtanh.f32 %v326_v32 }
  0xb0   :  { %v252_v28 = vmul.f32 %v240_v58, %v204_v26  ;;  %v253_v29 = vmul.f32 %v241_v59, %v204_v26  ;;  %v254_v30 = vmul.f32 %v242_v60, %v204_v26  ;;  %v246_v31 = vmul.f32 %v240_v58, %v190_v27 }
  0xb1   :  { %v247_v33 = vmul.f32 %v241_v59, %v190_v27  ;;  %v248_v34 = vmul.f32 %v242_v60, %v190_v27 }
  0xb2   :  { %v4563_v35 = vadd.f32 %v4527_v61, %v252_v28  ;;  %v4566_v36 = vadd.f32 %v4529_v62, %v253_v29  ;;  %v4569_v37 = vadd.f32 %v4531_v63, %v254_v30  ;;  %v4572_v38 = vadd.f32 %v4527_v61, %v246_v31 }
  0xb3   :  { %v4575_v39 = vadd.f32 %v4529_v62, %v247_v33  ;;  %v4578_v40 = vadd.f32 %v4531_v63, %v248_v34 }
  0xb4   :  { %v4148_v41 = vpop.eup %4147 }
  0xb5   :  { %v329_v43 = vmul.f32 0.5, %v4148_v41  ;;  %v4150_v1 = vpop.eup %4149 }
  0xb7   :  { %v331_v45 = vadd.f32 0.5, %v329_v43  ;;  %v232_v46 = vpop.permute.xlu1 %231  ;;  %v225_v47 = vpop.permute.xlu0 %224 }
  0xb8   :  { %v264_v49 = vmul.f32 %v240_v58, %v232_v46  ;;  %v265_v50 = vmul.f32 %v241_v59, %v232_v46  ;;  %v266_v51 = vmul.f32 %v242_v60, %v232_v46  ;;  %v261_v53 = vmul.f32 %v240_v58, %v225_v47 }
  0xb9   :  { %v336_v52 = vmul.f32 %v4583_v44, %v331_v45  ;;  %v262_v54 = vmul.f32 %v241_v59, %v225_v47  ;;  %v263_v55 = vmul.f32 %v242_v60, %v225_v47  ;;  %v330_v59 = vmul.f32 0.5, %v4150_v1 }
  0xba   :  { %v4588_v56 = vadd.f32 %v4527_v61, %v264_v49  ;;  %v4591_v57 = vadd.f32 %v4529_v62, %v265_v50  ;;  %v4594_v0 = vadd.f32 %v4531_v63, %v266_v51  ;;  %v4597_v3 = vadd.f32 %v4527_v61, %v261_v53 }
  0xbb   :  { %v337_v2 = vadd.f32 %v336_v52, %v276_v48  ;;  %v4600_v4 = vadd.f32 %v4529_v62, %v262_v54  ;;  %v4603_v58 = vadd.f32 %v4531_v63, %v263_v55  ;;  %v332_v60 = vadd.f32 0.5, %v330_v59 }
  0xbd   :  { %4151 = vtanh.f32 %v337_v2 }
  0xc3   :  { %v4152_v5 = vpop.eup %4151 }
  0xc4   :  { %v339_v6 = vmul.f32 %v4152_v5, %v332_v60 }
  0xc6   :  { %v4605_v13 = vsub.f32 %v4152_v5, %v339_v6 }
  0xc7   :  { %4319 = dma.done.wait [#allocation9], 3072 }
  0xc8   :  { %4320 = vsyncadd [#allocation9], 4294964224  ;;  %v4610_v61 = vld [vmem:[%s5010_s4] sm:$0x7]  ;;  %v3062_v63 = vld [vmem:[#allocation2 + $0xa8] sm:$0xf] }
  0xc9   :  { %v4615_v62 = vld [vmem:[%s5011_s5] sm:$0x1]  ;;  %v3930_v14 = vld [vmem:[#allocation2 + $0xb0] sm:$0xf0]  ;;  %v3070_v15 = vld [vmem:[#allocation2 + $0xb0] sm:$0xf] }
  0xca   :  { %v3931_v16 = vld [vmem:[#allocation2 + $0xb8] sm:$0xf0]  ;;  %v3063_v17 = vor.u32 %v3930_v14, %v3062_v63  ;;  %v3050_v19 = vld [vmem:[#allocation2 + $0x90] sm:$0xf]  ;;  %v3058_v24 = vld [vmem:[#allocation2 + $0x98] sm:$0xf] }
  0xcb   :  { %v3071_v18 = vor.u32 %v3931_v16, %v3070_v15  ;;  %v3927_v23 = vld [vmem:[#allocation2 + $0x98] sm:$0xf0]  ;;  %v3928_v25 = vld [vmem:[#allocation2 + $0xa0] sm:$0xf0]  ;;  %v3929_v26 = vld [vmem:[#allocation2 + $0xac] sm:$0xf] }
  0xcc   :  { %v3064_v27 = vld [vmem:[#allocation2 + $0xb4] sm:$0xf0]  ;;  %510 = vmatpush.bf16.msra.mxu0 %v3063_v17  ;;  %v3051_v28 = vor.u32 %v3927_v23, %v3050_v19  ;;  %v3059_v29 = vor.u32 %v3928_v25, %v3058_v24  ;;  %v3924_v32 = vld [vmem:[#allocation2 + $0x80] sm:$0xf0]  ;;  %v3046_v33 = vld [vmem:[#allocation2 + $0x80] sm:$0xf] }
  0xcd   :  { %536 = vmatpush.bf16.msra.mxu2 %v3071_v18  ;;  %v3067_v30 = vor.u32 %v3929_v26, %v3064_v27  ;;  %v3038_v31 = vld [vmem:[#allocation2 + $0x78] sm:$0xf]  ;;  %v3925_v34 = vld [vmem:[#allocation2 + $0x88] sm:$0xf0]  ;;  %v3926_v41 = vld [vmem:[#allocation2 + $0x94] sm:$0xf] }
  0xce   :  { %v3052_v42 = vld [vmem:[#allocation2 + $0x9c] sm:$0xf0]  ;;  %v3923_v45 = vld [vmem:[#allocation2 + $0x7c] sm:$0xf]  ;;  %v3040_v46 = vld [vmem:[#allocation2 + $0x84] sm:$0xf0]  ;;  %v3039_v47 = vor.u32 %v3924_v32, %v3038_v31  ;;  %v3047_v48 = vor.u32 %v3925_v34, %v3046_v33 }
  0xcf   :  { %523 = vmatpush.bf16.msra.mxu1 %v3067_v30  ;;  %v3055_v43 = vor.u32 %v3926_v41, %v3052_v42  ;;  %v3026_v49 = vld [vmem:[#allocation2 + $0x60] sm:$0xf]  ;;  %v3921_v50 = vld [vmem:[#allocation2 + $0x68] sm:$0xf0]  ;;  %v3034_v51 = vld [vmem:[#allocation2 + $0x68] sm:$0xf]  ;;  %v3043_v53 = vor.u32 %v3923_v45, %v3040_v46 }
  0xd0   :  { %511 = vmatpush.bf16.msra.mxu0 %v3051_v28  ;;  %v3922_v52 = vld [vmem:[#allocation2 + $0x70] sm:$0xf0]  ;;  %v3920_v54 = vld [vmem:[#allocation2 + $0x64] sm:$0xf]  ;;  %v3028_v55 = vld [vmem:[#allocation2 + $0x6c] sm:$0xf0]  ;;  %v3027_v1 = vor.u32 %v3921_v50, %v3026_v49 }
  0xd1   :  { %537 = vmatpush.bf16.msra.mxu2 %v3059_v29  ;;  %v3035_v2 = vor.u32 %v3922_v52, %v3034_v51  ;;  %v3014_v59 = vld [vmem:[#allocation2 + $0x48] sm:$0xf]  ;;  %v3918_v60 = vld [vmem:[#allocation2 + $0x50] sm:$0xf0]  ;;  %v3022_v5 = vld [vmem:[#allocation2 + $0x50] sm:$0xf]  ;;  %v3031_v63 = vor.u32 %v3920_v54, %v3028_v55 }
  0xd2   :  { %v3919_v6 = vld [vmem:[#allocation2 + $0x58] sm:$0xf0]  ;;  %v3917_v14 = vld [vmem:[#allocation2 + $0x4c] sm:$0xf]  ;;  %v3016_v15 = vld [vmem:[#allocation2 + $0x54] sm:$0xf0]  ;;  %v3015_v16 = vor.u32 %v3918_v60, %v3014_v59 }
  0xd3   :  { %524 = vmatpush.bf16.msra.mxu1 %v3055_v43  ;;  %v3023_v17 = vor.u32 %v3919_v6, %v3022_v5  ;;  %v3002_v18 = vld [vmem:[#allocation2 + $0x30] sm:$0xf]  ;;  %v3915_v19 = vld [vmem:[#allocation2 + $0x38] sm:$0xf0]  ;;  %v3010_v23 = vld [vmem:[#allocation2 + $0x38] sm:$0xf]  ;;  %v3019_v25 = vor.u32 %v3917_v14, %v3016_v15 }
  0xd4   :  { %512 = vmatpush.bf16.msra.mxu0 %v3039_v47  ;;  %v3916_v24 = vld [vmem:[#allocation2 + $0x40] sm:$0xf0]  ;;  %v3914_v26 = vld [vmem:[#allocation2 + $0x34] sm:$0xf]  ;;  %v3004_v27 = vld [vmem:[#allocation2 + $0x3c] sm:$0xf0]  ;;  %v3003_v28 = vor.u32 %v3915_v19, %v3002_v18 }
  0xd5   :  { %538 = vmatpush.bf16.msra.mxu2 %v3047_v48  ;;  %v3011_v29 = vor.u32 %v3916_v24, %v3010_v23  ;;  %v2990_v30 = vld [vmem:[#allocation2 + $0x18] sm:$0xf]  ;;  %v3912_v31 = vld [vmem:[#allocation2 + $0x20] sm:$0xf0]  ;;  %v2998_v32 = vld [vmem:[#allocation2 + $0x20] sm:$0xf]  ;;  %v3007_v34 = vor.u32 %v3914_v26, %v3004_v27 }
  0xd6   :  { %v3913_v33 = vld [vmem:[#allocation2 + $0x28] sm:$0xf0]  ;;  %v3911_v41 = vld [vmem:[#allocation2 + $0x1c] sm:$0xf]  ;;  %v2992_v42 = vld [vmem:[#allocation2 + $0x24] sm:$0xf0]  ;;  %v2991_v43 = vor.u32 %v3912_v31, %v2990_v30 }
  0xd7   :  { %525 = vmatpush.bf16.msra.mxu1 %v3043_v53  ;;  %v2999_v45 = vor.u32 %v3913_v33, %v2998_v32  ;;  %v2978_v46 = vld [vmem:[#allocation2] sm:$0xf]  ;;  %v3909_v47 = vld [vmem:[#allocation2 + $0x8] sm:$0xf0]  ;;  %v2986_v48 = vld [vmem:[#allocation2 + $0x8] sm:$0xf]  ;;  %v2995_v50 = vor.u32 %v3911_v41, %v2992_v42 }
  0xd8   :  { %513 = vmatpush.bf16.msra.mxu0 %v3027_v1  ;;  %v3910_v49 = vld [vmem:[#allocation2 + $0x10] sm:$0xf0]  ;;  %v3908_v51 = vld [vmem:[#allocation2 + $0x4] sm:$0xf]  ;;  %v2980_v52 = vld [vmem:[#allocation2 + $0xc] sm:$0xf0]  ;;  %v2979_v53 = vor.u32 %v3909_v47, %v2978_v46  ;;  %v349_v1 = vpack.c.bf16 %v4605_v13, %v4605_v13 }
  0xd9   :  { %539 = vmatpush.bf16.msra.mxu2 %v3035_v2  ;;  %v2987_v54 = vor.u32 %v3910_v49, %v2986_v48  ;;  %v2983_v55 = vor.u32 %v3908_v51, %v2980_v52  ;;  %v3158_v2 = vld [vmem:[#allocation2 + $0xa8] sm:$0xf]  ;;  %v3954_v59 = vld [vmem:[#allocation2 + $0xb0] sm:$0xf0]  ;;  %v3953_v60 = vld [vmem:[#allocation2 + $0xac] sm:$0xf] }
  0xda   :  { %v3159_v5 = vor.u32 %v3954_v59, %v3158_v2  ;;  %v3160_v6 = vld [vmem:[#allocation2 + $0xb4] sm:$0xf0]  ;;  %v3955_v14 = vld [vmem:[#allocation2 + $0xb8] sm:$0xf0]  ;;  %v3950_v19 = vld [vmem:[#allocation2 + $0x94] sm:$0xf] }
  0xdb   :  { %526 = vmatpush.bf16.msra.mxu1 %v3031_v63  ;;  %v3166_v63 = vld [vmem:[#allocation2 + $0xb0] sm:$0xf]  ;;  %v3163_v15 = vor.u32 %v3953_v60, %v3160_v6  ;;  %v3951_v18 = vld [vmem:[#allocation2 + $0x98] sm:$0xf0]  ;;  %v3148_v24 = vld [vmem:[#allocation2 + $0x9c] sm:$0xf0] }
  0xdc   :  { %514 = vmatpush.bf16.msra.mxu0 %v3015_v16  ;;  %v3167_v16 = vor.u32 %v3955_v14, %v3166_v63  ;;  %731 = vmatpush.bf16.msra.mxu3 %v3159_v5  ;;  %v3952_v26 = vld [vmem:[#allocation2 + $0xa0] sm:$0xf0]  ;;  %v3151_v27 = vor.u32 %v3950_v19, %v3148_v24  ;;  %v3947_v31 = vld [vmem:[#allocation2 + $0x7c] sm:$0xf]  ;;  %v3136_v33 = vld [vmem:[#allocation2 + $0x84] sm:$0xf0] }
  0xdd   :  { %540 = vmatpush.bf16.msra.mxu2 %v3023_v17  ;;  %v3146_v17 = vld [vmem:[#allocation2 + $0x90] sm:$0xf]  ;;  %v3948_v30 = vld [vmem:[#allocation2 + $0x80] sm:$0xf0]  ;;  %v3949_v41 = vld [vmem:[#allocation2 + $0x88] sm:$0xf0]  ;;  %v3139_v42 = vor.u32 %v3947_v31, %v3136_v33 }
  0xde   :  { %v3147_v23 = vor.u32 %v3951_v18, %v3146_v17  ;;  %v3945_v46 = vld [vmem:[#allocation2 + $0x68] sm:$0xf0]  ;;  %v3944_v47 = vld [vmem:[#allocation2 + $0x64] sm:$0xf]  ;;  %v3124_v49 = vld [vmem:[#allocation2 + $0x6c] sm:$0xf0] }
  0xdf   :  { %527 = vmatpush.bf16.msra.mxu1 %v3019_v25  ;;  %v3154_v25 = vld [vmem:[#allocation2 + $0x98] sm:$0xf]  ;;  %v3946_v51 = vld [vmem:[#allocation2 + $0x70] sm:$0xf0]  ;;  %v3127_v52 = vor.u32 %v3944_v47, %v3124_v49  ;;  %v3118_v60 = vld [vmem:[#allocation2 + $0x50] sm:$0xf] }
  0xe0   :  { %515 = vmatpush.bf16.msra.mxu0 %v3003_v28  ;;  %v3155_v28 = vor.u32 %v3952_v26, %v3154_v25  ;;  %732 = vmatpush.bf16.msra.mxu3 %v3147_v23  ;;  %v3112_v59 = vld [vmem:[#allocation2 + $0x54] sm:$0xf0]  ;;  %v3943_v5 = vld [vmem:[#allocation2 + $0x58] sm:$0xf0]  ;;  %v3098_v14 = vld [vmem:[#allocation2 + $0x30] sm:$0xf] }
  0xe1   :  { %541 = vmatpush.bf16.msra.mxu2 %v3011_v29  ;;  %v3134_v29 = vld [vmem:[#allocation2 + $0x78] sm:$0xf]  ;;  %v3119_v63 = vor.u32 %v3943_v5, %v3118_v60  ;;  %v3100_v18 = vld [vmem:[#allocation2 + $0x3c] sm:$0xf0]  ;;  %v3940_v23 = vld [vmem:[#allocation2 + $0x40] sm:$0xf0] }
  0xe2   :  { %v3135_v32 = vor.u32 %v3948_v30, %v3134_v29  ;;  %v3106_v19 = vld [vmem:[#allocation2 + $0x38] sm:$0xf]  ;;  %v3088_v29 = vld [vmem:[#allocation2 + $0x24] sm:$0xf0]  ;;  %v3094_v30 = vld [vmem:[#allocation2 + $0x20] sm:$0xf] }
  0xe3   :  { %528 = vmatpush.bf16.msra.mxu1 %v3007_v34  ;;  %v3142_v34 = vld [vmem:[#allocation2 + $0x80] sm:$0xf]  ;;  %v3107_v25 = vor.u32 %v3940_v23, %v3106_v19  ;;  %v3086_v26 = vld [vmem:[#allocation2 + $0x18] sm:$0xf]  ;;  %v3937_v31 = vld [vmem:[#allocation2 + $0x28] sm:$0xf0] }
  0xe4   :  { %516 = vmatpush.bf16.msra.mxu0 %v2991_v43  ;;  %v3143_v43 = vor.u32 %v3949_v41, %v3142_v34  ;;  %733 = vmatpush.bf16.msra.mxu3 %v3135_v32  ;;  %v3095_v34 = vor.u32 %v3937_v31, %v3094_v30  ;;  %v3074_v41 = vld [vmem:[#allocation2] sm:$0xf]  ;;  %v3934_v47 = vld [vmem:[#allocation2 + $0x10] sm:$0xf0]  ;;  %v3262_v31 = vld [vmem:[#allocation2 + $0xb0] sm:$0xf] }
  0xe5   :  { %542 = vmatpush.bf16.msra.mxu2 %v2999_v45  ;;  %v3122_v45 = vld [vmem:[#allocation2 + $0x60] sm:$0xf] }
  0xe6   :  { %v3123_v48 = vor.u32 %v3945_v46, %v3122_v45  ;;  %v3076_v45 = vld [vmem:[#allocation2 + $0xc] sm:$0xf0]  ;;  %v3082_v46 = vld [vmem:[#allocation2 + $0x8] sm:$0xf] }
  0xe7   :  { %529 = vmatpush.bf16.msra.mxu1 %v2995_v50  ;;  %v3130_v50 = vld [vmem:[#allocation2 + $0x68] sm:$0xf] }
  0xe8   :  { %517 = vmatpush.bf16.msra.mxu0 %v2979_v53  ;;  %v3131_v53 = vor.u32 %v3946_v51, %v3130_v50  ;;  %734 = vmatpush.bf16.msra.mxu3 %v3123_v48  ;;  %v3083_v50 = vor.u32 %v3934_v47, %v3082_v46  ;;  %v3244_v46 = vld [vmem:[#allocation2 + $0x9c] sm:$0xf0]  ;;  %v3250_v47 = vld [vmem:[#allocation2 + $0x98] sm:$0xf] }
  0xe9   :  { %543 = vmatpush.bf16.msra.mxu2 %v2987_v54  ;;  %v3110_v54 = vld [vmem:[#allocation2 + $0x48] sm:$0xf] }
  0xeb   :  { %530 = vmatpush.bf16.msra.mxu1 %v2983_v55  ;;  %518 = vmatmul.bf16.vlgmr.msra.gmra.mxu0 %v349_v1  ;;  %v3942_v55 = vld [vmem:[#allocation2 + $0x50] sm:$0xf0] }
  0xec   :  { %544 = vmatmul.bf16.vlgmr.msra.gmra.mxu2 %v349_v1  ;;  %744 = vmatpush.bf16.msrb.mxu0 %v3163_v15  ;;  %v3111_v2 = vor.u32 %v3942_v55, %v3110_v54  ;;  %v3939_v15 = vld [vmem:[#allocation2 + $0x38] sm:$0xf0] }
  0xed   :  { %v3099_v17 = vor.u32 %v3939_v15, %v3098_v14 }
  0xee   :  { %531 = vmatmul.bf16.vlgmr.msra.gmra.mxu1 %v349_v1  ;;  %v3941_v1 = vld [vmem:[#allocation2 + $0x4c] sm:$0xf]  ;;  %735 = vmatpush.bf16.msra.mxu3 %v3111_v2 }
  0xef   :  { %757 = vmatpush.bf16.msrb.mxu1 %v3167_v16  ;;  %v3115_v6 = vor.u32 %v3941_v1, %v3112_v59  ;;  %v3938_v16 = vld [vmem:[#allocation2 + $0x34] sm:$0xf] }
  0xf0   :  { %745 = vmatpush.bf16.msrb.mxu0 %v3151_v27  ;;  %v3103_v24 = vor.u32 %v3938_v16, %v3100_v18  ;;  %v3936_v27 = vld [vmem:[#allocation2 + $0x20] sm:$0xf0] }
  0xf1   :  { %v3087_v32 = vor.u32 %v3936_v27, %v3086_v26  ;;  %v3254_v27 = vld [vmem:[#allocation2 + $0xa8] sm:$0xf] }
  0xf2   :  { %736 = vmatpush.bf16.msra.mxu3 %v3099_v17 }
  0xf3   :  { %758 = vmatpush.bf16.msrb.mxu1 %v3155_v28  ;;  %v3935_v28 = vld [vmem:[#allocation2 + $0x1c] sm:$0xf] }
  0xf4   :  { %746 = vmatpush.bf16.msrb.mxu0 %v3139_v42  ;;  %v3091_v33 = vor.u32 %v3935_v28, %v3088_v29  ;;  %v3933_v42 = vld [vmem:[#allocation2 + $0x8] sm:$0xf0]  ;;  %v3978_v28 = vld [vmem:[#allocation2 + $0xb0] sm:$0xf0] }
  0xf5   :  { %v3075_v48 = vor.u32 %v3933_v42, %v3074_v41  ;;  %v3977_v29 = vld [vmem:[#allocation2 + $0xac] sm:$0xf]  ;;  %v3255_v30 = vor.u32 %v3978_v28, %v3254_v27  ;;  %v3242_v41 = vld [vmem:[#allocation2 + $0x90] sm:$0xf]  ;;  %v3975_v42 = vld [vmem:[#allocation2 + $0x98] sm:$0xf0] }
  0xf6   :  { %737 = vmatpush.bf16.msra.mxu3 %v3087_v32  ;;  %v3979_v32 = vld [vmem:[#allocation2 + $0xb8] sm:$0xf0]  ;;  %v3214_v27 = vld [vmem:[#allocation2 + $0x50] sm:$0xf] }
  0xf7   :  { %759 = vmatpush.bf16.msrb.mxu1 %v3143_v43  ;;  %v3932_v43 = vld [vmem:[#allocation2 + $0x4] sm:$0xf]  ;;  %952 = vmatpush.bf16.msrb.mxu2 %v3255_v30  ;;  %v3967_v28 = vld [vmem:[#allocation2 + $0x58] sm:$0xf0] }
  0xf8   :  { %747 = vmatpush.bf16.msrb.mxu0 %v3127_v52  ;;  %v3079_v49 = vor.u32 %v3932_v43, %v3076_v45  ;;  %v3974_v43 = vld [vmem:[#allocation2 + $0x94] sm:$0xf]  ;;  %v3243_v45 = vor.u32 %v3975_v42, %v3242_v41  ;;  %v3215_v30 = vor.u32 %v3967_v28, %v3214_v27  ;;  %v3202_v41 = vld [vmem:[#allocation2 + $0x38] sm:$0xf]  ;;  %v3964_v42 = vld [vmem:[#allocation2 + $0x40] sm:$0xf0] }
  0xfa   :  { %738 = vmatpush.bf16.msra.mxu3 %v3075_v48  ;;  %v3976_v48 = vld [vmem:[#allocation2 + $0xa0] sm:$0xf0] }
  0xfb   :  { %760 = vmatpush.bf16.msrb.mxu1 %v3131_v53  ;;  %953 = vmatpush.bf16.msrb.mxu2 %v3243_v45  ;;  %v3203_v45 = vor.u32 %v3964_v42, %v3202_v41 }
  0xfc   :  { %748 = vmatpush.bf16.msrb.mxu0 %v3115_v6 }
  0xff   :  { %761 = vmatpush.bf16.msrb.mxu1 %v3119_v63 }
 0x100   :  { %749 = vmatpush.bf16.msrb.mxu0 %v3103_v24 }
 0x103   :  { %762 = vmatpush.bf16.msrb.mxu1 %v3107_v25 }
 0x104   :  { %750 = vmatpush.bf16.msrb.mxu0 %v3091_v33 }
 0x107   :  { %763 = vmatpush.bf16.msrb.mxu1 %v3095_v34  ;;  %v3263_v34 = vor.u32 %v3979_v32, %v3262_v31  ;;  %v3963_v31 = vld [vmem:[#allocation2 + $0x38] sm:$0xf0]  ;;  %v3962_v32 = vld [vmem:[#allocation2 + $0x34] sm:$0xf] }
 0x108   :  { %751 = vmatpush.bf16.msrb.mxu0 %v3079_v49  ;;  %v3247_v49 = vor.u32 %v3974_v43, %v3244_v46  ;;  %v3182_v46 = vld [vmem:[#allocation2 + $0x18] sm:$0xf] }
 0x10b   :  { %764 = vmatpush.bf16.msrb.mxu1 %v3083_v50  ;;  %v3251_v50 = vor.u32 %v3976_v48, %v3250_v47  ;;  %v3960_v47 = vld [vmem:[#allocation2 + $0x20] sm:$0xf0]  ;;  %v3959_v48 = vld [vmem:[#allocation2 + $0x1c] sm:$0xf] }
 0x10c   :  { %978 = vmatpush.bf16.msra.mxu0 %v3263_v34  ;;  %v3196_v34 = vld [vmem:[#allocation2 + $0x3c] sm:$0xf0] }
 0x10d   :  { %v3199_v43 = vor.u32 %v3962_v32, %v3196_v34 }
 0x110   :  { %979 = vmatpush.bf16.msra.mxu0 %v3251_v50  ;;  %v3190_v50 = vld [vmem:[#allocation2 + $0x20] sm:$0xf] }
 0x168   :  { %v519_v51 = vpop.f32.mrf.mxu0 }
 0x169   :  { %v549_v52 = vadd.f32 %v519_v51, %v4572_v38  ;;  %v3230_v51 = vld [vmem:[#allocation2 + $0x78] sm:$0xf] }
 0x16b   :  { %v532_v53 = vpop.f32.mrf.mxu1  ;;  %v551_v54 = vmul.f32 0.5, %v549_v52  ;;  %v3972_v52 = vld [vmem:[#allocation2 + $0x80] sm:$0xf0] }
 0x16c   :  { %v550_v55 = vadd.f32 %v532_v53, %v4575_v39  ;;  %v3971_v53 = vld [vmem:[#allocation2 + $0x7c] sm:$0xf] }
 0x16d   :  { %4153 = vtanh.f32 %v551_v54  ;;  %v3231_v54 = vor.u32 %v3972_v52, %v3230_v51  ;;  %v3961_v51 = vld [vmem:[#allocation2 + $0x28] sm:$0xf0]  ;;  %v3183_v52 = vor.u32 %v3960_v47, %v3182_v46  ;;  %v4002_v46 = vld [vmem:[#allocation2 + $0xb0] sm:$0xf0] }
 0x16e   :  { %v552_v2 = vmul.f32 0.5, %v550_v55  ;;  %v3232_v55 = vld [vmem:[#allocation2 + $0x84] sm:$0xf0]  ;;  %v4001_v47 = vld [vmem:[#allocation2 + $0xac] sm:$0xf] }
 0x16f   :  { %v545_v1 = vpop.f32.mrf.mxu2  ;;  %954 = vmatpush.bf16.msrb.mxu2 %v3231_v54 }
 0x170   :  { %v521_v59 = vpop.f32.mrf.mxu0  ;;  %4155 = vtanh.f32 %v552_v2  ;;  %v559_v63 = vadd.f32 %v4583_v44, %v545_v1  ;;  %v3238_v1 = vld [vmem:[#allocation2 + $0x80] sm:$0xf]  ;;  %v3973_v2 = vld [vmem:[#allocation2 + $0x88] sm:$0xf0] }
 0x171   :  { %v3235_v59 = vor.u32 %v3971_v53, %v3232_v55  ;;  %v3191_v55 = vor.u32 %v3961_v51, %v3190_v50  ;;  %v4003_v50 = vld [vmem:[#allocation2 + $0xb8] sm:$0xf0] }
 0x173   :  { %v534_v60 = vpop.f32.mrf.mxu1  ;;  %v4154_v5 = vpop.eup %4153 }
 0x174   :  { %v555_v6 = vmul.f32 0.5, %v4154_v5  ;;  %v3239_v60 = vor.u32 %v3973_v2, %v3238_v1  ;;  %v3218_v5 = vld [vmem:[#allocation2 + $0x60] sm:$0xf]  ;;  %v3957_v2 = vld [vmem:[#allocation2 + $0x8] sm:$0xf0] }
 0x175   :  { %v3170_v1 = vld [vmem:[#allocation2] sm:$0xf] }
 0x176   :  { %v557_v14 = vadd.f32 0.5, %v555_v6  ;;  %v4156_v38 = vpop.eup %4155  ;;  %980 = vmatpush.bf16.msra.mxu0 %v3239_v60  ;;  %v3969_v6 = vld [vmem:[#allocation2 + $0x68] sm:$0xf0] }
 0x177   :  { %v547_v15 = vpop.f32.mrf.mxu2  ;;  %v556_v18 = vmul.f32 0.5, %v4156_v38  ;;  %v3970_v38 = vld [vmem:[#allocation2 + $0x70] sm:$0xf0] }
 0x178   :  { %v560_v16 = vmul.f32 %v559_v63, %v557_v14  ;;  %v3968_v63 = vld [vmem:[#allocation2 + $0x64] sm:$0xf]  ;;  %v3219_v14 = vor.u32 %v3969_v6, %v3218_v5  ;;  %v3220_v15 = vld [vmem:[#allocation2 + $0x6c] sm:$0xf0]  ;;  %v3178_v6 = vld [vmem:[#allocation2 + $0x8] sm:$0xf] }
 0x179   :  { %v558_v19 = vadd.f32 0.5, %v556_v18  ;;  %v3172_v5 = vld [vmem:[#allocation2 + $0xc] sm:$0xf0] }
 0x17a   :  { %v561_v17 = vadd.f32 %v560_v16, %v4578_v40  ;;  %v3256_v40 = vld [vmem:[#allocation2 + $0xb4] sm:$0xf0]  ;;  %v3226_v16 = vld [vmem:[#allocation2 + $0x68] sm:$0xf]  ;;  %955 = vmatpush.bf16.msrb.mxu2 %v3219_v14  ;;  %v3171_v14 = vor.u32 %v3957_v2, %v3170_v1  ;;  %v3340_v2 = vld [vmem:[#allocation2 + $0x9c] sm:$0xf0] }
 0x17b   :  { %v3259_v33 = vor.u32 %v3977_v29, %v3256_v40  ;;  %v3227_v18 = vor.u32 %v3970_v38, %v3226_v16  ;;  %v3194_v40 = vld [vmem:[#allocation2 + $0x30] sm:$0xf] }
 0x17c   :  { %4157 = vtanh.f32 %v561_v17  ;;  %v3223_v17 = vor.u32 %v3968_v63, %v3220_v15  ;;  %v3958_v63 = vld [vmem:[#allocation2 + $0x10] sm:$0xf0] }
 0x17d   :  { %965 = vmatpush.bf16.msrb.mxu3 %v3259_v33  ;;  %981 = vmatpush.bf16.msra.mxu0 %v3227_v18  ;;  %v3195_v33 = vor.u32 %v3963_v31, %v3194_v40  ;;  %v3179_v16 = vor.u32 %v3958_v63, %v3178_v6  ;;  %v3326_v63 = vld [vmem:[#allocation2 + $0x78] sm:$0xf] }
 0x181   :  { %966 = vmatpush.bf16.msrb.mxu3 %v3247_v49  ;;  %982 = vmatpush.bf16.msra.mxu0 %v3215_v30  ;;  %v3184_v49 = vld [vmem:[#allocation2 + $0x24] sm:$0xf0] }
 0x182   :  { %v4158_v39 = vpop.eup %4157  ;;  %v3187_v54 = vor.u32 %v3959_v48, %v3184_v49  ;;  %v3352_v48 = vld [vmem:[#allocation2 + $0xb4] sm:$0xf0]  ;;  %v3358_v49 = vld [vmem:[#allocation2 + $0xb0] sm:$0xf] }
 0x183   :  { %v563_v23 = vsub.f32 %v4605_v13, %v4158_v39  ;;  %v3355_v51 = vor.u32 %v4001_v47, %v3352_v48  ;;  %v3290_v47 = vld [vmem:[#allocation2 + $0x30] sm:$0xf]  ;;  %v3986_v48 = vld [vmem:[#allocation2 + $0x34] sm:$0xf] }
 0x185   :  { %v564_v24 = vmul.f32 %v563_v23, %v558_v19  ;;  %967 = vmatpush.bf16.msrb.mxu3 %v3235_v59  ;;  %v3206_v19 = vld [vmem:[#allocation2 + $0x48] sm:$0xf]  ;;  %v3965_v23 = vld [vmem:[#allocation2 + $0x4c] sm:$0xf]  ;;  %983 = vmatpush.bf16.msra.mxu0 %v3203_v45  ;;  %v3956_v59 = vld [vmem:[#allocation2 + $0x4] sm:$0xf] }
 0x186   :  { %v3175_v15 = vor.u32 %v3956_v59, %v3172_v5  ;;  %v3350_v45 = vld [vmem:[#allocation2 + $0xa8] sm:$0xf]  ;;  %v3346_v59 = vld [vmem:[#allocation2 + $0x98] sm:$0xf] }
 0x187   :  { %v4624_v25 = vadd.f32 %v4158_v39, %v564_v24  ;;  %v3966_v39 = vld [vmem:[#allocation2 + $0x50] sm:$0xf0] }
 0x188   :  { %v3207_v24 = vor.u32 %v3966_v39, %v3206_v19 }
 0x189   :  { %v570_v26 = vpack.c.bf16 %v4624_v25, %v4624_v25  ;;  %968 = vmatpush.bf16.msrb.mxu3 %v3223_v17  ;;  %984 = vmatpush.bf16.msra.mxu0 %v3191_v55  ;;  %v3998_v55 = vld [vmem:[#allocation2 + $0x94] sm:$0xf] }
 0x18a   :  { %956 = vmatpush.bf16.msrb.mxu2 %v3207_v24  ;;  %v3343_v5 = vor.u32 %v3998_v55, %v3340_v2  ;;  %v3278_v55 = vld [vmem:[#allocation2 + $0x18] sm:$0xf]  ;;  %v3983_v2 = vld [vmem:[#allocation2 + $0x1c] sm:$0xf] }
 0x18b   :  { %739 = vmatmul.bf16.vlgmr.msra.gmra.mxu3 %v570_v26  ;;  %752 = vmatmul.bf16.vlgmr.msrb.gmra.mxu0 %v570_v26 }
 0x18c   :  { %765 = vmatmul.bf16.vlgmr.msrb.gmra.mxu1 %v570_v26  ;;  %v3208_v26 = vld [vmem:[#allocation2 + $0x54] sm:$0xf0] }
 0x18d   :  { %v3211_v29 = vor.u32 %v3965_v23, %v3208_v26  ;;  %985 = vmatpush.bf16.msra.mxu0 %v3179_v16 }
 0x18e   :  { %957 = vmatpush.bf16.msrb.mxu2 %v3195_v33 }
 0x18f   :  { %969 = vmatpush.bf16.msrb.mxu3 %v3211_v29 }
 0x192   :  { %958 = vmatpush.bf16.msrb.mxu2 %v3183_v52  ;;  %v3359_v52 = vor.u32 %v4003_v50, %v3358_v49  ;;  %v3292_v50 = vld [vmem:[#allocation2 + $0x3c] sm:$0xf0] }
 0x193   :  { %970 = vmatpush.bf16.msrb.mxu3 %v3199_v43 }
 0x196   :  { %959 = vmatpush.bf16.msrb.mxu2 %v3171_v14  ;;  %v3996_v14 = vld [vmem:[#allocation2 + $0x80] sm:$0xf0] }
 0x197   :  { %971 = vmatpush.bf16.msrb.mxu3 %v3187_v54  ;;  %v3999_v54 = vld [vmem:[#allocation2 + $0x98] sm:$0xf0]  ;;  %v3327_v16 = vor.u32 %v3996_v14, %v3326_v63  ;;  %v3985_v63 = vld [vmem:[#allocation2 + $0x28] sm:$0xf0] }
 0x19a   :  { %1186 = vmatpush.bf16.msra.mxu2 %v3355_v51  ;;  %v3298_v51 = vld [vmem:[#allocation2 + $0x38] sm:$0xf] }
 0x19b   :  { %972 = vmatpush.bf16.msrb.mxu3 %v3175_v15  ;;  %v3995_v15 = vld [vmem:[#allocation2 + $0x7c] sm:$0xf] }
 0x19e   :  { %1187 = vmatpush.bf16.msra.mxu2 %v3343_v5  ;;  %v3280_v5 = vld [vmem:[#allocation2 + $0x24] sm:$0xf0] }
 0x19f   :  { %1199 = vmatpush.bf16.msra.mxu3 %v3359_v52  ;;  %v3988_v52 = vld [vmem:[#allocation2 + $0x40] sm:$0xf0]  ;;  %v3283_v14 = vor.u32 %v3983_v2, %v3280_v5  ;;  %v4027_v2 = vld [vmem:[#allocation2 + $0xb8] sm:$0xf0]  ;;  %v3434_v5 = vld [vmem:[#allocation2 + $0x90] sm:$0xf] }
 0x208   :  { %v753_v53 = vpop.f32.mrf.mxu0 }
 0x209   :  { %v766_v60 = vpop.f32.mrf.mxu1  ;;  %v771_v23 = vadd.f32 %v753_v53, %v4555_v21  ;;  %v3338_v53 = vld [vmem:[#allocation2 + $0x90] sm:$0xf] }
 0x20a   :  { %v780_v29 = vadd.f32 %v4583_v44, %v766_v60  ;;  %v3339_v1 = vor.u32 %v3999_v54, %v3338_v53  ;;  %v4000_v60 = vld [vmem:[#allocation2 + $0xa0] sm:$0xf0]  ;;  %v3295_v53 = vor.u32 %v3986_v48, %v3292_v50  ;;  %v3299_v54 = vor.u32 %v3988_v52, %v3298_v51  ;;  %v3446_v52 = vld [vmem:[#allocation2 + $0xa8] sm:$0xf] }
 0x20b   :  { %v773_v26 = vmul.f32 0.5, %v771_v23  ;;  %v3347_v6 = vor.u32 %v4000_v60, %v3346_v59  ;;  %v3314_v23 = vld [vmem:[#allocation2 + $0x60] sm:$0xf] }
 0x20d   :  { %1200 = vmatpush.bf16.msra.mxu3 %v3347_v6  ;;  %v3286_v6 = vld [vmem:[#allocation2 + $0x20] sm:$0xf] }
 0x20e   :  { %v740_v38 = vpop.f32.mrf.mxu3 }
 0x20f   :  { %v770_v17 = vadd.f32 %v740_v38, %v4552_v20  ;;  %v3328_v38 = vld [vmem:[#allocation2 + $0x84] sm:$0xf0] }
 0x210   :  { %v755_v18 = vpop.f32.mrf.mxu0 }
 0x211   :  { %v772_v19 = vmul.f32 0.5, %v770_v17  ;;  %v768_v39 = vpop.f32.mrf.mxu1  ;;  %v3334_v17 = vld [vmem:[#allocation2 + $0x80] sm:$0xf]  ;;  %v3997_v18 = vld [vmem:[#allocation2 + $0x88] sm:$0xf0] }
 0x212   :  { %v3335_v39 = vor.u32 %v3997_v18, %v3334_v17  ;;  %v3980_v17 = vld [vmem:[#allocation2 + $0x4] sm:$0xf] }
 0x213   :  { %4159 = vtanh.f32 %v772_v19  ;;  %v3331_v19 = vor.u32 %v3995_v15, %v3328_v38  ;;  %v3287_v15 = vor.u32 %v3985_v63, %v3286_v6  ;;  %v3981_v38 = vld [vmem:[#allocation2 + $0x8] sm:$0xf0]  ;;  %v4023_v6 = vld [vmem:[#allocation2 + $0x98] sm:$0xf0]  ;;  %v4022_v63 = vld [vmem:[#allocation2 + $0x94] sm:$0xf] }
 0x214   :  { %4161 = vtanh.f32 %v773_v26  ;;  %1201 = vmatpush.bf16.msra.mxu3 %v3335_v39  ;;  %v3992_v26 = vld [vmem:[#allocation2 + $0x64] sm:$0xf]  ;;  %v3274_v39 = vld [vmem:[#allocation2 + $0x8] sm:$0xf] }
 0x215   :  { %1188 = vmatpush.bf16.msra.mxu2 %v3331_v19  ;;  %v3268_v19 = vld [vmem:[#allocation2 + $0xc] sm:$0xf0] }
 0x216   :  { %v742_v24 = vpop.f32.mrf.mxu3 }
 0x217   :  { %v3993_v24 = vld [vmem:[#allocation2 + $0x68] sm:$0xf0] }
 0x219   :  { %v4160_v27 = vpop.eup %4159 }
 0x21a   :  { %v776_v28 = vmul.f32 0.5, %v4160_v27  ;;  %v4162_v31 = vpop.eup %4161  ;;  %v3315_v27 = vor.u32 %v3993_v24, %v3314_v23  ;;  %v3982_v23 = vld [vmem:[#allocation2 + $0x10] sm:$0xf0] }
 0x21b   :  { %v777_v32 = vmul.f32 0.5, %v4162_v31  ;;  %v3302_v31 = vld [vmem:[#allocation2 + $0x48] sm:$0xf] }
 0x21c   :  { %v778_v30 = vadd.f32 0.5, %v776_v28  ;;  %v3316_v28 = vld [vmem:[#allocation2 + $0x6c] sm:$0xf0] }
 0x21d   :  { %v779_v34 = vadd.f32 0.5, %v777_v32  ;;  %v3990_v32 = vld [vmem:[#allocation2 + $0x50] sm:$0xf0] }
 0x21e   :  { %v781_v40 = vmul.f32 %v780_v29, %v778_v30  ;;  %v3322_v29 = vld [vmem:[#allocation2 + $0x68] sm:$0xf]  ;;  %v3994_v30 = vld [vmem:[#allocation2 + $0x70] sm:$0xf0] }
 0x220   :  { %v782_v20 = vadd.f32 %v781_v40, %v4558_v22  ;;  %v3351_v22 = vor.u32 %v4002_v46, %v3350_v45  ;;  %v3319_v40 = vor.u32 %v3992_v26, %v3316_v28  ;;  %v3275_v28 = vor.u32 %v3982_v23, %v3274_v39  ;;  %v4020_v39 = vld [vmem:[#allocation2 + $0x80] sm:$0xf0]  ;;  %v4019_v23 = vld [vmem:[#allocation2 + $0x7c] sm:$0xf] }
 0x222   :  { %4163 = vtanh.f32 %v782_v20  ;;  %1173 = vmatpush.bf16.msra.mxu1 %v3351_v22  ;;  %v3323_v20 = vor.u32 %v3994_v30, %v3322_v29  ;;  %1189 = vmatpush.bf16.msra.mxu2 %v3319_v40  ;;  %v3987_v22 = vld [vmem:[#allocation2 + $0x38] sm:$0xf0] }
 0x223   :  { %v3291_v49 = vor.u32 %v3987_v22, %v3290_v47 }
 0x224   :  { %1202 = vmatpush.bf16.msra.mxu3 %v3323_v20 }
 0x226   :  { %1174 = vmatpush.bf16.msra.mxu1 %v3339_v1  ;;  %v3984_v1 = vld [vmem:[#allocation2 + $0x20] sm:$0xf0] }
 0x227   :  { %v3279_v60 = vor.u32 %v3984_v1, %v3278_v55  ;;  %v3448_v55 = vld [vmem:[#allocation2 + $0xb4] sm:$0xf0]  ;;  %v3454_v1 = vld [vmem:[#allocation2 + $0xb0] sm:$0xf] }
 0x228   :  { %v4164_v33 = vpop.eup %4163 }
 0x229   :  { %v784_v41 = vsub.f32 %v4624_v25, %v4164_v33 }
 0x22a   :  { %1175 = vmatpush.bf16.msra.mxu1 %v3327_v16  ;;  %v3266_v16 = vld [vmem:[#allocation2] sm:$0xf] }
 0x22b   :  { %v785_v42 = vmul.f32 %v784_v41, %v779_v34  ;;  %v3303_v34 = vor.u32 %v3990_v32, %v3302_v31  ;;  %v3304_v41 = vld [vmem:[#allocation2 + $0x54] sm:$0xf0]  ;;  %v3267_v18 = vor.u32 %v3981_v38, %v3266_v16  ;;  %v4024_v38 = vld [vmem:[#allocation2 + $0xa0] sm:$0xf0] }
 0x22c   :  { %v3442_v16 = vld [vmem:[#allocation2 + $0x98] sm:$0xf] }
 0x22d   :  { %v4633_v21 = vadd.f32 %v4164_v33, %v785_v42  ;;  %v3989_v33 = vld [vmem:[#allocation2 + $0x4c] sm:$0xf]  ;;  %v3310_v42 = vld [vmem:[#allocation2 + $0x50] sm:$0xf] }
 0x22e   :  { %1176 = vmatpush.bf16.msra.mxu1 %v3315_v27  ;;  %v3307_v45 = vor.u32 %v3989_v33, %v3304_v41  ;;  %v3271_v27 = vor.u32 %v3980_v17, %v3268_v19  ;;  %v3422_v19 = vld [vmem:[#allocation2 + $0x78] sm:$0xf] }
 0x22f   :  { %v791_v43 = vpack.c.bf16 %v4633_v21, %v4633_v21 }
 0x230   :  { %1190 = vmatpush.bf16.msra.mxu2 %v3307_v45 }
 0x231   :  { %960 = vmatmul.bf16.vlgmr.msrb.gmra.mxu2 %v791_v43  ;;  %973 = vmatmul.bf16.vlgmr.msrb.gmra.mxu3 %v791_v43 }
 0x232   :  { %986 = vmatmul.bf16.vlgmr.msra.gmra.mxu0 %v791_v43  ;;  %v3991_v43 = vld [vmem:[#allocation2 + $0x58] sm:$0xf0]  ;;  %1177 = vmatpush.bf16.msra.mxu1 %v3303_v34 }
 0x233   :  { %v3311_v46 = vor.u32 %v3991_v43, %v3310_v42 }
 0x234   :  { %1191 = vmatpush.bf16.msra.mxu2 %v3295_v53  ;;  %v4026_v53 = vld [vmem:[#allocation2 + $0xb0] sm:$0xf0] }
 0x235   :  { %1203 = vmatpush.bf16.msra.mxu3 %v3311_v46 }
 0x236   :  { %1178 = vmatpush.bf16.msra.mxu1 %v3291_v49 }
 0x238   :  { %1192 = vmatpush.bf16.msra.mxu2 %v3283_v14  ;;  %v3435_v14 = vor.u32 %v4023_v6, %v3434_v5  ;;  %v3374_v5 = vld [vmem:[#allocation2 + $0x18] sm:$0xf]  ;;  %v4008_v6 = vld [vmem:[#allocation2 + $0x20] sm:$0xf0] }
 0x239   :  { %1204 = vmatpush.bf16.msra.mxu3 %v3299_v54  ;;  %v4025_v54 = vld [vmem:[#allocation2 + $0xac] sm:$0xf] }
 0x23a   :  { %1179 = vmatpush.bf16.msra.mxu1 %v3279_v60  ;;  %v3455_v60 = vor.u32 %v4027_v2, %v3454_v1  ;;  %v3394_v1 = vld [vmem:[#allocation2 + $0x38] sm:$0xf]  ;;  %v4012_v2 = vld [vmem:[#allocation2 + $0x40] sm:$0xf0] }
 0x23c   :  { %1193 = vmatpush.bf16.msra.mxu2 %v3271_v27  ;;  %v3430_v27 = vld [vmem:[#allocation2 + $0x80] sm:$0xf] }
 0x23d   :  { %1205 = vmatpush.bf16.msra.mxu3 %v3287_v15  ;;  %v3436_v15 = vld [vmem:[#allocation2 + $0x9c] sm:$0xf0] }
 0x23e   :  { %1180 = vmatpush.bf16.msra.mxu1 %v3267_v18  ;;  %v3439_v17 = vor.u32 %v4022_v63, %v3436_v15  ;;  %v3443_v18 = vor.u32 %v4024_v38, %v3442_v16  ;;  %v4007_v63 = vld [vmem:[#allocation2 + $0x1c] sm:$0xf]  ;;  %v3376_v15 = vld [vmem:[#allocation2 + $0x24] sm:$0xf0]  ;;  %v3382_v16 = vld [vmem:[#allocation2 + $0x20] sm:$0xf] }
 0x23f   :  { %v4009_v38 = vld [vmem:[#allocation2 + $0x28] sm:$0xf0] }
 0x240   :  { %1420 = vmatpush.bf16.msrb.mxu2 %v3455_v60  ;;  %v3395_v60 = vor.u32 %v4012_v2, %v3394_v1  ;;  %v4050_v1 = vld [vmem:[#allocation2 + $0xb0] sm:$0xf0]  ;;  %v4049_v2 = vld [vmem:[#allocation2 + $0xac] sm:$0xf] }
 0x241   :  { %1206 = vmatpush.bf16.msra.mxu3 %v3275_v28  ;;  %v4021_v28 = vld [vmem:[#allocation2 + $0x88] sm:$0xf0] }
 0x244   :  { %1421 = vmatpush.bf16.msrb.mxu2 %v3443_v18  ;;  %v3383_v18 = vor.u32 %v4009_v38, %v3382_v16  ;;  %v4046_v16 = vld [vmem:[#allocation2 + $0x94] sm:$0xf] }
 0x2af   :  { %v987_v59 = vpop.f32.mrf.mxu0 }
 0x2b0   :  { %v1001_v42 = vadd.f32 %v4583_v44, %v987_v59  ;;  %v3451_v59 = vor.u32 %v4025_v54, %v3448_v55  ;;  %v4010_v54 = vld [vmem:[#allocation2 + $0x34] sm:$0xf]  ;;  %v3388_v55 = vld [vmem:[#allocation2 + $0x3c] sm:$0xf0] }
 0x2b2   :  { %1407 = vmatpush.bf16.msrb.mxu1 %v3451_v59  ;;  %v3391_v59 = vor.u32 %v4010_v54, %v3388_v55  ;;  %v3542_v55 = vld [vmem:[#allocation2 + $0xa8] sm:$0xf] }
 0x2b4   :  { %v961_v24 = vpop.f32.mrf.mxu2  ;;  %v974_v26 = vpop.f32.mrf.mxu3 }
 0x2b5   :  { %v991_v29 = vadd.f32 %v961_v24, %v4563_v35  ;;  %v992_v20 = vadd.f32 %v974_v26, %v4566_v36  ;;  %v3423_v24 = vor.u32 %v4020_v39, %v3422_v19  ;;  %v3424_v26 = vld [vmem:[#allocation2 + $0x84] sm:$0xf0]  ;;  %v3362_v19 = vld [vmem:[#allocation2] sm:$0xf]  ;;  %v4005_v39 = vld [vmem:[#allocation2 + $0x8] sm:$0xf0] }
 0x2b6   :  { %1408 = vmatpush.bf16.msrb.mxu1 %v3439_v17  ;;  %v3379_v17 = vor.u32 %v4007_v63, %v3376_v15  ;;  %v4047_v15 = vld [vmem:[#allocation2 + $0x98] sm:$0xf0] }
 0x2b7   :  { %v993_v30 = vmul.f32 0.5, %v991_v29  ;;  %v989_v40 = vpop.f32.mrf.mxu0  ;;  %v994_v33 = vmul.f32 0.5, %v992_v20  ;;  %v3427_v29 = vor.u32 %v4019_v23, %v3424_v26  ;;  %v4017_v20 = vld [vmem:[#allocation2 + $0x68] sm:$0xf0]  ;;  %v4004_v23 = vld [vmem:[#allocation2 + $0x4] sm:$0xf] }
 0x2b8   :  { %v3410_v40 = vld [vmem:[#allocation2 + $0x60] sm:$0xf]  ;;  %v3364_v26 = vld [vmem:[#allocation2 + $0xc] sm:$0xf0] }
 0x2b9   :  { %4165 = vtanh.f32 %v993_v30  ;;  %v3431_v30 = vor.u32 %v4021_v28, %v3430_v27  ;;  %v3370_v27 = vld [vmem:[#allocation2 + $0x8] sm:$0xf]  ;;  %v4006_v28 = vld [vmem:[#allocation2 + $0x10] sm:$0xf0] }
 0x2ba   :  { %4167 = vtanh.f32 %v994_v33  ;;  %1409 = vmatpush.bf16.msrb.mxu1 %v3427_v29  ;;  %v3412_v33 = vld [vmem:[#allocation2 + $0x6c] sm:$0xf0]  ;;  %v3367_v29 = vor.u32 %v4004_v23, %v3364_v26  ;;  %v4044_v26 = vld [vmem:[#allocation2 + $0x80] sm:$0xf0] }
 0x2bb   :  { %1422 = vmatpush.bf16.msrb.mxu2 %v3431_v30  ;;  %v3371_v30 = vor.u32 %v4006_v28, %v3370_v27  ;;  %v4043_v27 = vld [vmem:[#allocation2 + $0x7c] sm:$0xf] }
 0x2bc   :  { %v963_v31 = vpop.f32.mrf.mxu2  ;;  %v976_v32 = vpop.f32.mrf.mxu3 }
 0x2bd   :  { %v4016_v31 = vld [vmem:[#allocation2 + $0x64] sm:$0xf]  ;;  %v3411_v32 = vor.u32 %v4017_v20, %v3410_v40 }
 0x2bf   :  { %v4166_v34 = vpop.eup %4165 }
 0x2c0   :  { %v997_v41 = vmul.f32 0.5, %v4166_v34  ;;  %v4168_v46 = vpop.eup %4167  ;;  %v3418_v34 = vld [vmem:[#allocation2 + $0x68] sm:$0xf] }
 0x2c1   :  { %v998_v47 = vmul.f32 0.5, %v4168_v46  ;;  %v4013_v46 = vld [vmem:[#allocation2 + $0x4c] sm:$0xf] }
 0x2c2   :  { %v999_v43 = vadd.f32 0.5, %v997_v41  ;;  %v4018_v41 = vld [vmem:[#allocation2 + $0x70] sm:$0xf0] }
 0x2c3   :  { %v1000_v48 = vadd.f32 0.5, %v998_v47 }
 0x2c4   :  { %v1002_v45 = vmul.f32 %v1001_v42, %v999_v43  ;;  %v3415_v42 = vor.u32 %v4016_v31, %v3412_v33  ;;  %v3419_v43 = vor.u32 %v4018_v41, %v3418_v34 }
 0x2c6   :  { %v1003_v35 = vadd.f32 %v1002_v45, %v4569_v37  ;;  %v3447_v37 = vor.u32 %v4026_v53, %v3446_v52  ;;  %1410 = vmatpush.bf16.msrb.mxu1 %v3415_v42  ;;  %1423 = vmatpush.bf16.msrb.mxu2 %v3419_v43  ;;  %v3398_v45 = vld [vmem:[#allocation2 + $0x48] sm:$0xf]  ;;  %v3386_v52 = vld [vmem:[#allocation2 + $0x30] sm:$0xf]  ;;  %v4011_v53 = vld [vmem:[#allocation2 + $0x38] sm:$0xf0] }
 0x2c8   :  { %4169 = vtanh.f32 %v1003_v35  ;;  %1394 = vmatpush.bf16.msrb.mxu0 %v3447_v37  ;;  %v4014_v35 = vld [vmem:[#allocation2 + $0x50] sm:$0xf0]  ;;  %v3387_v37 = vor.u32 %v4011_v53, %v3386_v52 }
 0x2c9   :  { %v3399_v47 = vor.u32 %v4014_v35, %v3398_v45 }
 0x2cc   :  { %1395 = vmatpush.bf16.msrb.mxu0 %v3435_v14  ;;  %v3375_v14 = vor.u32 %v4008_v6, %v3374_v5  ;;  %v4051_v5 = vld [vmem:[#allocation2 + $0xb8] sm:$0xf0] }
 0x2ce   :  { %v4170_v22 = vpop.eup %4169 }
 0x2cf   :  { %v1005_v49 = vsub.f32 %v4633_v21, %v4170_v22 }
 0x2d0   :  { %1396 = vmatpush.bf16.msrb.mxu0 %v3423_v24  ;;  %v3363_v24 = vor.u32 %v4005_v39, %v3362_v19  ;;  %v4048_v19 = vld [vmem:[#allocation2 + $0xa0] sm:$0xf0] }
 0x2d1   :  { %v1006_v36 = vmul.f32 %v1005_v49, %v1000_v48  ;;  %v3406_v48 = vld [vmem:[#allocation2 + $0x50] sm:$0xf]  ;;  %v4015_v49 = vld [vmem:[#allocation2 + $0x58] sm:$0xf0] }
 0x2d3   :  { %v4642_v50 = vadd.f32 %v4170_v22, %v1006_v36  ;;  %v3400_v22 = vld [vmem:[#allocation2 + $0x54] sm:$0xf0] }
 0x2d4   :  { %1397 = vmatpush.bf16.msrb.mxu0 %v3411_v32  ;;  %v3403_v36 = vor.u32 %v4013_v46, %v3400_v22 }
 0x2d5   :  { %v1012_v51 = vpack.c.bf16 %v4642_v50, %v4642_v50 }
 0x2d6   :  { %1411 = vmatpush.bf16.msrb.mxu1 %v3403_v36 }
 0x2d7   :  { %1181 = vmatmul.bf16.vlgmr.msra.gmra.mxu1 %v1012_v51  ;;  %1194 = vmatmul.bf16.vlgmr.msra.gmra.mxu2 %v1012_v51 }
 0x2d8   :  { %1207 = vmatmul.bf16.vlgmr.msra.gmra.mxu3 %v1012_v51  ;;  %v3407_v51 = vor.u32 %v4015_v49, %v3406_v48  ;;  %1398 = vmatpush.bf16.msrb.mxu0 %v3399_v47 }
 0x2da   :  { %1424 = vmatpush.bf16.msrb.mxu2 %v3407_v51  ;;  %1412 = vmatpush.bf16.msrb.mxu1 %v3391_v59  ;;  %v3544_v59 = vld [vmem:[#allocation2 + $0xb4] sm:$0xf0] }
 0x2db   :  { %v3547_v6 = vor.u32 %v4049_v2, %v3544_v59  ;;  %v3484_v2 = vld [vmem:[#allocation2 + $0x3c] sm:$0xf0]  ;;  %v4036_v59 = vld [vmem:[#allocation2 + $0x40] sm:$0xf0] }
 0x2dc   :  { %1399 = vmatpush.bf16.msrb.mxu0 %v3387_v37 }
 0x2de   :  { %1425 = vmatpush.bf16.msrb.mxu2 %v3395_v60  ;;  %1413 = vmatpush.bf16.msrb.mxu1 %v3379_v17  ;;  %v3550_v60 = vld [vmem:[#allocation2 + $0xb0] sm:$0xf]  ;;  %v3532_v17 = vld [vmem:[#allocation2 + $0x9c] sm:$0xf0] }
 0x2df   :  { %v3551_v63 = vor.u32 %v4051_v5, %v3550_v60  ;;  %v3535_v39 = vor.u32 %v4046_v16, %v3532_v17  ;;  %v3472_v16 = vld [vmem:[#allocation2 + $0x24] sm:$0xf0]  ;;  %v4033_v17 = vld [vmem:[#allocation2 + $0x28] sm:$0xf0] }
 0x2e0   :  { %1400 = vmatpush.bf16.msrb.mxu0 %v3375_v14  ;;  %v3530_v14 = vld [vmem:[#allocation2 + $0x90] sm:$0xf] }
 0x2e1   :  { %v3531_v38 = vor.u32 %v4047_v15, %v3530_v14  ;;  %v4031_v14 = vld [vmem:[#allocation2 + $0x1c] sm:$0xf] }
 0x2e2   :  { %1426 = vmatpush.bf16.msrb.mxu2 %v3383_v18  ;;  %1414 = vmatpush.bf16.msrb.mxu1 %v3367_v29  ;;  %v3538_v18 = vld [vmem:[#allocation2 + $0x98] sm:$0xf]  ;;  %v3520_v29 = vld [vmem:[#allocation2 + $0x84] sm:$0xf0] }
 0x2e3   :  { %v3539_v23 = vor.u32 %v4048_v19, %v3538_v18  ;;  %v3475_v18 = vor.u32 %v4031_v14, %v3472_v16  ;;  %v4071_v14 = vld [vmem:[#allocation2 + $0x98] sm:$0xf0] }
 0x2e4   :  { %1401 = vmatpush.bf16.msrb.mxu0 %v3363_v24  ;;  %v3518_v24 = vld [vmem:[#allocation2 + $0x78] sm:$0xf] }
 0x2e5   :  { %v3519_v28 = vor.u32 %v4044_v26, %v3518_v24  ;;  %v4028_v24 = vld [vmem:[#allocation2 + $0x4] sm:$0xf] }
 0x2e6   :  { %1427 = vmatpush.bf16.msrb.mxu2 %v3371_v30  ;;  %1641 = vmatpush.bf16.msra.mxu1 %v3551_v63  ;;  %v3526_v30 = vld [vmem:[#allocation2 + $0x80] sm:$0xf]  ;;  %v4032_v63 = vld [vmem:[#allocation2 + $0x20] sm:$0xf0] }
 0x2e8   :  { %1628 = vmatpush.bf16.msra.mxu0 %v3547_v6  ;;  %v3470_v6 = vld [vmem:[#allocation2 + $0x18] sm:$0xf] }
 0x2e9   :  { %v3471_v15 = vor.u32 %v4032_v63, %v3470_v6  ;;  %v3626_v63 = vld [vmem:[#allocation2 + $0x90] sm:$0xf] }
 0x2ea   :  { %1642 = vmatpush.bf16.msra.mxu1 %v3539_v23  ;;  %v4029_v23 = vld [vmem:[#allocation2 + $0x8] sm:$0xf0]  ;;  %v3627_v16 = vor.u32 %v4071_v14, %v3626_v63  ;;  %v3574_v63 = vld [vmem:[#allocation2 + $0x20] sm:$0xf] }
 0x2eb   :  { %v4057_v14 = vld [vmem:[#allocation2 + $0x28] sm:$0xf0] }
 0x2ec   :  { %1629 = vmatpush.bf16.msra.mxu0 %v3535_v39  ;;  %v3458_v39 = vld [vmem:[#allocation2] sm:$0xf] }
 0x2ed   :  { %v3459_v26 = vor.u32 %v4029_v23, %v3458_v39  ;;  %v3614_v23 = vld [vmem:[#allocation2 + $0x78] sm:$0xf] }
 0x354   :  { %v1182_v40 = vpop.f32.mrf.mxu1 }
 0x355   :  { %v1212_v20 = vadd.f32 %v1182_v40, %v4534_v7  ;;  %v4045_v40 = vld [vmem:[#allocation2 + $0x88] sm:$0xf0] }
 0x357   :  { %v1214_v31 = vmul.f32 0.5, %v1212_v20  ;;  %v3523_v20 = vor.u32 %v4043_v27, %v3520_v29  ;;  %v3460_v27 = vld [vmem:[#allocation2 + $0xc] sm:$0xf0]  ;;  %v4030_v29 = vld [vmem:[#allocation2 + $0x10] sm:$0xf0] }
 0x359   :  { %4171 = vtanh.f32 %v1214_v31  ;;  %v3527_v31 = vor.u32 %v4045_v40, %v3526_v30  ;;  %1630 = vmatpush.bf16.msra.mxu0 %v3523_v20  ;;  %v3463_v30 = vor.u32 %v4028_v24, %v3460_v27  ;;  %v4068_v24 = vld [vmem:[#allocation2 + $0x80] sm:$0xf0] }
 0x35a   :  { %v1195_v32 = vpop.f32.mrf.mxu2  ;;  %v3615_v27 = vor.u32 %v4068_v24, %v3614_v23  ;;  %v3556_v24 = vld [vmem:[#allocation2 + $0xc] sm:$0xf0] }
 0x35b   :  { %v1213_v33 = vadd.f32 %v1195_v32, %v4537_v8  ;;  %v1208_v34 = vpop.f32.mrf.mxu3  ;;  %1643 = vmatpush.bf16.msra.mxu1 %v3527_v31  ;;  %v3506_v32 = vld [vmem:[#allocation2 + $0x60] sm:$0xf] }
 0x35c   :  { %v1184_v41 = vpop.f32.mrf.mxu1  ;;  %v1222_v46 = vadd.f32 %v4583_v44, %v1208_v34  ;;  %v4040_v34 = vld [vmem:[#allocation2 + $0x64] sm:$0xf] }
 0x35d   :  { %v1215_v42 = vmul.f32 0.5, %v1213_v33  ;;  %v4041_v33 = vld [vmem:[#allocation2 + $0x68] sm:$0xf0] }
 0x35e   :  { %v3507_v41 = vor.u32 %v4041_v33, %v3506_v32 }
 0x35f   :  { %v4172_v43 = vpop.eup %4171  ;;  %4173 = vtanh.f32 %v1215_v42  ;;  %v3508_v42 = vld [vmem:[#allocation2 + $0x6c] sm:$0xf0] }
 0x360   :  { %v1218_v45 = vmul.f32 0.5, %v4172_v43  ;;  %v3514_v43 = vld [vmem:[#allocation2 + $0x68] sm:$0xf] }
 0x362   :  { %v1220_v35 = vadd.f32 0.5, %v1218_v45  ;;  %v1197_v47 = vpop.f32.mrf.mxu2  ;;  %v4042_v45 = vld [vmem:[#allocation2 + $0x70] sm:$0xf0] }
 0x363   :  { %v1210_v22 = vpop.f32.mrf.mxu3  ;;  %v3494_v47 = vld [vmem:[#allocation2 + $0x48] sm:$0xf] }
 0x364   :  { %v1223_v7 = vmul.f32 %v1222_v46, %v1220_v35  ;;  %v3511_v35 = vor.u32 %v4040_v34, %v3508_v42  ;;  %v3515_v46 = vor.u32 %v4042_v45, %v3514_v43  ;;  %v4038_v22 = vld [vmem:[#allocation2 + $0x50] sm:$0xf0] }
 0x365   :  { %v4174_v49 = vpop.eup %4173 }
 0x366   :  { %v1224_v48 = vadd.f32 %v1223_v7, %v4540_v9  ;;  %v1219_v36 = vmul.f32 0.5, %v4174_v49  ;;  %v3543_v9 = vor.u32 %v4050_v1, %v3542_v55  ;;  %1631 = vmatpush.bf16.msra.mxu0 %v3511_v35  ;;  %1644 = vmatpush.bf16.msra.mxu1 %v3515_v46  ;;  %v4037_v7 = vld [vmem:[#allocation2 + $0x4c] sm:$0xf]  ;;  %v3496_v49 = vld [vmem:[#allocation2 + $0x54] sm:$0xf0] }
 0x367   :  { %v4034_v55 = vld [vmem:[#allocation2 + $0x34] sm:$0xf] }
 0x368   :  { %4175 = vtanh.f32 %v1224_v48  ;;  %v1221_v52 = vadd.f32 0.5, %v1219_v36  ;;  %1615 = vmatpush.bf16.msrb.mxu3 %v3543_v9  ;;  %v3495_v48 = vor.u32 %v4038_v22, %v3494_v47  ;;  %v3502_v36 = vld [vmem:[#allocation2 + $0x50] sm:$0xf]  ;;  %v3490_v9 = vld [vmem:[#allocation2 + $0x38] sm:$0xf]  ;;  %v3487_v60 = vor.u32 %v4034_v55, %v3484_v2 }
 0x369   :  { %v3491_v5 = vor.u32 %v4036_v59, %v3490_v9  ;;  %v3638_v55 = vld [vmem:[#allocation2 + $0xa8] sm:$0xf]  ;;  %v4073_v2 = vld [vmem:[#allocation2 + $0xac] sm:$0xf]  ;;  %v3640_v9 = vld [vmem:[#allocation2 + $0xb4] sm:$0xf0] }
 0x36a   :  { %v3646_v59 = vld [vmem:[#allocation2 + $0xb0] sm:$0xf] }
 0x36c   :  { %1616 = vmatpush.bf16.msrb.mxu3 %v3531_v38  ;;  %v3478_v38 = vld [vmem:[#allocation2 + $0x20] sm:$0xf] }
 0x36d   :  { %v3479_v19 = vor.u32 %v4033_v17, %v3478_v38  ;;  %v3628_v38 = vld [vmem:[#allocation2 + $0x9c] sm:$0xf0]  ;;  %v3634_v17 = vld [vmem:[#allocation2 + $0x98] sm:$0xf] }
 0x36e   :  { %v4176_v51 = vpop.eup %4175 }
 0x36f   :  { %v1226_v8 = vsub.f32 %v4642_v50, %v4176_v51 }
 0x370   :  { %1617 = vmatpush.bf16.msrb.mxu3 %v3519_v28  ;;  %v3466_v28 = vld [vmem:[#allocation2 + $0x8] sm:$0xf] }
 0x371   :  { %v1227_v53 = vmul.f32 %v1226_v8, %v1221_v52  ;;  %v3499_v52 = vor.u32 %v4037_v7, %v3496_v49  ;;  %v3467_v40 = vor.u32 %v4030_v29, %v3466_v28  ;;  %v3616_v28 = vld [vmem:[#allocation2 + $0x84] sm:$0xf0]  ;;  %v3622_v29 = vld [vmem:[#allocation2 + $0x80] sm:$0xf] }
 0x373   :  { %v4651_v54 = vadd.f32 %v4176_v51, %v1227_v53  ;;  %v4039_v51 = vld [vmem:[#allocation2 + $0x58] sm:$0xf0]  ;;  %1632 = vmatpush.bf16.msra.mxu0 %v3499_v52  ;;  %v3482_v53 = vld [vmem:[#allocation2 + $0x30] sm:$0xf] }
 0x374   :  { %1618 = vmatpush.bf16.msrb.mxu3 %v3507_v41  ;;  %v3503_v8 = vor.u32 %v4039_v51, %v3502_v36 }
 0x375   :  { %v1233_v37 = vpack.c.bf16 %v4651_v54, %v4651_v54 }
 0x376   :  { %1645 = vmatpush.bf16.msra.mxu1 %v3503_v8 }
 0x377   :  { %1402 = vmatmul.bf16.vlgmr.msrb.gmra.mxu0 %v1233_v37  ;;  %1415 = vmatmul.bf16.vlgmr.msrb.gmra.mxu1 %v1233_v37 }
 0x378   :  { %1428 = vmatmul.bf16.vlgmr.msrb.gmra.mxu2 %v1233_v37  ;;  %1619 = vmatpush.bf16.msrb.mxu3 %v3495_v48  ;;  %v4035_v37 = vld [vmem:[#allocation2 + $0x38] sm:$0xf0] }
 0x379   :  { %v3483_v1 = vor.u32 %v4035_v37, %v3482_v53  ;;  %1633 = vmatpush.bf16.msra.mxu0 %v3487_v60  ;;  %v4075_v60 = vld [vmem:[#allocation2 + $0xb8] sm:$0xf0] }
 0x37a   :  { %1646 = vmatpush.bf16.msra.mxu1 %v3491_v5  ;;  %v3643_v5 = vor.u32 %v4073_v2, %v3640_v9  ;;  %v3647_v6 = vor.u32 %v4075_v60, %v3646_v59  ;;  %v4060_v2 = vld [vmem:[#allocation2 + $0x40] sm:$0xf0]  ;;  %v3566_v59 = vld [vmem:[#allocation2 + $0x18] sm:$0xf] }
 0x37b   :  { %v4056_v60 = vld [vmem:[#allocation2 + $0x20] sm:$0xf0] }
 0x37c   :  { %1620 = vmatpush.bf16.msrb.mxu3 %v3483_v1  ;;  %v4074_v1 = vld [vmem:[#allocation2 + $0xb0] sm:$0xf0] }
 0x37d   :  { %1634 = vmatpush.bf16.msra.mxu0 %v3475_v18  ;;  %v4072_v18 = vld [vmem:[#allocation2 + $0xa0] sm:$0xf0] }
 0x37e   :  { %1647 = vmatpush.bf16.msra.mxu1 %v3479_v19  ;;  %v3635_v39 = vor.u32 %v4072_v18, %v3634_v17  ;;  %v3575_v17 = vor.u32 %v4057_v14, %v3574_v63  ;;  %v3554_v18 = vld [vmem:[#allocation2] sm:$0xf] }
 0x380   :  { %1621 = vmatpush.bf16.msrb.mxu3 %v3471_v15  ;;  %v4070_v15 = vld [vmem:[#allocation2 + $0x94] sm:$0xf] }
 0x381   :  { %1635 = vmatpush.bf16.msra.mxu0 %v3463_v30  ;;  %v3631_v19 = vor.u32 %v4070_v15, %v3628_v38  ;;  %v4069_v30 = vld [vmem:[#allocation2 + $0x88] sm:$0xf0]  ;;  %v3567_v15 = vor.u32 %v4056_v60, %v3566_v59 }
 0x382   :  { %1648 = vmatpush.bf16.msra.mxu1 %v3467_v40 }
 0x384   :  { %1622 = vmatpush.bf16.msrb.mxu3 %v3459_v26  ;;  %v4067_v26 = vld [vmem:[#allocation2 + $0x7c] sm:$0xf] }
 0x385   :  { %1862 = vmatpush.bf16.msrb.mxu0 %v3647_v6  ;;  %v3619_v40 = vor.u32 %v4067_v26, %v3616_v28  ;;  %v3568_v6 = vld [vmem:[#allocation2 + $0x24] sm:$0xf0] }
 0x386   :  { %v3562_v26 = vld [vmem:[#allocation2 + $0x8] sm:$0xf] }
 0x388   :  { %1849 = vmatpush.bf16.msra.mxu3 %v3643_v5  ;;  %v4055_v5 = vld [vmem:[#allocation2 + $0x1c] sm:$0xf] }
 0x389   :  { %1863 = vmatpush.bf16.msrb.mxu0 %v3635_v39  ;;  %v3571_v38 = vor.u32 %v4055_v5, %v3568_v6  ;;  %v4052_v39 = vld [vmem:[#allocation2 + $0x4] sm:$0xf] }
 0x38c   :  { %1850 = vmatpush.bf16.msra.mxu3 %v3631_v19  ;;  %v4053_v19 = vld [vmem:[#allocation2 + $0x8] sm:$0xf0] }
 0x38d   :  { %v3555_v28 = vor.u32 %v4053_v19, %v3554_v18 }
 0x390   :  { %1851 = vmatpush.bf16.msra.mxu3 %v3619_v40 }
 0x3f4   :  { %v1403_v20 = vpop.f32.mrf.mxu0  ;;  %v1416_v31 = vpop.f32.mrf.mxu1 }
 0x3f5   :  { %v1433_v32 = vadd.f32 %v1403_v20, %v4543_v10  ;;  %v1434_v34 = vadd.f32 %v1416_v31, %v4546_v11  ;;  %v3623_v20 = vor.u32 %v4069_v30, %v3622_v29  ;;  %v3602_v31 = vld [vmem:[#allocation2 + $0x60] sm:$0xf]  ;;  %v3559_v29 = vor.u32 %v4052_v39, %v3556_v24 }
 0x3f7   :  { %v1435_v33 = vmul.f32 0.5, %v1433_v32  ;;  %v1436_v45 = vmul.f32 0.5, %v1434_v34  ;;  %1864 = vmatpush.bf16.msrb.mxu0 %v3623_v20  ;;  %v4065_v32 = vld [vmem:[#allocation2 + $0x68] sm:$0xf0] }
 0x3f8   :  { %v3603_v34 = vor.u32 %v4065_v32, %v3602_v31 }
 0x3f9   :  { %4177 = vtanh.f32 %v1435_v33  ;;  %v4064_v33 = vld [vmem:[#allocation2 + $0x64] sm:$0xf] }
 0x3fa   :  { %4179 = vtanh.f32 %v1436_v45 }
 0x3fb   :  { %v1429_v41 = vpop.f32.mrf.mxu2 }
 0x3fc   :  { %v1405_v42 = vpop.f32.mrf.mxu0  ;;  %v1418_v43 = vpop.f32.mrf.mxu1  ;;  %v1443_v22 = vadd.f32 %v4583_v44, %v1429_v41  ;;  %v3604_v41 = vld [vmem:[#allocation2 + $0x6c] sm:$0xf0] }
 0x3fd   :  { %v3610_v42 = vld [vmem:[#allocation2 + $0x68] sm:$0xf]  ;;  %v4066_v43 = vld [vmem:[#allocation2 + $0x70] sm:$0xf0]  ;;  %v3607_v45 = vor.u32 %v4064_v33, %v3604_v41 }
 0x3ff   :  { %v4178_v35 = vpop.eup %4177  ;;  %1852 = vmatpush.bf16.msra.mxu3 %v3607_v45 }
 0x400   :  { %v1439_v46 = vmul.f32 0.5, %v4178_v35  ;;  %v4180_v49 = vpop.eup %4179  ;;  %v3611_v35 = vor.u32 %v4066_v43, %v3610_v42 }
 0x401   :  { %v1440_v36 = vmul.f32 0.5, %v4180_v49  ;;  %v4063_v49 = vld [vmem:[#allocation2 + $0x58] sm:$0xf0] }
 0x402   :  { %v1441_v47 = vadd.f32 0.5, %v1439_v46  ;;  %1865 = vmatpush.bf16.msrb.mxu0 %v3611_v35  ;;  %v3590_v46 = vld [vmem:[#allocation2 + $0x48] sm:$0xf] }
 0x403   :  { %v1431_v7 = vpop.f32.mrf.mxu2  ;;  %v1442_v52 = vadd.f32 0.5, %v1440_v36 }
 0x404   :  { %v1444_v48 = vmul.f32 %v1443_v22, %v1441_v47  ;;  %v4062_v47 = vld [vmem:[#allocation2 + $0x50] sm:$0xf0]  ;;  %v4061_v22 = vld [vmem:[#allocation2 + $0x4c] sm:$0xf] }
 0x405   :  { %v3591_v7 = vor.u32 %v4062_v47, %v3590_v46 }
 0x406   :  { %v1445_v10 = vadd.f32 %v1444_v48, %v4549_v12  ;;  %v3639_v12 = vor.u32 %v4074_v1, %v3638_v55  ;;  %v3592_v48 = vld [vmem:[#allocation2 + $0x54] sm:$0xf0]  ;;  %v3580_v55 = vld [vmem:[#allocation2 + $0x3c] sm:$0xf0] }
 0x407   :  { %v3595_v36 = vor.u32 %v4061_v22, %v3592_v48  ;;  %v3586_v1 = vld [vmem:[#allocation2 + $0x38] sm:$0xf] }
 0x408   :  { %4181 = vtanh.f32 %v1445_v10  ;;  %1836 = vmatpush.bf16.msra.mxu2 %v3639_v12  ;;  %v3598_v10 = vld [vmem:[#allocation2 + $0x50] sm:$0xf]  ;;  %v3587_v9 = vor.u32 %v4060_v2, %v3586_v1 }
 0x409   :  { %1853 = vmatpush.bf16.msra.mxu3 %v3595_v36 }
 0x40c   :  { %1837 = vmatpush.bf16.msra.mxu2 %v3627_v16 }
 0x40e   :  { %v4182_v51 = vpop.eup %4181 }
 0x40f   :  { %v1447_v11 = vsub.f32 %v4651_v54, %v4182_v51 }
 0x410   :  { %1838 = vmatpush.bf16.msra.mxu2 %v3615_v27  ;;  %v4054_v27 = vld [vmem:[#allocation2 + $0x10] sm:$0xf0] }
 0x411   :  { %v1448_v8 = vmul.f32 %v1447_v11, %v1442_v52  ;;  %v3578_v52 = vld [vmem:[#allocation2 + $0x30] sm:$0xf]  ;;  %v4059_v11 = vld [vmem:[#allocation2 + $0x38] sm:$0xf0]  ;;  %v3563_v30 = vor.u32 %v4054_v27, %v3562_v26 }
 0x413   :  { %v4660_v53 = vadd.f32 %v4182_v51, %v1448_v8  ;;  %v3599_v51 = vor.u32 %v4063_v49, %v3598_v10  ;;  %v4058_v8 = vld [vmem:[#allocation2 + $0x34] sm:$0xf] }
 0x414   :  { %1839 = vmatpush.bf16.msra.mxu2 %v3603_v34  ;;  %v3583_v12 = vor.u32 %v4058_v8, %v3580_v55 }
 0x415   :  { %v1454_v37 = vpack.c.bf16 %v4660_v53, %v4660_v53  ;;  %1866 = vmatpush.bf16.msrb.mxu0 %v3599_v51 }
 0x416   :  { %1854 = vmatpush.bf16.msra.mxu3 %v3583_v12 }
 0x417   :  { %1623 = vmatmul.bf16.vlgmr.msrb.gmra.mxu3 %v1454_v37  ;;  %1636 = vmatmul.bf16.vlgmr.msra.gmra.mxu0 %v1454_v37 }
 0x418   :  { %1649 = vmatmul.bf16.vlgmr.msra.gmra.mxu1 %v1454_v37  ;;  %1840 = vmatpush.bf16.msra.mxu2 %v3591_v7  ;;  %v3579_v37 = vor.u32 %v4059_v11, %v3578_v52 }
 0x419   :  { %1867 = vmatpush.bf16.msrb.mxu0 %v3587_v9 }
 0x41a   :  { %1855 = vmatpush.bf16.msra.mxu3 %v3571_v38 }
 0x41c   :  { %1841 = vmatpush.bf16.msra.mxu2 %v3579_v37 }
 0x41d   :  { %1868 = vmatpush.bf16.msrb.mxu0 %v3575_v17 }
 0x41e   :  { %1856 = vmatpush.bf16.msra.mxu3 %v3559_v29 }
 0x420   :  { %1842 = vmatpush.bf16.msra.mxu2 %v3567_v15 }
 0x421   :  { %1869 = vmatpush.bf16.msrb.mxu0 %v3563_v30 }
 0x424   :  { %1843 = vmatpush.bf16.msra.mxu2 %v3555_v28 }
 0x494   :  { %v1637_v16 = vpop.f32.mrf.mxu0 }
 0x495   :  { %v1650_v23 = vpop.f32.mrf.mxu1  ;;  %v1655_v34 = vadd.f32 %v1637_v16, %v4600_v4 }
 0x496   :  { %v1664_v35 = vadd.f32 %v4583_v44, %v1650_v23 }
 0x497   :  { %v1657_v42 = vmul.f32 0.5, %v1655_v34 }
 0x49a   :  { %v1624_v40 = vpop.f32.mrf.mxu3 }
 0x49b   :  { %v1654_v20 = vadd.f32 %v1624_v40, %v4597_v3 }
 0x49c   :  { %v1639_v31 = vpop.f32.mrf.mxu0 }
 0x49d   :  { %v1656_v32 = vmul.f32 0.5, %v1654_v20  ;;  %v1652_v33 = vpop.f32.mrf.mxu1 }
 0x49f   :  { %4183 = vtanh.f32 %v1656_v32 }
 0x4a0   :  { %4185 = vtanh.f32 %v1657_v42 }
 0x4a2   :  { %v1626_v41 = vpop.f32.mrf.mxu3 }
 0x4a5   :  { %v4184_v43 = vpop.eup %4183 }
 0x4a6   :  { %v1660_v45 = vmul.f32 0.5, %v4184_v43  ;;  %v4186_v22 = vpop.eup %4185 }
 0x4a7   :  { %v1661_v7 = vmul.f32 0.5, %v4186_v22 }
 0x4a8   :  { %v1662_v46 = vadd.f32 0.5, %v1660_v45 }
 0x4a9   :  { %v1663_v10 = vadd.f32 0.5, %v1661_v7 }
 0x4aa   :  { %v1665_v47 = vmul.f32 %v1664_v35, %v1662_v46 }
 0x4ac   :  { %v1666_v3 = vadd.f32 %v1665_v47, %v4603_v58 }
 0x4ae   :  { %4187 = vtanh.f32 %v1666_v3 }
 0x4b4   :  { %v4188_v48 = vpop.eup %4187 }
 0x4b5   :  { %v1668_v49 = vsub.f32 %v4660_v53, %v4188_v48 }
 0x4b7   :  { %v1669_v36 = vmul.f32 %v1668_v49, %v1663_v10 }
 0x4b9   :  { %v4669_v4 = vadd.f32 %v4188_v48, %v1669_v36 }
 0x4bb   :  { %v1675_v51 = vpack.c.bf16 %v4669_v4, %v4669_v4 }
 0x4bd   :  { %1844 = vmatmul.bf16.vlgmr.msra.gmra.mxu2 %v1675_v51  ;;  %1857 = vmatmul.bf16.vlgmr.msra.gmra.mxu3 %v1675_v51 }
 0x4be   :  { %1870 = vmatmul.bf16.vlgmr.msrb.gmra.mxu0 %v1675_v51 }
 0x53b   :  { %v1871_v52 = vpop.f32.mrf.mxu0 }
 0x53c   :  { %v1885_v5 = vadd.f32 %v4583_v44, %v1871_v52 }
 0x540   :  { %v1845_v11 = vpop.f32.mrf.mxu2  ;;  %v1858_v8 = vpop.f32.mrf.mxu3 }
 0x541   :  { %v1875_v58 = vadd.f32 %v1845_v11, %v4588_v56  ;;  %v1876_v1 = vadd.f32 %v1858_v8, %v4591_v57 }
 0x543   :  { %v1877_v37 = vmul.f32 0.5, %v1875_v58  ;;  %v1873_v55 = vpop.f32.mrf.mxu0  ;;  %v1878_v9 = vmul.f32 0.5, %v1876_v1 }
 0x545   :  { %4189 = vtanh.f32 %v1877_v37 }
 0x546   :  { %4191 = vtanh.f32 %v1878_v9 }
 0x548   :  { %v1847_v2 = vpop.f32.mrf.mxu2  ;;  %v1860_v12 = vpop.f32.mrf.mxu3 }
 0x54b   :  { %v4190_v59 = vpop.eup %4189 }
 0x54c   :  { %v1881_v60 = vmul.f32 0.5, %v4190_v59  ;;  %v4192_v15 = vpop.eup %4191 }
 0x54d   :  { %v1882_v56 = vmul.f32 0.5, %v4192_v15 }
 0x54e   :  { %v1883_v6 = vadd.f32 0.5, %v1881_v60 }
 0x54f   :  { %v1884_v38 = vadd.f32 0.5, %v1882_v56 }
 0x550   :  { %v1886_v63 = vmul.f32 %v1885_v5, %v1883_v6 }
 0x552   :  { %v1887_v14 = vadd.f32 %v1886_v63, %v4594_v0 }
 0x554   :  { %4193 = vtanh.f32 %v1887_v14 }
 0x55a   :  { %v4194_v16 = vpop.eup %4193 }
 0x55b   :  { %v1889_v17 = vsub.f32 %v4669_v4, %v4194_v16 }
 0x55d   :  { %v1890_v57 = vmul.f32 %v1889_v17, %v1884_v38 }
 0x55f   :  { %v4678_v18 = vadd.f32 %v4194_v16, %v1890_v57 }
 0x560   :  { %4321 = dma.done.wait [#allocation9 + $0x2], 3072 }
 0x561   :  { %4322 = vsyncadd [#allocation9 + $0x2], 4294964224  ;;  %v3734_v19 = vld [vmem:[#allocation4 + $0xa8] sm:$0xf]  ;;  %v4098_v39 = vld [vmem:[#allocation4 + $0xb0] sm:$0xf0] }
 0x562   :  { %v4097_v44 = vld [vmem:[#allocation4 + $0xac] sm:$0xf]  ;;  %v3735_v23 = vor.u32 %v4098_v39, %v3734_v19  ;;  %v3736_v24 = vld [vmem:[#allocation4 + $0xb4] sm:$0xf0]  ;;  %v3742_v26 = vld [vmem:[#allocation4 + $0xb0] sm:$0xf] }
 0x563   :  { %v4099_v27 = vld [vmem:[#allocation4 + $0xb8] sm:$0xf0]  ;;  %v3739_v0 = vor.u32 %v4097_v44, %v3736_v24  ;;  %v3722_v29 = vld [vmem:[#allocation4 + $0x90] sm:$0xf]  ;;  %v4094_v40 = vld [vmem:[#allocation4 + $0x94] sm:$0xf] }
 0x564   :  { %v3743_v28 = vor.u32 %v4099_v27, %v3742_v26  ;;  %v4095_v30 = vld [vmem:[#allocation4 + $0x98] sm:$0xf0]  ;;  %2076 = vmatpush.bf16.msrb.mxu1 %v3735_v23  ;;  %v3724_v31 = vld [vmem:[#allocation4 + $0x9c] sm:$0xf0]  ;;  %v3730_v32 = vld [vmem:[#allocation4 + $0x98] sm:$0xf] }
 0x565   :  { %v3723_v20 = vor.u32 %v4095_v30, %v3722_v29  ;;  %v4096_v33 = vld [vmem:[#allocation4 + $0xa0] sm:$0xf0]  ;;  %2105 = vmatpush.bf16.msrb.mxu2 %v3739_v0  ;;  %v3727_v34 = vor.u32 %v4094_v40, %v3724_v31  ;;  %v3710_v42 = vld [vmem:[#allocation4 + $0x78] sm:$0xf]  ;;  %v4091_v45 = vld [vmem:[#allocation4 + $0x7c] sm:$0xf] }
 0x566   :  { %2134 = vmatpush.bf16.msrb.mxu3 %v3743_v28  ;;  %v3731_v41 = vor.u32 %v4096_v33, %v3730_v32  ;;  %v4092_v43 = vld [vmem:[#allocation4 + $0x80] sm:$0xf0]  ;;  %v3712_v35 = vld [vmem:[#allocation4 + $0x84] sm:$0xf0]  ;;  %v3718_v46 = vld [vmem:[#allocation4 + $0x80] sm:$0xf] }
 0x567   :  { %v4093_v47 = vld [vmem:[#allocation4 + $0x88] sm:$0xf0]  ;;  %v3711_v3 = vor.u32 %v4092_v43, %v3710_v42  ;;  %v3715_v22 = vor.u32 %v4091_v45, %v3712_v35  ;;  %v3698_v48 = vld [vmem:[#allocation4 + $0x60] sm:$0xf]  ;;  %v4088_v49 = vld [vmem:[#allocation4 + $0x64] sm:$0xf]  ;;  %v1905_v42 = vpack.c.bf16 %v4624_v25, %v4605_v13  ;;  %v1906_v43 = vpack.c.bf16 %v4642_v50, %v4633_v21 }
 0x568   :  { %2077 = vmatpush.bf16.msrb.mxu1 %v3723_v20  ;;  %v3719_v7 = vor.u32 %v4093_v47, %v3718_v46  ;;  %v4089_v10 = vld [vmem:[#allocation4 + $0x68] sm:$0xf0]  ;;  %v3700_v36 = vld [vmem:[#allocation4 + $0x6c] sm:$0xf0]  ;;  %v3706_v51 = vld [vmem:[#allocation4 + $0x68] sm:$0xf]  ;;  %v1907_v45 = vpack.c.bf16 %v4660_v53, %v4651_v54  ;;  %v1908_v13 = vpack.c.bf16 %v4678_v18, %v4669_v4 }
 0x569   :  { %2106 = vmatpush.bf16.msrb.mxu2 %v3727_v34  ;;  %v4090_v52 = vld [vmem:[#allocation4 + $0x70] sm:$0xf0]  ;;  %v3699_v11 = vor.u32 %v4089_v10, %v3698_v48  ;;  %v3703_v8 = vor.u32 %v4088_v49, %v3700_v36  ;;  %v3686_v37 = vld [vmem:[#allocation4 + $0x48] sm:$0xf]  ;;  %v4085_v1 = vld [vmem:[#allocation4 + $0x4c] sm:$0xf] }
 0x56a   :  { %2135 = vmatpush.bf16.msrb.mxu3 %v3731_v41  ;;  %v3707_v58 = vor.u32 %v4090_v52, %v3706_v51  ;;  %v4086_v55 = vld [vmem:[#allocation4 + $0x50] sm:$0xf0]  ;;  %v3688_v2 = vld [vmem:[#allocation4 + $0x54] sm:$0xf0]  ;;  %v3694_v12 = vld [vmem:[#allocation4 + $0x50] sm:$0xf] }
 0x56b   :  { %v4087_v9 = vld [vmem:[#allocation4 + $0x58] sm:$0xf0]  ;;  %v3687_v59 = vor.u32 %v4086_v55, %v3686_v37  ;;  %v3691_v60 = vor.u32 %v4085_v1, %v3688_v2  ;;  %v3674_v6 = vld [vmem:[#allocation4 + $0x30] sm:$0xf]  ;;  %v4082_v14 = vld [vmem:[#allocation4 + $0x34] sm:$0xf] }
 0x56c   :  { %2078 = vmatpush.bf16.msrb.mxu1 %v3711_v3  ;;  %v3695_v5 = vor.u32 %v4087_v9, %v3694_v12  ;;  %v4083_v63 = vld [vmem:[#allocation4 + $0x38] sm:$0xf0]  ;;  %v3676_v15 = vld [vmem:[#allocation4 + $0x3c] sm:$0xf0]  ;;  %v3682_v56 = vld [vmem:[#allocation4 + $0x38] sm:$0xf] }
 0x56d   :  { %2107 = vmatpush.bf16.msrb.mxu2 %v3715_v22  ;;  %v4084_v16 = vld [vmem:[#allocation4 + $0x40] sm:$0xf0]  ;;  %v3675_v38 = vor.u32 %v4083_v63, %v3674_v6  ;;  %v3679_v17 = vor.u32 %v4082_v14, %v3676_v15  ;;  %v3662_v19 = vld [vmem:[#allocation4 + $0x18] sm:$0xf]  ;;  %v4079_v44 = vld [vmem:[#allocation4 + $0x1c] sm:$0xf] }
 0x56e   :  { %2136 = vmatpush.bf16.msrb.mxu3 %v3719_v7  ;;  %v3683_v57 = vor.u32 %v4084_v16, %v3682_v56  ;;  %v4080_v39 = vld [vmem:[#allocation4 + $0x20] sm:$0xf0]  ;;  %v3664_v23 = vld [vmem:[#allocation4 + $0x24] sm:$0xf0]  ;;  %v3670_v24 = vld [vmem:[#allocation4 + $0x20] sm:$0xf] }
 0x56f   :  { %v4081_v26 = vld [vmem:[#allocation4 + $0x28] sm:$0xf0]  ;;  %v3663_v27 = vor.u32 %v4080_v39, %v3662_v19  ;;  %v3667_v0 = vor.u32 %v4079_v44, %v3664_v23  ;;  %v3650_v29 = vld [vmem:[#allocation4] sm:$0xf]  ;;  %v4076_v40 = vld [vmem:[#allocation4 + $0x4] sm:$0xf] }
 0x570   :  { %2079 = vmatpush.bf16.msrb.mxu1 %v3699_v11  ;;  %v3671_v28 = vor.u32 %v4081_v26, %v3670_v24  ;;  %v4077_v30 = vld [vmem:[#allocation4 + $0x8] sm:$0xf0]  ;;  %v3652_v20 = vld [vmem:[#allocation4 + $0xc] sm:$0xf0]  ;;  %v3658_v31 = vld [vmem:[#allocation4 + $0x8] sm:$0xf] }
 0x571   :  { %2108 = vmatpush.bf16.msrb.mxu2 %v3703_v8  ;;  %v4078_v32 = vld [vmem:[#allocation4 + $0x10] sm:$0xf0]  ;;  %v3651_v33 = vor.u32 %v4077_v30, %v3650_v29  ;;  %v3655_v34 = vor.u32 %v4076_v40, %v3652_v20  ;;  %v4689_v25 = vperm.slane %v4610_v61, 0  ;;  %v1943_v46 = vperm.slane %v4610_v61, 1 }
 0x572   :  { %2137 = vmatpush.bf16.msrb.mxu3 %v3707_v58  ;;  %v3659_v41 = vor.u32 %v4078_v32, %v3658_v31  ;;  %v1944_v48 = vperm.slane %v4610_v61, 2  ;;  %v4698_v10 = vperm.slane %v4615_v62, 0 }
 0x574   :  { %2080 = vmatpush.bf16.msrb.mxu1 %v3687_v59 }
 0x575   :  { %2109 = vmatpush.bf16.msrb.mxu2 %v3691_v60 }
 0x576   :  { %2138 = vmatpush.bf16.msrb.mxu3 %v3695_v5 }
 0x578   :  { %2081 = vmatpush.bf16.msrb.mxu1 %v3675_v38 }
 0x579   :  { %2110 = vmatpush.bf16.msrb.mxu2 %v3679_v17 }
 0x57a   :  { %2139 = vmatpush.bf16.msrb.mxu3 %v3683_v57 }
 0x57c   :  { %2082 = vmatpush.bf16.msrb.mxu1 %v3663_v27 }
 0x57d   :  { %2111 = vmatpush.bf16.msrb.mxu2 %v3667_v0 }
 0x57e   :  { %2140 = vmatpush.bf16.msrb.mxu3 %v3671_v28 }
 0x580   :  { %2083 = vmatpush.bf16.msrb.mxu1 %v3651_v33 }
 0x581   :  { %2112 = vmatpush.bf16.msrb.mxu2 %v3655_v34 }
 0x582   :  { %2141 = vmatpush.bf16.msrb.mxu3 %v3659_v41 }
 0x583   :  { %2084 = vmatmul.bf16.vlgmr.msrb.gmra.mxu1 %v1905_v42 }
 0x584   :  { %2113 = vmatmul.bf16.vlgmr.msrb.gmra.mxu2 %v1905_v42 }
 0x585   :  { %2142 = vmatmul.bf16.vlgmr.msrb.gmra.mxu3 %v1905_v42 }
 0x593   :  { %2089 = vmatmul.bf16.gmra.mxu1 %v1906_v43 }
 0x594   :  { %2118 = vmatmul.bf16.gmra.mxu2 %v1906_v43 }
 0x595   :  { %2147 = vmatmul.bf16.gmra.mxu3 %v1906_v43 }
 0x5a3   :  { %2094 = vmatmul.bf16.gmra.mxu1 %v1907_v45 }
 0x5a4   :  { %2123 = vmatmul.bf16.gmra.mxu2 %v1907_v45 }
 0x5a5   :  { %2152 = vmatmul.bf16.gmra.mxu3 %v1907_v45 }
 0x5b3   :  { %2099 = vmatmul.bf16.gmra.mxu1 %v1908_v13 }
 0x5b4   :  { %2128 = vmatmul.bf16.gmra.mxu2 %v1908_v13 }
 0x5b5   :  { %2157 = vmatmul.bf16.gmra.mxu3 %v1908_v13 }
 0x600   :  { %v2085_v35 = vpop.f32.mrf.mxu1 }
 0x601   :  { %v2086_v21 = vadd.f32 %v2085_v35, %v4689_v25 }
 0x603   :  { %v2190_v50 = vmul.f32 0.5, %v2086_v21 }
 0x605   :  { %4195 = vtanh.f32 %v2190_v50 }
 0x607   :  { %v2114_v54 = vpop.f32.mrf.mxu2 }
 0x608   :  { %v2143_v53 = vpop.f32.mrf.mxu3  ;;  %v2115_v47 = vadd.f32 %v2114_v54, %v1943_v46  ;;  %v2087_v3 = vpop.f32.mrf.mxu1 }
 0x609   :  { %v4694_v22 = vadd.f32 %v2087_v3, %v4689_v25  ;;  %v2144_v52 = vadd.f32 %v2143_v53, %v1944_v48 }
 0x60a   :  { %v2191_v4 = vmul.f32 0.5, %v2115_v47 }
 0x60b   :  { %v4196_v18 = vpop.eup %4195 }
 0x60c   :  { %v2194_v7 = vmul.f32 0.5, %v4196_v18  ;;  %4197 = vtanh.f32 %v2191_v4 }
 0x60e   :  { %v2196_v49 = vadd.f32 0.5, %v2194_v7 }
 0x60f   :  { %v2116_v36 = vpop.f32.mrf.mxu2 }
 0x610   :  { %v2145_v51 = vpop.f32.mrf.mxu3  ;;  %v2201_v11 = vmul.f32 %v4698_v10, %v2196_v49  ;;  %v4701_v8 = vadd.f32 %v2116_v36, %v1943_v46  ;;  %v2090_v37 = vpop.f32.mrf.mxu1 }
 0x611   :  { %v4703_v58 = vadd.f32 %v2145_v51, %v1944_v48  ;;  %v4706_v55 = vadd.f32 %v2090_v37, %v4689_v25 }
 0x612   :  { %v4198_v1 = vpop.eup %4197  ;;  %v2202_v2 = vadd.f32 %v2201_v11, %v2144_v52 }
 0x613   :  { %v2195_v61 = vmul.f32 0.5, %v4198_v1 }
 0x614   :  { %4199 = vtanh.f32 %v2202_v2 }
 0x615   :  { %v2197_v5 = vadd.f32 0.5, %v2195_v61 }
 0x617   :  { %v2119_v62 = vpop.f32.mrf.mxu2 }
 0x618   :  { %v2148_v12 = vpop.f32.mrf.mxu3  ;;  %v4708_v9 = vadd.f32 %v2119_v62, %v1943_v46  ;;  %v2092_v60 = vpop.f32.mrf.mxu1 }
 0x619   :  { %v4710_v59 = vadd.f32 %v2148_v12, %v1944_v48  ;;  %v4713_v6 = vadd.f32 %v2092_v60, %v4689_v25 }
 0x61a   :  { %v4200_v63 = vpop.eup %4199 }
 0x61b   :  { %v2204_v14 = vmul.f32 %v4200_v63, %v2197_v5 }
 0x61d   :  { %v4715_v15 = vsub.f32 %v4200_v63, %v2204_v14 }
 0x61f   :  { %v2121_v56 = vpop.f32.mrf.mxu2 }
 0x620   :  { %v2150_v16 = vpop.f32.mrf.mxu3  ;;  %v4717_v38 = vadd.f32 %v2121_v56, %v1943_v46  ;;  %v2095_v57 = vpop.f32.mrf.mxu1 }
 0x621   :  { %v4719_v17 = vadd.f32 %v2150_v16, %v1944_v48  ;;  %v4722_v19 = vadd.f32 %v2095_v57, %v4689_v25 }
 0x627   :  { %v2124_v39 = vpop.f32.mrf.mxu2 }
 0x628   :  { %v2153_v44 = vpop.f32.mrf.mxu3  ;;  %v4724_v23 = vadd.f32 %v2124_v39, %v1943_v46  ;;  %v2097_v26 = vpop.f32.mrf.mxu1 }
 0x629   :  { %v4726_v24 = vadd.f32 %v2153_v44, %v1944_v48  ;;  %v4729_v27 = vadd.f32 %v2097_v26, %v4689_v25 }
 0x62f   :  { %v2126_v0 = vpop.f32.mrf.mxu2 }
 0x630   :  { %v2155_v28 = vpop.f32.mrf.mxu3  ;;  %v4731_v29 = vadd.f32 %v2126_v0, %v1943_v46  ;;  %v2100_v40 = vpop.f32.mrf.mxu1 }
 0x631   :  { %v4733_v30 = vadd.f32 %v2155_v28, %v1944_v48  ;;  %v4736_v20 = vadd.f32 %v2100_v40, %v4689_v25 }
 0x637   :  { %v2129_v31 = vpop.f32.mrf.mxu2 }
 0x638   :  { %v2158_v32 = vpop.f32.mrf.mxu3  ;;  %v4738_v33 = vadd.f32 %v2129_v31, %v1943_v46  ;;  %v2102_v41 = vpop.f32.mrf.mxu1 }
 0x639   :  { %v4740_v34 = vadd.f32 %v2158_v32, %v1944_v48  ;;  %v4743_v42 = vadd.f32 %v2102_v41, %v4689_v25 }
 0x63f   :  { %v2131_v43 = vpop.f32.mrf.mxu2 }
 0x640   :  { %v2160_v45 = vpop.f32.mrf.mxu3  ;;  %v4745_v13 = vadd.f32 %v2131_v43, %v1943_v46 }
 0x641   :  { %v4747_v35 = vadd.f32 %v2160_v45, %v1944_v48 }
 0x642   :  { %4323 = dma.done.wait [#allocation9 + $0x1], 3072 }
 0x643   :  { %4324 = vsyncadd [#allocation9 + $0x1], 4294964224  ;;  %v3830_v21 = vld [vmem:[#allocation3 + $0xa8] sm:$0xf]  ;;  %v4122_v50 = vld [vmem:[#allocation3 + $0xb0] sm:$0xf0] }
 0x644   :  { %v3818_v54 = vld [vmem:[#allocation3 + $0x90] sm:$0xf]  ;;  %v4749_v53 = vor.u32 %v4122_v50, %v3830_v21  ;;  %v4119_v47 = vld [vmem:[#allocation3 + $0x98] sm:$0xf0]  ;;  %v3806_v25 = vld [vmem:[#allocation3 + $0x78] sm:$0xf] }
 0x645   :  { %v4752_v3 = vor.u32 %v4119_v47, %v3818_v54  ;;  %v4116_v4 = vld [vmem:[#allocation3 + $0x80] sm:$0xf0]  ;;  %v3838_v46 = vld [vmem:[#allocation3 + $0xb0] sm:$0xf]  ;;  %v4123_v18 = vld [vmem:[#allocation3 + $0xb8] sm:$0xf0] }
 0x646   :  { %2372 = vmatpush.bf16.msra.mxu0 %v4749_v53  ;;  %2432 = vmatpush.bf16.msra.mxu2 %v4749_v53  ;;  %v4755_v7 = vor.u32 %v4123_v18, %v3838_v46  ;;  %v3826_v48 = vld [vmem:[#allocation3 + $0x98] sm:$0xf]  ;;  %v4120_v49 = vld [vmem:[#allocation3 + $0xa0] sm:$0xf0]  ;;  %v4121_v36 = vld [vmem:[#allocation3 + $0xac] sm:$0xf]  ;;  %v4758_v51 = vor.u32 %v4116_v4, %v3806_v25 }
 0x647   :  { %v3794_v52 = vld [vmem:[#allocation3 + $0x60] sm:$0xf]  ;;  %v4761_v11 = vor.u32 %v4120_v49, %v3826_v48  ;;  %v3832_v37 = vld [vmem:[#allocation3 + $0xb4] sm:$0xf0]  ;;  %v4113_v1 = vld [vmem:[#allocation3 + $0x68] sm:$0xf0] }
 0x648   :  { %2398 = vmatpush.bf16.msra.mxu1 %v4755_v7  ;;  %v4763_v2 = vor.u32 %v4121_v36, %v3832_v37  ;;  %v3814_v61 = vld [vmem:[#allocation3 + $0x80] sm:$0xf]  ;;  %v4117_v62 = vld [vmem:[#allocation3 + $0x88] sm:$0xf0]  ;;  %v4118_v12 = vld [vmem:[#allocation3 + $0x94] sm:$0xf]  ;;  %v4768_v5 = vor.u32 %v4113_v1, %v3794_v52 }
 0x649   :  { %v3820_v60 = vld [vmem:[#allocation3 + $0x9c] sm:$0xf0]  ;;  %v3782_v63 = vld [vmem:[#allocation3 + $0x48] sm:$0xf]  ;;  %v4771_v14 = vor.u32 %v4117_v62, %v3814_v61  ;;  %v4110_v56 = vld [vmem:[#allocation3 + $0x50] sm:$0xf0] }
 0x64a   :  { %2373 = vmatpush.bf16.msra.mxu0 %v4752_v3  ;;  %2433 = vmatpush.bf16.msra.mxu2 %v4752_v3  ;;  %v4773_v16 = vor.u32 %v4118_v12, %v3820_v60  ;;  %v3802_v57 = vld [vmem:[#allocation3 + $0x68] sm:$0xf]  ;;  %v4114_v39 = vld [vmem:[#allocation3 + $0x70] sm:$0xf0]  ;;  %v4115_v44 = vld [vmem:[#allocation3 + $0x7c] sm:$0xf]  ;;  %v4778_v0 = vor.u32 %v4110_v56, %v3782_v63 }
 0x64b   :  { %2445 = vmatpush.bf16.msra.mxu3 %v4763_v2  ;;  %v3808_v26 = vld [vmem:[#allocation3 + $0x84] sm:$0xf0]  ;;  %v3770_v28 = vld [vmem:[#allocation3 + $0x30] sm:$0xf]  ;;  %v4781_v40 = vor.u32 %v4114_v39, %v3802_v57  ;;  %v4107_v31 = vld [vmem:[#allocation3 + $0x38] sm:$0xf0] }
 0x64c   :  { %2399 = vmatpush.bf16.msra.mxu1 %v4761_v11  ;;  %v4783_v32 = vor.u32 %v4115_v44, %v3808_v26  ;;  %v3790_v41 = vld [vmem:[#allocation3 + $0x50] sm:$0xf]  ;;  %v4111_v43 = vld [vmem:[#allocation3 + $0x58] sm:$0xf0]  ;;  %v4112_v45 = vld [vmem:[#allocation3 + $0x64] sm:$0xf]  ;;  %v4788_v50 = vor.u32 %v4107_v31, %v3770_v28 }
 0x64d   :  { %v3796_v21 = vld [vmem:[#allocation3 + $0x6c] sm:$0xf0]  ;;  %v3758_v54 = vld [vmem:[#allocation3 + $0x18] sm:$0xf]  ;;  %v4791_v47 = vor.u32 %v4111_v43, %v3790_v41  ;;  %v4104_v25 = vld [vmem:[#allocation3 + $0x20] sm:$0xf0]  ;;  %v2211_v41 = vpack.c.bf16 %v4715_v15, %v4715_v15 }
 0x64e   :  { %2374 = vmatpush.bf16.msra.mxu0 %v4758_v51  ;;  %2434 = vmatpush.bf16.msra.mxu2 %v4758_v51  ;;  %v4793_v4 = vor.u32 %v4112_v45, %v3796_v21  ;;  %v3778_v46 = vld [vmem:[#allocation3 + $0x38] sm:$0xf]  ;;  %v4108_v18 = vld [vmem:[#allocation3 + $0x40] sm:$0xf0]  ;;  %v4109_v48 = vld [vmem:[#allocation3 + $0x4c] sm:$0xf]  ;;  %v4798_v36 = vor.u32 %v4104_v25, %v3758_v54 }
 0x64f   :  { %2446 = vmatpush.bf16.msra.mxu3 %v4773_v16  ;;  %v3784_v49 = vld [vmem:[#allocation3 + $0x54] sm:$0xf0]  ;;  %v3746_v52 = vld [vmem:[#allocation3] sm:$0xf]  ;;  %v4801_v37 = vor.u32 %v4108_v18, %v3778_v46  ;;  %v4101_v1 = vld [vmem:[#allocation3 + $0x8] sm:$0xf0] }
 0x650   :  { %2400 = vmatpush.bf16.msra.mxu1 %v4771_v14  ;;  %v4803_v61 = vor.u32 %v4109_v48, %v3784_v49  ;;  %v3766_v62 = vld [vmem:[#allocation3 + $0x20] sm:$0xf]  ;;  %v4105_v12 = vld [vmem:[#allocation3 + $0x28] sm:$0xf0]  ;;  %v4106_v60 = vld [vmem:[#allocation3 + $0x34] sm:$0xf]  ;;  %v4808_v56 = vor.u32 %v4101_v1, %v3746_v52 }
 0x651   :  { %v3772_v63 = vld [vmem:[#allocation3 + $0x3c] sm:$0xf0]  ;;  %v4811_v57 = vor.u32 %v4105_v12, %v3766_v62  ;;  %v3754_v44 = vld [vmem:[#allocation3 + $0x8] sm:$0xf]  ;;  %v4102_v26 = vld [vmem:[#allocation3 + $0x10] sm:$0xf0] }
 0x652   :  { %2375 = vmatpush.bf16.msra.mxu0 %v4768_v5  ;;  %2435 = vmatpush.bf16.msra.mxu2 %v4768_v5  ;;  %v4813_v39 = vor.u32 %v4106_v60, %v3772_v63  ;;  %v4103_v28 = vld [vmem:[#allocation3 + $0x1c] sm:$0xf]  ;;  %v3760_v31 = vld [vmem:[#allocation3 + $0x24] sm:$0xf0]  ;;  %v4821_v43 = vor.u32 %v4102_v26, %v3754_v44  ;;  %v4100_v21 = vld [vmem:[#allocation3 + $0x4] sm:$0xf] }
 0x653   :  { %2447 = vmatpush.bf16.msra.mxu3 %v4783_v32  ;;  %v4824_v45 = vor.u32 %v4103_v28, %v3760_v31  ;;  %v3748_v54 = vld [vmem:[#allocation3 + $0xc] sm:$0xf0] }
 0x654   :  { %2401 = vmatpush.bf16.msra.mxu1 %v4781_v40  ;;  %v4831_v25 = vor.u32 %v4100_v21, %v3748_v54 }
 0x656   :  { %2376 = vmatpush.bf16.msra.mxu0 %v4778_v0  ;;  %2436 = vmatpush.bf16.msra.mxu2 %v4778_v0 }
 0x657   :  { %2448 = vmatpush.bf16.msra.mxu3 %v4793_v4 }
 0x658   :  { %2402 = vmatpush.bf16.msra.mxu1 %v4791_v47 }
 0x65a   :  { %2377 = vmatpush.bf16.msra.mxu0 %v4788_v50  ;;  %2437 = vmatpush.bf16.msra.mxu2 %v4788_v50 }
 0x65b   :  { %2449 = vmatpush.bf16.msra.mxu3 %v4803_v61 }
 0x65c   :  { %2403 = vmatpush.bf16.msra.mxu1 %v4801_v37 }
 0x65e   :  { %2378 = vmatpush.bf16.msra.mxu0 %v4798_v36  ;;  %2438 = vmatpush.bf16.msra.mxu2 %v4798_v36 }
 0x65f   :  { %2450 = vmatpush.bf16.msra.mxu3 %v4813_v39 }
 0x660   :  { %2404 = vmatpush.bf16.msra.mxu1 %v4811_v57 }
 0x662   :  { %2379 = vmatpush.bf16.msra.mxu0 %v4808_v56  ;;  %2439 = vmatpush.bf16.msra.mxu2 %v4808_v56 }
 0x663   :  { %2451 = vmatpush.bf16.msra.mxu3 %v4824_v45 }
 0x664   :  { %2405 = vmatpush.bf16.msra.mxu1 %v4821_v43 }
 0x665   :  { %2380 = vmatmul.bf16.vlgmr.msra.gmra.mxu0 %v2211_v41 }
 0x666   :  { %2385 = vmatpush.bf16.msrb.mxu0 %v4763_v2  ;;  %2505 = vmatpush.bf16.msrb.mxu2 %v4763_v2 }
 0x667   :  { %2406 = vmatmul.bf16.vlgmr.msra.gmra.mxu1 %v2211_v41  ;;  %2452 = vmatpush.bf16.msra.mxu3 %v4831_v25 }
 0x668   :  { %2492 = vmatpush.bf16.msrb.mxu1 %v4749_v53 }
 0x66a   :  { %2386 = vmatpush.bf16.msrb.mxu0 %v4773_v16  ;;  %2506 = vmatpush.bf16.msrb.mxu2 %v4773_v16 }
 0x66b   :  { %2518 = vmatpush.bf16.msrb.mxu3 %v4755_v7 }
 0x66c   :  { %2493 = vmatpush.bf16.msrb.mxu1 %v4752_v3 }
 0x66e   :  { %2387 = vmatpush.bf16.msrb.mxu0 %v4783_v32  ;;  %2507 = vmatpush.bf16.msrb.mxu2 %v4783_v32 }
 0x66f   :  { %2519 = vmatpush.bf16.msrb.mxu3 %v4761_v11 }
 0x670   :  { %2494 = vmatpush.bf16.msrb.mxu1 %v4758_v51 }
 0x672   :  { %2388 = vmatpush.bf16.msrb.mxu0 %v4793_v4  ;;  %2508 = vmatpush.bf16.msrb.mxu2 %v4793_v4 }
 0x673   :  { %2520 = vmatpush.bf16.msrb.mxu3 %v4771_v14 }
 0x674   :  { %2495 = vmatpush.bf16.msrb.mxu1 %v4768_v5 }
 0x676   :  { %2389 = vmatpush.bf16.msrb.mxu0 %v4803_v61  ;;  %2509 = vmatpush.bf16.msrb.mxu2 %v4803_v61 }
 0x677   :  { %2521 = vmatpush.bf16.msrb.mxu3 %v4781_v40 }
 0x678   :  { %2496 = vmatpush.bf16.msrb.mxu1 %v4778_v0 }
 0x67a   :  { %2390 = vmatpush.bf16.msrb.mxu0 %v4813_v39  ;;  %2510 = vmatpush.bf16.msrb.mxu2 %v4813_v39 }
 0x67b   :  { %2522 = vmatpush.bf16.msrb.mxu3 %v4791_v47 }
 0x67c   :  { %2497 = vmatpush.bf16.msrb.mxu1 %v4788_v50 }
 0x67e   :  { %2391 = vmatpush.bf16.msrb.mxu0 %v4824_v45  ;;  %2511 = vmatpush.bf16.msrb.mxu2 %v4824_v45 }
 0x67f   :  { %2523 = vmatpush.bf16.msrb.mxu3 %v4801_v37 }
 0x680   :  { %2498 = vmatpush.bf16.msrb.mxu1 %v4798_v36 }
 0x682   :  { %2392 = vmatpush.bf16.msrb.mxu0 %v4831_v25  ;;  %2512 = vmatpush.bf16.msrb.mxu2 %v4831_v25 }
 0x683   :  { %2524 = vmatpush.bf16.msrb.mxu3 %v4811_v57 }
 0x684   :  { %2499 = vmatpush.bf16.msrb.mxu1 %v4808_v56 }
 0x685   :  { %2393 = vmatmul.bf16.vlgmr.msrb.gmra.mxu0 %v2211_v41 }
 0x686   :  { %2458 = vmatpush.bf16.msra.mxu0 %v4755_v7 }
 0x687   :  { %2525 = vmatpush.bf16.msrb.mxu3 %v4821_v43 }
 0x688   :  { %2565 = vmatpush.bf16.msra.mxu1 %v4763_v2 }
 0x68a   :  { %2459 = vmatpush.bf16.msra.mxu0 %v4761_v11 }
 0x68c   :  { %2566 = vmatpush.bf16.msra.mxu1 %v4773_v16 }
 0x68e   :  { %2460 = vmatpush.bf16.msra.mxu0 %v4771_v14 }
 0x690   :  { %2567 = vmatpush.bf16.msra.mxu1 %v4783_v32 }
 0x692   :  { %2461 = vmatpush.bf16.msra.mxu0 %v4781_v40 }
 0x694   :  { %2568 = vmatpush.bf16.msra.mxu1 %v4793_v4 }
 0x696   :  { %2462 = vmatpush.bf16.msra.mxu0 %v4791_v47 }
 0x698   :  { %2569 = vmatpush.bf16.msra.mxu1 %v4803_v61 }
 0x69a   :  { %2463 = vmatpush.bf16.msra.mxu0 %v4801_v37 }
 0x69c   :  { %2570 = vmatpush.bf16.msra.mxu1 %v4813_v39 }
 0x69e   :  { %2464 = vmatpush.bf16.msra.mxu0 %v4811_v57 }
 0x6a0   :  { %2571 = vmatpush.bf16.msra.mxu1 %v4824_v45 }
 0x6a2   :  { %2465 = vmatpush.bf16.msra.mxu0 %v4821_v43 }
 0x6a4   :  { %2572 = vmatpush.bf16.msra.mxu1 %v4831_v25 }
 0x6a6   :  { %2552 = vmatpush.bf16.msrb.mxu0 %v4749_v53 }
 0x6aa   :  { %2553 = vmatpush.bf16.msrb.mxu0 %v4752_v3 }
 0x6ae   :  { %2554 = vmatpush.bf16.msrb.mxu0 %v4758_v51 }
 0x6b2   :  { %2555 = vmatpush.bf16.msrb.mxu0 %v4768_v5 }
 0x6b6   :  { %2556 = vmatpush.bf16.msrb.mxu0 %v4778_v0 }
 0x6ba   :  { %2557 = vmatpush.bf16.msrb.mxu0 %v4788_v50 }
 0x6be   :  { %2558 = vmatpush.bf16.msrb.mxu0 %v4798_v36 }
 0x6c2   :  { %2559 = vmatpush.bf16.msrb.mxu0 %v4808_v56 }
 0x6e2   :  { %v2381_v46 = vpop.f32.mrf.mxu0 }
 0x6e3   :  { %v2411_v18 = vadd.f32 %v2381_v46, %v4694_v22 }
 0x6e4   :  { %v2407_v49 = vpop.f32.mrf.mxu1 }
 0x6e5   :  { %v2413_v48 = vmul.f32 0.5, %v2411_v18  ;;  %v2421_v63 = vadd.f32 %v2407_v49, %v4698_v10 }
 0x6e7   :  { %4201 = vtanh.f32 %v2413_v48 }
 0x6ea   :  { %v2383_v52 = vpop.f32.mrf.mxu0 }
 0x6ec   :  { %v2409_v1 = vpop.f32.mrf.mxu1 }
 0x6ed   :  { %v4202_v62 = vpop.eup %4201 }
 0x6ee   :  { %v2417_v12 = vmul.f32 0.5, %v4202_v62 }
 0x6f0   :  { %v2419_v60 = vadd.f32 0.5, %v2417_v12 }
 0x6f2   :  { %v2422_v44 = vmul.f32 %v2421_v63, %v2419_v60 }
 0x6f4   :  { %v2423_v26 = vadd.f32 %v2422_v44, %v4703_v58 }
 0x6f6   :  { %4203 = vtanh.f32 %v2423_v26 }
 0x6fc   :  { %v4204_v21 = vpop.eup %4203 }
 0x6fd   :  { %v2425_v48 = vsub.f32 %v4715_v15, %v4204_v21 }
 0x702   :  { %v2394_v28 = vpop.f32.mrf.mxu0 }
 0x703   :  { %v2412_v31 = vadd.f32 %v2394_v28, %v4701_v8 }
 0x705   :  { %v2414_v41 = vmul.f32 0.5, %v2412_v31 }
 0x707   :  { %4205 = vtanh.f32 %v2414_v41 }
 0x70a   :  { %v2396_v22 = vpop.f32.mrf.mxu0 }
 0x70d   :  { %v4206_v54 = vpop.eup %4205 }
 0x70e   :  { %v2418_v46 = vmul.f32 0.5, %v4206_v54 }
 0x710   :  { %v2420_v18 = vadd.f32 0.5, %v2418_v46 }
 0x712   :  { %v2426_v52 = vmul.f32 %v2425_v48, %v2420_v18 }
 0x714   :  { %v2427_v1 = vadd.f32 %v4204_v21, %v2426_v52 }
 0x716   :  { %v2431_v62 = vpack.c.bf16 %v2427_v1, %v2427_v1 }
 0x718   :  { %2440 = vmatmul.bf16.vlgmr.msra.gmra.mxu2 %v2431_v62  ;;  %2453 = vmatmul.bf16.vlgmr.msra.gmra.mxu3 %v2431_v62 }
 0x719   :  { %2466 = vmatmul.bf16.vlgmr.msra.gmra.mxu0 %v2431_v62  ;;  %2578 = vmatpush.bf16.msra.mxu2 %v4755_v7 }
 0x71a   :  { %2612 = vmatpush.bf16.msra.mxu3 %v4749_v53  ;;  %2625 = vmatpush.bf16.msra.mxu0 %v4763_v2 }
 0x71d   :  { %2579 = vmatpush.bf16.msra.mxu2 %v4761_v11 }
 0x71e   :  { %2613 = vmatpush.bf16.msra.mxu3 %v4752_v3  ;;  %2626 = vmatpush.bf16.msra.mxu0 %v4773_v16 }
 0x721   :  { %2580 = vmatpush.bf16.msra.mxu2 %v4771_v14 }
 0x722   :  { %2614 = vmatpush.bf16.msra.mxu3 %v4758_v51  ;;  %2627 = vmatpush.bf16.msra.mxu0 %v4783_v32 }
 0x725   :  { %2581 = vmatpush.bf16.msra.mxu2 %v4781_v40 }
 0x726   :  { %2615 = vmatpush.bf16.msra.mxu3 %v4768_v5  ;;  %2628 = vmatpush.bf16.msra.mxu0 %v4793_v4 }
 0x729   :  { %2582 = vmatpush.bf16.msra.mxu2 %v4791_v47 }
 0x72a   :  { %2616 = vmatpush.bf16.msra.mxu3 %v4778_v0  ;;  %2629 = vmatpush.bf16.msra.mxu0 %v4803_v61 }
 0x72d   :  { %2583 = vmatpush.bf16.msra.mxu2 %v4801_v37 }
 0x72e   :  { %2617 = vmatpush.bf16.msra.mxu3 %v4788_v50  ;;  %2630 = vmatpush.bf16.msra.mxu0 %v4813_v39 }
 0x731   :  { %2584 = vmatpush.bf16.msra.mxu2 %v4811_v57 }
 0x732   :  { %2618 = vmatpush.bf16.msra.mxu3 %v4798_v36  ;;  %2631 = vmatpush.bf16.msra.mxu0 %v4824_v45 }
 0x735   :  { %2585 = vmatpush.bf16.msra.mxu2 %v4821_v43 }
 0x736   :  { %2619 = vmatpush.bf16.msra.mxu3 %v4808_v56  ;;  %2632 = vmatpush.bf16.msra.mxu0 %v4831_v25 }
 0x796   :  { %v2467_v8 = vpop.f32.mrf.mxu0 }
 0x797   :  { %v2481_v22 = vadd.f32 %v2467_v8, %v4698_v10 }
 0x79b   :  { %v2441_v58 = vpop.f32.mrf.mxu2  ;;  %v2454_v15 = vpop.f32.mrf.mxu3 }
 0x79c   :  { %v2471_v49 = vadd.f32 %v2441_v58, %v4706_v55  ;;  %v2472_v63 = vadd.f32 %v2454_v15, %v4708_v9 }
 0x79e   :  { %v2473_v12 = vmul.f32 0.5, %v2471_v49  ;;  %v2469_v60 = vpop.f32.mrf.mxu0  ;;  %v2474_v28 = vmul.f32 0.5, %v2472_v63 }
 0x7a0   :  { %4207 = vtanh.f32 %v2473_v12 }
 0x7a1   :  { %4209 = vtanh.f32 %v2474_v28 }
 0x7a3   :  { %v2443_v44 = vpop.f32.mrf.mxu2  ;;  %v2456_v26 = vpop.f32.mrf.mxu3 }
 0x7a6   :  { %v4208_v31 = vpop.eup %4207 }
 0x7a7   :  { %v2477_v41 = vmul.f32 0.5, %v4208_v31  ;;  %v4210_v18 = vpop.eup %4209 }
 0x7a8   :  { %v2478_v55 = vmul.f32 0.5, %v4210_v18 }
 0x7a9   :  { %v2479_v21 = vadd.f32 0.5, %v2477_v41 }
 0x7aa   :  { %v2480_v52 = vadd.f32 0.5, %v2478_v55 }
 0x7ab   :  { %v2482_v54 = vmul.f32 %v2481_v22, %v2479_v21 }
 0x7ad   :  { %v2483_v46 = vadd.f32 %v2482_v54, %v4710_v59 }
 0x7af   :  { %4211 = vtanh.f32 %v2483_v46 }
 0x7b5   :  { %v4212_v48 = vpop.eup %4211 }
 0x7b6   :  { %v2485_v62 = vsub.f32 %v2427_v1, %v4212_v48 }
 0x7b8   :  { %v2486_v58 = vmul.f32 %v2485_v62, %v2480_v52 }
 0x7ba   :  { %v2487_v9 = vadd.f32 %v4212_v48, %v2486_v58 }
 0x7bc   :  { %v2491_v15 = vpack.c.bf16 %v2487_v9, %v2487_v9 }
 0x7be   :  { %2500 = vmatmul.bf16.vlgmr.msrb.gmra.mxu1 %v2491_v15  ;;  %2513 = vmatmul.bf16.vlgmr.msrb.gmra.mxu2 %v2491_v15 }
 0x7bf   :  { %2526 = vmatmul.bf16.vlgmr.msrb.gmra.mxu3 %v2491_v15  ;;  %2638 = vmatpush.bf16.msrb.mxu1 %v4755_v7 }
 0x7c0   :  { %2672 = vmatpush.bf16.msrb.mxu2 %v4749_v53  ;;  %2685 = vmatpush.bf16.msrb.mxu3 %v4763_v2 }
 0x7c3   :  { %2639 = vmatpush.bf16.msrb.mxu1 %v4761_v11 }
 0x7c4   :  { %2673 = vmatpush.bf16.msrb.mxu2 %v4752_v3  ;;  %2686 = vmatpush.bf16.msrb.mxu3 %v4773_v16 }
 0x7c7   :  { %2640 = vmatpush.bf16.msrb.mxu1 %v4771_v14 }
 0x7c8   :  { %2674 = vmatpush.bf16.msrb.mxu2 %v4758_v51  ;;  %2687 = vmatpush.bf16.msrb.mxu3 %v4783_v32 }
 0x7cb   :  { %2641 = vmatpush.bf16.msrb.mxu1 %v4781_v40 }
 0x7cc   :  { %2675 = vmatpush.bf16.msrb.mxu2 %v4768_v5  ;;  %2688 = vmatpush.bf16.msrb.mxu3 %v4793_v4 }
 0x7cf   :  { %2642 = vmatpush.bf16.msrb.mxu1 %v4791_v47 }
 0x7d0   :  { %2676 = vmatpush.bf16.msrb.mxu2 %v4778_v0  ;;  %2689 = vmatpush.bf16.msrb.mxu3 %v4803_v61 }
 0x7d3   :  { %2643 = vmatpush.bf16.msrb.mxu1 %v4801_v37 }
 0x7d4   :  { %2677 = vmatpush.bf16.msrb.mxu2 %v4788_v50  ;;  %2690 = vmatpush.bf16.msrb.mxu3 %v4813_v39 }
 0x7d7   :  { %2644 = vmatpush.bf16.msrb.mxu1 %v4811_v57 }
 0x7d8   :  { %2678 = vmatpush.bf16.msrb.mxu2 %v4798_v36  ;;  %2691 = vmatpush.bf16.msrb.mxu3 %v4824_v45 }
 0x7db   :  { %2645 = vmatpush.bf16.msrb.mxu1 %v4821_v43 }
 0x7dc   :  { %2679 = vmatpush.bf16.msrb.mxu2 %v4808_v56  ;;  %2692 = vmatpush.bf16.msrb.mxu3 %v4831_v25 }
 0x83b   :  { %v2501_v59 = vpop.f32.mrf.mxu1 }
 0x83c   :  { %v2531_v1 = vadd.f32 %v2501_v59, %v4713_v6 }
 0x83e   :  { %v2533_v8 = vmul.f32 0.5, %v2531_v1 }
 0x840   :  { %4213 = vtanh.f32 %v2533_v8 }
 0x841   :  { %v2514_v49 = vpop.f32.mrf.mxu2 }
 0x842   :  { %v2532_v12 = vadd.f32 %v2514_v49, %v4717_v38  ;;  %v2527_v60 = vpop.f32.mrf.mxu3 }
 0x843   :  { %v2503_v63 = vpop.f32.mrf.mxu1  ;;  %v2541_v41 = vadd.f32 %v2527_v60, %v4698_v10 }
 0x844   :  { %v2534_v44 = vmul.f32 0.5, %v2532_v12 }
 0x846   :  { %v4214_v26 = vpop.eup %4213  ;;  %4215 = vtanh.f32 %v2534_v44 }
 0x847   :  { %v2537_v28 = vmul.f32 0.5, %v4214_v26 }
 0x849   :  { %v2539_v31 = vadd.f32 0.5, %v2537_v28  ;;  %v2516_v22 = vpop.f32.mrf.mxu2 }
 0x84a   :  { %v2529_v21 = vpop.f32.mrf.mxu3 }
 0x84b   :  { %v2542_v54 = vmul.f32 %v2541_v41, %v2539_v31 }
 0x84c   :  { %v4216_v6 = vpop.eup %4215 }
 0x84d   :  { %v2543_v46 = vadd.f32 %v2542_v54, %v4719_v17  ;;  %v2538_v18 = vmul.f32 0.5, %v4216_v6 }
 0x84f   :  { %4217 = vtanh.f32 %v2543_v46  ;;  %v2540_v48 = vadd.f32 0.5, %v2538_v18 }
 0x855   :  { %v4218_v55 = vpop.eup %4217 }
 0x856   :  { %v2545_v38 = vsub.f32 %v2487_v9, %v4218_v55 }
 0x858   :  { %v2546_v52 = vmul.f32 %v2545_v38, %v2540_v48 }
 0x85a   :  { %v2547_v62 = vadd.f32 %v4218_v55, %v2546_v52 }
 0x85c   :  { %v2551_v58 = vpack.c.bf16 %v2547_v62, %v2547_v62 }
 0x85e   :  { %2560 = vmatmul.bf16.vlgmr.msrb.gmra.mxu0 %v2551_v58  ;;  %2573 = vmatmul.bf16.vlgmr.msra.gmra.mxu1 %v2551_v58 }
 0x85f   :  { %2586 = vmatmul.bf16.vlgmr.msra.gmra.mxu2 %v2551_v58  ;;  %2698 = vmatpush.bf16.msrb.mxu0 %v4755_v7 }
 0x860   :  { %2732 = vmatpush.bf16.msra.mxu1 %v4749_v53  ;;  %2745 = vmatpush.bf16.msra.mxu2 %v4763_v2 }
 0x863   :  { %2699 = vmatpush.bf16.msrb.mxu0 %v4761_v11 }
 0x864   :  { %2733 = vmatpush.bf16.msra.mxu1 %v4752_v3  ;;  %2746 = vmatpush.bf16.msra.mxu2 %v4773_v16 }
 0x867   :  { %2700 = vmatpush.bf16.msrb.mxu0 %v4771_v14 }
 0x868   :  { %2734 = vmatpush.bf16.msra.mxu1 %v4758_v51  ;;  %2747 = vmatpush.bf16.msra.mxu2 %v4783_v32 }
 0x86b   :  { %2701 = vmatpush.bf16.msrb.mxu0 %v4781_v40 }
 0x86c   :  { %2735 = vmatpush.bf16.msra.mxu1 %v4768_v5  ;;  %2748 = vmatpush.bf16.msra.mxu2 %v4793_v4 }
 0x86f   :  { %2702 = vmatpush.bf16.msrb.mxu0 %v4791_v47 }
 0x870   :  { %2736 = vmatpush.bf16.msra.mxu1 %v4778_v0  ;;  %2749 = vmatpush.bf16.msra.mxu2 %v4803_v61 }
 0x873   :  { %2703 = vmatpush.bf16.msrb.mxu0 %v4801_v37 }
 0x874   :  { %2737 = vmatpush.bf16.msra.mxu1 %v4788_v50  ;;  %2750 = vmatpush.bf16.msra.mxu2 %v4813_v39 }
 0x877   :  { %2704 = vmatpush.bf16.msrb.mxu0 %v4811_v57 }
 0x878   :  { %2738 = vmatpush.bf16.msra.mxu1 %v4798_v36  ;;  %2751 = vmatpush.bf16.msra.mxu2 %v4824_v45 }
 0x87b   :  { %2705 = vmatpush.bf16.msrb.mxu0 %v4821_v43 }
 0x87c   :  { %2739 = vmatpush.bf16.msra.mxu1 %v4808_v56  ;;  %2752 = vmatpush.bf16.msra.mxu2 %v4831_v25 }
 0x8db   :  { %v2561_v17 = vpop.f32.mrf.mxu0  ;;  %v2574_v53 = vpop.f32.mrf.mxu1 }
 0x8dc   :  { %v2591_v3 = vadd.f32 %v2561_v17, %v4722_v19  ;;  %v2592_v2 = vadd.f32 %v2574_v53, %v4724_v23 }
 0x8de   :  { %v2593_v51 = vmul.f32 0.5, %v2591_v3  ;;  %v2594_v32 = vmul.f32 0.5, %v2592_v2 }
 0x8e0   :  { %4219 = vtanh.f32 %v2593_v51 }
 0x8e1   :  { %4221 = vtanh.f32 %v2594_v32 }
 0x8e2   :  { %v2587_v5 = vpop.f32.mrf.mxu2 }
 0x8e3   :  { %v2563_v16 = vpop.f32.mrf.mxu0  ;;  %v2576_v0 = vpop.f32.mrf.mxu1  ;;  %v2601_v61 = vadd.f32 %v2587_v5, %v4698_v10 }
 0x8e6   :  { %v4220_v50 = vpop.eup %4219 }
 0x8e7   :  { %v2597_v4 = vmul.f32 0.5, %v4220_v50  ;;  %v4222_v25 = vpop.eup %4221 }
 0x8e8   :  { %v2598_v19 = vmul.f32 0.5, %v4222_v25 }
 0x8e9   :  { %v2599_v36 = vadd.f32 0.5, %v2597_v4 }
 0x8ea   :  { %v2589_v56 = vpop.f32.mrf.mxu2  ;;  %v2600_v15 = vadd.f32 0.5, %v2598_v19 }
 0x8eb   :  { %v2602_v39 = vmul.f32 %v2601_v61, %v2599_v36 }
 0x8ed   :  { %v2603_v45 = vadd.f32 %v2602_v39, %v4726_v24 }
 0x8ef   :  { %4223 = vtanh.f32 %v2603_v45 }
 0x8f5   :  { %v4224_v9 = vpop.eup %4223 }
 0x8f6   :  { %v2605_v23 = vsub.f32 %v2547_v62, %v4224_v9 }
 0x8f8   :  { %v2606_v59 = vmul.f32 %v2605_v23, %v2600_v15 }
 0x8fa   :  { %v2607_v1 = vadd.f32 %v4224_v9, %v2606_v59 }
 0x8fc   :  { %v2611_v8 = vpack.c.bf16 %v2607_v1, %v2607_v1 }
 0x8fe   :  { %2620 = vmatmul.bf16.vlgmr.msra.gmra.mxu3 %v2611_v8  ;;  %2633 = vmatmul.bf16.vlgmr.msra.gmra.mxu0 %v2611_v8 }
 0x8ff   :  { %2646 = vmatmul.bf16.vlgmr.msrb.gmra.mxu1 %v2611_v8  ;;  %2758 = vmatpush.bf16.msra.mxu3 %v4755_v7 }
 0x903   :  { %2759 = vmatpush.bf16.msra.mxu3 %v4761_v11 }
 0x907   :  { %2760 = vmatpush.bf16.msra.mxu3 %v4771_v14 }
 0x90b   :  { %2761 = vmatpush.bf16.msra.mxu3 %v4781_v40 }
 0x90f   :  { %2762 = vmatpush.bf16.msra.mxu3 %v4791_v47 }
 0x913   :  { %2763 = vmatpush.bf16.msra.mxu3 %v4801_v37 }
 0x917   :  { %2764 = vmatpush.bf16.msra.mxu3 %v4811_v57 }
 0x91b   :  { %2765 = vmatpush.bf16.msra.mxu3 %v4821_v43 }
 0x97b   :  { %v2634_v24 = vpop.f32.mrf.mxu0 }
 0x97c   :  { %v2647_v49 = vpop.f32.mrf.mxu1  ;;  %v2652_v14 = vadd.f32 %v2634_v24, %v4731_v29 }
 0x97d   :  { %v2661_v37 = vadd.f32 %v2647_v49, %v4698_v10 }
 0x97e   :  { %v2654_v44 = vmul.f32 0.5, %v2652_v14 }
 0x981   :  { %v2621_v12 = vpop.f32.mrf.mxu3 }
 0x982   :  { %v2651_v60 = vadd.f32 %v2621_v12, %v4729_v27 }
 0x983   :  { %v2636_v7 = vpop.f32.mrf.mxu0 }
 0x984   :  { %v2653_v63 = vmul.f32 0.5, %v2651_v60  ;;  %v2649_v11 = vpop.f32.mrf.mxu1 }
 0x986   :  { %4225 = vtanh.f32 %v2653_v63 }
 0x987   :  { %4227 = vtanh.f32 %v2654_v44 }
 0x989   :  { %v2623_v40 = vpop.f32.mrf.mxu3 }
 0x98c   :  { %v4226_v47 = vpop.eup %4225 }
 0x98d   :  { %v2657_v26 = vmul.f32 0.5, %v4226_v47  ;;  %v4228_v31 = vpop.eup %4227 }
 0x98e   :  { %v2658_v27 = vmul.f32 0.5, %v4228_v31 }
 0x98f   :  { %v2659_v57 = vadd.f32 0.5, %v2657_v26 }
 0x990   :  { %v2660_v22 = vadd.f32 0.5, %v2658_v27 }
 0x991   :  { %v2662_v43 = vmul.f32 %v2661_v37, %v2659_v57 }
 0x993   :  { %v2663_v28 = vadd.f32 %v2662_v43, %v4733_v30 }
 0x995   :  { %4229 = vtanh.f32 %v2663_v28 }
 0x99b   :  { %v4230_v41 = vpop.eup %4229 }
 0x99c   :  { %v2665_v21 = vsub.f32 %v2607_v1, %v4230_v41 }
 0x99e   :  { %v2666_v54 = vmul.f32 %v2665_v21, %v2660_v22 }
 0x9a0   :  { %v2667_v46 = vadd.f32 %v4230_v41, %v2666_v54 }
 0x9a2   :  { %v2671_v29 = vpack.c.bf16 %v2667_v46, %v2667_v46 }
 0x9a4   :  { %2680 = vmatmul.bf16.vlgmr.msrb.gmra.mxu2 %v2671_v29  ;;  %2693 = vmatmul.bf16.vlgmr.msrb.gmra.mxu3 %v2671_v29 }
 0x9a5   :  { %2706 = vmatmul.bf16.vlgmr.msrb.gmra.mxu0 %v2671_v29 }
 0xa22   :  { %v2707_v6 = vpop.f32.mrf.mxu0 }
 0xa23   :  { %v2721_v51 = vadd.f32 %v2707_v6, %v4698_v10 }
 0xa27   :  { %v2681_v18 = vpop.f32.mrf.mxu2  ;;  %v2694_v55 = vpop.f32.mrf.mxu3 }
 0xa28   :  { %v2711_v48 = vadd.f32 %v2681_v18, %v4736_v20  ;;  %v2712_v30 = vadd.f32 %v2694_v55, %v4738_v33 }
 0xa2a   :  { %v2713_v38 = vmul.f32 0.5, %v2711_v48  ;;  %v2709_v52 = vpop.f32.mrf.mxu0  ;;  %v2714_v17 = vmul.f32 0.5, %v2712_v30 }
 0xa2c   :  { %4231 = vtanh.f32 %v2713_v38 }
 0xa2d   :  { %4233 = vtanh.f32 %v2714_v17 }
 0xa2f   :  { %v2683_v62 = vpop.f32.mrf.mxu2  ;;  %v2696_v58 = vpop.f32.mrf.mxu3 }
 0xa32   :  { %v4232_v53 = vpop.eup %4231 }
 0xa33   :  { %v2717_v3 = vmul.f32 0.5, %v4232_v53  ;;  %v4234_v0 = vpop.eup %4233 }
 0xa34   :  { %v2718_v20 = vmul.f32 0.5, %v4234_v0 }
 0xa35   :  { %v2719_v2 = vadd.f32 0.5, %v2717_v3 }
 0xa36   :  { %v2720_v50 = vadd.f32 0.5, %v2718_v20 }
 0xa37   :  { %v2722_v5 = vmul.f32 %v2721_v51, %v2719_v2 }
 0xa39   :  { %v2723_v16 = vadd.f32 %v2722_v5, %v4740_v34 }
 0xa3b   :  { %4235 = vtanh.f32 %v2723_v16 }
 0xa41   :  { %v4236_v32 = vpop.eup %4235 }
 0xa42   :  { %v2725_v4 = vsub.f32 %v2667_v46, %v4236_v32 }
 0xa44   :  { %v2726_v36 = vmul.f32 %v2725_v4, %v2720_v50 }
 0xa46   :  { %v2727_v33 = vadd.f32 %v4236_v32, %v2726_v36 }
 0xa48   :  { %v2731_v61 = vpack.c.bf16 %v2727_v33, %v2727_v33 }
 0xa4a   :  { %2740 = vmatmul.bf16.vlgmr.msra.gmra.mxu1 %v2731_v61  ;;  %2753 = vmatmul.bf16.vlgmr.msra.gmra.mxu2 %v2731_v61 }
 0xa4b   :  { %2766 = vmatmul.bf16.vlgmr.msra.gmra.mxu3 %v2731_v61 }
 0xac7   :  { %v2741_v56 = vpop.f32.mrf.mxu1 }
 0xac8   :  { %v2771_v39 = vadd.f32 %v2741_v56, %v4743_v42 }
 0xaca   :  { %v2773_v45 = vmul.f32 0.5, %v2771_v39 }
 0xacc   :  { %4237 = vtanh.f32 %v2773_v45 }
 0xacd   :  { %v2754_v25 = vpop.f32.mrf.mxu2 }
 0xace   :  { %v2772_v34 = vadd.f32 %v2754_v25, %v4745_v13  ;;  %v2767_v19 = vpop.f32.mrf.mxu3 }
 0xacf   :  { %v2743_v9 = vpop.f32.mrf.mxu1  ;;  %v2781_v8 = vadd.f32 %v2767_v19, %v4698_v10 }
 0xad0   :  { %v2774_v15 = vmul.f32 0.5, %v2772_v34 }
 0xad2   :  { %v4238_v23 = vpop.eup %4237  ;;  %4239 = vtanh.f32 %v2774_v15 }
 0xad3   :  { %v2777_v59 = vmul.f32 0.5, %v4238_v23 }
 0xad5   :  { %v2779_v1 = vadd.f32 0.5, %v2777_v59  ;;  %v2756_v24 = vpop.f32.mrf.mxu2 }
 0xad6   :  { %v2769_v49 = vpop.f32.mrf.mxu3 }
 0xad7   :  { %v2782_v12 = vmul.f32 %v2781_v8, %v2779_v1 }
 0xad8   :  { %v4240_v42 = vpop.eup %4239 }
 0xad9   :  { %v2783_v60 = vadd.f32 %v2782_v12, %v4747_v35  ;;  %v2778_v7 = vmul.f32 0.5, %v4240_v42 }
 0xadb   :  { %4241 = vtanh.f32 %v2783_v60  ;;  %v2780_v11 = vadd.f32 0.5, %v2778_v7 }
 0xae1   :  { %v4242_v63 = vpop.eup %4241 }
 0xae2   :  { %v2785_v13 = vsub.f32 %v2727_v33, %v4242_v63 }
 0xae4   :  { %v2786_v14 = vmul.f32 %v2785_v13, %v2780_v11 }
 0xae6   :  { %v4996_v40 = vadd.f32 %v4242_v63, %v2786_v14 }
 0xae7   :  { %4325 = dma.done.wait [#allocation9 + $0x3], 2048 }
 0xae8   :  { %4326 = vsyncadd [#allocation9 + $0x3], 4294965248  ;;  %v3898_v44 = vld [vmem:[#allocation5 + $0x70] sm:$0xf]  ;;  %v4139_v47 = vld [vmem:[#allocation5 + $0x74] sm:$0xf0]  ;;  %v2791_v15 = vpack.c.bf16 %v4996_v40, %v4996_v40 }
 0xae9   :  { %v4138_v26 = vld [vmem:[#allocation5 + $0x74] sm:$0xf]  ;;  %v3899_v10 = vor.u32 %v4139_v47, %v3898_v44  ;;  %v3900_v37 = vld [vmem:[#allocation5 + $0x78] sm:$0xf0]  ;;  %v3890_v57 = vld [vmem:[#allocation5 + $0x60] sm:$0xf] }
 0xaea   :  { %v4137_v43 = vld [vmem:[#allocation5 + $0x64] sm:$0xf0]  ;;  %v3903_v28 = vor.u32 %v4138_v26, %v3900_v37  ;;  %v4136_v35 = vld [vmem:[#allocation5 + $0x64] sm:$0xf]  ;;  %v3892_v31 = vld [vmem:[#allocation5 + $0x68] sm:$0xf0] }
 0xaeb   :  { %2894 = vmatpush.bf16.msra.mxu0 %v3899_v10  ;;  %v3891_v27 = vor.u32 %v4137_v43, %v3890_v57  ;;  %v3895_v41 = vor.u32 %v4136_v35, %v3892_v31  ;;  %v3882_v22 = vld [vmem:[#allocation5 + $0x50] sm:$0xf]  ;;  %v4135_v21 = vld [vmem:[#allocation5 + $0x54] sm:$0xf0]  ;;  %v4134_v54 = vld [vmem:[#allocation5 + $0x54] sm:$0xf] }
 0xaec   :  { %2907 = vmatpush.bf16.msrb.mxu1 %v3903_v28  ;;  %v3884_v46 = vld [vmem:[#allocation5 + $0x58] sm:$0xf0]  ;;  %v3883_v29 = vor.u32 %v4135_v21, %v3882_v22  ;;  %v3874_v18 = vld [vmem:[#allocation5 + $0x40] sm:$0xf]  ;;  %v4133_v55 = vld [vmem:[#allocation5 + $0x44] sm:$0xf0] }
 0xaed   :  { %v3887_v6 = vor.u32 %v4134_v54, %v3884_v46  ;;  %v4132_v48 = vld [vmem:[#allocation5 + $0x44] sm:$0xf]  ;;  %v3876_v38 = vld [vmem:[#allocation5 + $0x48] sm:$0xf0]  ;;  %v3875_v52 = vor.u32 %v4133_v55, %v3874_v18  ;;  %v3866_v62 = vld [vmem:[#allocation5 + $0x30] sm:$0xf] }
 0xaee   :  { %v3879_v30 = vor.u32 %v4132_v48, %v3876_v38  ;;  %v4131_v58 = vld [vmem:[#allocation5 + $0x34] sm:$0xf0]  ;;  %v4130_v17 = vld [vmem:[#allocation5 + $0x34] sm:$0xf]  ;;  %v3868_v53 = vld [vmem:[#allocation5 + $0x38] sm:$0xf0] }
 0xaef   :  { %2895 = vmatpush.bf16.msra.mxu0 %v3891_v27  ;;  %v3867_v3 = vor.u32 %v4131_v58, %v3866_v62  ;;  %v3871_v51 = vor.u32 %v4130_v17, %v3868_v53  ;;  %v3858_v2 = vld [vmem:[#allocation5 + $0x20] sm:$0xf]  ;;  %v4129_v5 = vld [vmem:[#allocation5 + $0x24] sm:$0xf0]  ;;  %v4128_v16 = vld [vmem:[#allocation5 + $0x24] sm:$0xf] }
 0xaf0   :  { %2908 = vmatpush.bf16.msrb.mxu1 %v3895_v41  ;;  %v3860_v0 = vld [vmem:[#allocation5 + $0x28] sm:$0xf0]  ;;  %v3859_v20 = vor.u32 %v4129_v5, %v3858_v2  ;;  %v3850_v50 = vld [vmem:[#allocation5 + $0x10] sm:$0xf]  ;;  %v4127_v4 = vld [vmem:[#allocation5 + $0x14] sm:$0xf0] }
 0xaf1   :  { %v3863_v32 = vor.u32 %v4128_v16, %v3860_v0  ;;  %v4126_v36 = vld [vmem:[#allocation5 + $0x14] sm:$0xf]  ;;  %v3852_v33 = vld [vmem:[#allocation5 + $0x18] sm:$0xf0]  ;;  %v3851_v61 = vor.u32 %v4127_v4, %v3850_v50  ;;  %v3842_v39 = vld [vmem:[#allocation5] sm:$0xf] }
 0xaf2   :  { %v3855_v56 = vor.u32 %v4126_v36, %v3852_v33  ;;  %v4125_v45 = vld [vmem:[#allocation5 + $0x4] sm:$0xf0]  ;;  %v4124_v25 = vld [vmem:[#allocation5 + $0x4] sm:$0xf]  ;;  %v3844_v34 = vld [vmem:[#allocation5 + $0x8] sm:$0xf0] }
 0xaf3   :  { %2896 = vmatpush.bf16.msra.mxu0 %v3883_v29  ;;  %v3843_v19 = vor.u32 %v4125_v45, %v3842_v39  ;;  %v3847_v9 = vor.u32 %v4124_v25, %v3844_v34  ;;  %v2808_v23 = vld [vmem:[%s5012_s6] sm:$0x3]  ;;  %s4331_s13 = smov [#allocation10]   ;;  %s2932_s7 = sshll.u32 %s5017_s11, 4  ;;  %vm2923_vm0 = vcmask 97280   ;;  %s2933_s7 = int_to_ptr.hbm [resolvable:$true] %s2932_s7 }
 0xaf4   :  { %2909 = vmatpush.bf16.msrb.mxu1 %v3887_v6  ;;  %v2810_v59 = vperm.slane %v2808_v23, 0  ;;  %v2811_v1 = vperm.slane %v2808_v23, 1  ;;  %s2930_s14 = sshll.u32 %s4331_s13, 4  ;;  %s2931_s14 = int_to_ptr.vmem [resolvable:$true] %s2930_s14 }
 0xaf7   :  { %2897 = vmatpush.bf16.msra.mxu0 %v3875_v52 }
 0xaf8   :  { %2910 = vmatpush.bf16.msrb.mxu1 %v3879_v30 }
 0xafb   :  { %2898 = vmatpush.bf16.msra.mxu0 %v3867_v3 }
 0xafc   :  { %2911 = vmatpush.bf16.msrb.mxu1 %v3871_v51 }
 0xaff   :  { %2899 = vmatpush.bf16.msra.mxu0 %v3859_v20 }
 0xb00   :  { %2912 = vmatpush.bf16.msrb.mxu1 %v3863_v32 }
 0xb03   :  { %2900 = vmatpush.bf16.msra.mxu0 %v3851_v61 }
 0xb04   :  { %2913 = vmatpush.bf16.msrb.mxu1 %v3855_v56 }
 0xb07   :  { %2901 = vmatpush.bf16.msra.mxu0 %v3843_v19 }
 0xb08   :  { %2914 = vmatpush.bf16.msrb.mxu1 %v3847_v9 }
 0xb0a   :  { %2902 = vmatmul.bf16.vlgmr.msra.gmra.mxu0 %v2791_v15 }
 0xb0b   :  { %2915 = vmatmul.bf16.vlgmr.msrb.gmra.mxu1 %v2791_v15 }
 0xb87   :  { %v2903_v8 = vpop.f32.mrf.mxu0 }
 0xb88   :  { %v2904_v24 = vadd.f32 %v2903_v8, %v2810_v59  ;;  %v2916_v49 = vpop.f32.mrf.mxu1 }
 0xb89   :  { %v2917_v12 = vadd.f32 %v2916_v49, %v2811_v1 }
 0xb8a   :  { %4243 = vtanh.f32 %v2904_v24 }
 0xb8b   :  { %4245 = vtanh.f32 %v2917_v12 }
 0xb8f   :  { %v2905_v60 = vpop.f32.mrf.mxu0 }
 0xb90   :  { %v4244_v42 = vpop.eup %4243  ;;  %v2918_v7 = vpop.f32.mrf.mxu1 }
 0xb91   :  { %v4246_v63 = vpop.eup %4245  ;;  %2922 = vst [vmem:[#allocation10] sm:$0xff] %v4244_v42 }
 0xb92   :  { %2924 = vst.msk [vmem:[#allocation10 + $0x8] sm:$0xff] %vm2923_vm0, %v4246_v63 }
 0xb93   :  { %2935 = dma.vmem_to_hbm [thread:$0]  %s2931_s14, 256, %s2933_s7, [#allocation11]  }
 0xb94   :  { %4327 = dma.done.wait [#allocation11], 256  }
 0xb95   :  { %4328 = vsyncadd [#allocation11], 4294967040 }
 0xb96   :  { %2940 = vsyncpa [#allocation11], 1 }
 0xb97   :  { %2941 = vsyncmov [#allocation9] }
 0xb9a   :  { %s2942_s6 = vpop.sfrf %2941 }
 0xb9b   :  { %p3904_p0 = scmp.ne.s32.totalorder %s2942_s6, 0 }
 0xb9d   :  { %2946 = shalt.err (%p3904_p0)  }
 0xb9e   :  { %2948 = vsyncmov [#allocation9 + $0x1] }
 0xba1   :  { %s2949_s17 = vpop.sfrf %2948 }
 0xba2   :  { %p3905_p1 = scmp.ne.s32.totalorder %s2949_s17, 0 }
 0xba4   :  { %2953 = shalt.err (%p3905_p1)  }
 0xba5   :  { %2955 = vsyncmov [#allocation9 + $0x2] }
 0xba8   :  { %s2956_s11 = vpop.sfrf %2955 }
 0xba9   :  { %p3906_p2 = scmp.ne.s32.totalorder %s2956_s11, 0 }
 0xbab   :  { %2960 = shalt.err (%p3906_p2)  }
 0xbac   :  { %2962 = vsyncmov [#allocation9 + $0x3] }
 0xbaf   :  { %s2963_s18 = vpop.sfrf %2962 }
 0xbb0   :  { %p3907_p3 = scmp.ne.s32.totalorder %s2963_s18, 0 }
 0xbb2   :  { %2967 = shalt.err (%p3907_p3)  }

</bundles_post_ra>
